<compile_context>
chip_gen: v7x
topology: tpu7x:2x2x1
jax: 0.10.0
libtpu: 0.0.40
codegen_flags: <defaults>
</compile_context>

<pallas_src>
import numpy as np

import jax
import jax.numpy as jnp
from jax import lax
from jax.experimental import pallas as pl

# ----------------------------- config (small) -------------------------------
SEQ = 8
D_MODEL = 128
N_HEADS = 4
HEAD_DIM = D_MODEL // N_HEADS          # 32
D_FF = 256
N_LAYERS = 2
VOCAB = 256
EPS = 1e-5
OPTIONS = ("A", "B", "C", "D")
# TODO(synk): real module uses a SentencePiece tokenizer; option token ids here
# are synthetic (ASCII codes), consistent with the synthetic vocab.
OPTION_TOKEN_IDS = {opt: ord(opt) for opt in OPTIONS}   # 65..68 < VOCAB
OPTION_IDS = tuple(OPTION_TOKEN_IDS[o] for o in OPTIONS)


# ------------------------------ fused kernel ---------------------------------
def fused_llama_kernel(ids_ref, emb_ref, cos_ref, sin_ref,
                       attn_norm_ref, wqkv_ref, wo_ref,
                       ffn_norm_ref, w13_ref, w2_ref,
                       head_norm_ref, w_head_ref, o_ref):
    """Whole model in one invocation; every ref is a whole-array VMEM block."""
    f32 = jnp.float32

    # ---- embedding: one-hot matmul against the VMEM-resident table.
    # TODO(synk): for a realistic vocab size, replace with a scalar-prefetch
    # row gather; the one-hot matmul is only reasonable at VOCAB=256.
    ids = ids_ref[...]                                            # (S, 1) int32
    vocab_iota = lax.broadcasted_iota(jnp.int32, (SEQ, VOCAB), 1)
    onehot = (vocab_iota == ids).astype(f32)
    x = jnp.dot(onehot, emb_ref[...], preferred_element_type=f32)  # (S, D)

    cos = cos_ref[...]                                            # (S, hd)
    sin = sin_ref[...]                                            # sign-folded
    row = lax.broadcasted_iota(jnp.int32, (SEQ, SEQ), 0)
    col = lax.broadcasted_iota(jnp.int32, (SEQ, SEQ), 1)
    causal = col <= row
    scale = 1.0 / (HEAD_DIM ** 0.5)
    half = HEAD_DIM // 2

    def rmsnorm(t, w):                                            # t f32, w (1, D)
        var = jnp.mean(t * t, axis=-1, keepdims=True)
        return t * lax.rsqrt(var + EPS) * w

    def rope(t):                                                  # (S, hd)
        rolled = jnp.concatenate([t[:, half:], t[:, :half]], axis=-1)
        return t * cos + rolled * sin                             # sign in table

    for l in range(N_LAYERS):                                     # static unroll
        # ---------------- attention block (fused QKV, residual folded) -------
        h = rmsnorm(x, attn_norm_ref[l])
        qkv = jnp.dot(h, wqkv_ref[l], preferred_element_type=f32)  # (S, 3D)
        heads = []
        for n in range(N_HEADS):                                   # static slices
            lo = n * HEAD_DIM
            q = rope(qkv[:, lo:lo + HEAD_DIM])
            k = rope(qkv[:, D_MODEL + lo:D_MODEL + lo + HEAD_DIM])
            v = qkv[:, 2 * D_MODEL + lo:2 * D_MODEL + lo + HEAD_DIM]
            s = jnp.dot(q, k.T, preferred_element_type=f32) * scale   # (S, S)
            s = jnp.where(causal, s, -1e30)                           # finite mask
            s = s - jnp.max(s, axis=-1, keepdims=True)
            p = jnp.exp(s)
            p = p / jnp.sum(p, axis=-1, keepdims=True)
            heads.append(jnp.dot(p, v, preferred_element_type=f32))   # (S, hd)
        attn = jnp.concatenate(heads, axis=-1)                        # (S, D)
        x = x + jnp.dot(attn, wo_ref[l], preferred_element_type=f32)

        # ---------------- SwiGLU FFN block (fused w1/w3, residual folded) ----
        h = rmsnorm(x, ffn_norm_ref[l])
        gu = jnp.dot(h, w13_ref[l], preferred_element_type=f32)       # (S, 2F)
        g = gu[:, :D_FF]
        u = gu[:, D_FF:]
        ff = g * (1.0 / (1.0 + jnp.exp(-g))) * u                      # silu(g)*u
        x = x + jnp.dot(ff, w2_ref[l], preferred_element_type=f32)

    # ---- head: RMSNorm of the last token only, then project to the vocab.
    last = x[SEQ - 1:SEQ, :]                                          # (1, D)
    xn = rmsnorm(last, head_norm_ref[...])
    o_ref[...] = jnp.dot(xn, w_head_ref[...],
                         preferred_element_type=f32).astype(o_ref.dtype)


# ------------------------------ jitted wrapper --------------------------------
@jax.jit
def forward(params, tokens, r_cos, r_sin):
    """One pallas_call for the whole model; returns (logits[V], option_probs[4])."""
    ids = tokens.reshape(SEQ, 1).astype(jnp.int32)
    half = HEAD_DIM // 2
    # Fold the rotate-half sign into the sin table: rope = t*cos + roll(t)*sin_signed.
    sin_signed = jnp.concatenate([-r_sin[:, :half], r_sin[:, half:]], axis=-1)

    logits = pl.pallas_call(
        fused_llama_kernel,
        out_shape=jax.ShapeDtypeStruct((1, VOCAB), jnp.float32),
    )(ids, params["tok_embeddings"], r_cos, sin_signed,
      params["attn_norm"], params["wqkv"], params["wo"],
      params["ffn_norm"], params["w13"], params["w2"],
      params["head_norm"], params["w_head"])[0]                       # (V,)

    option_logits = logits[jnp.array(OPTION_IDS, dtype=jnp.int32)]
    probs = jax.nn.softmax(option_logits, axis=-1)
    return logits, probs


def mmlu_forward(params, tokens, r_cos, r_sin):
    _, probs = forward(params, tokens, r_cos, r_sin)
    probs = np.asarray(jax.block_until_ready(probs))
    scores = {opt: float(probs[i]) for i, opt in enumerate(OPTIONS)}
    actual = max(scores, key=scores.get)
    return scores, actual


# --------------------------- pure-JAX reference -------------------------------
def reference_logits(params, tokens, r_cos, r_sin):
    hp = lax.Precision.HIGHEST
    half = HEAD_DIM // 2
    sin_signed = jnp.concatenate([-r_sin[:, :half], r_sin[:, half:]], axis=-1)
    causal = jnp.tril(jnp.ones((SEQ, SEQ), bool))

    def rms(t, w):
        return t * lax.rsqrt(jnp.mean(t * t, axis=-1, keepdims=True) + EPS) * w

    def rope(t):
        rolled = jnp.concatenate([t[..., half:], t[..., :half]], axis=-1)
        return t * r_cos + rolled * sin_signed

    x = params["tok_embeddings"][tokens]
    for l in range(N_LAYERS):
        h = rms(x, params["attn_norm"][l])
        qkv = jnp.dot(h, params["wqkv"][l], precision=hp)
        q, k, v = jnp.split(qkv, 3, axis=-1)
        q = rope(q.reshape(SEQ, N_HEADS, HEAD_DIM).transpose(1, 0, 2))
        k = rope(k.reshape(SEQ, N_HEADS, HEAD_DIM).transpose(1, 0, 2))
        v = v.reshape(SEQ, N_HEADS, HEAD_DIM).transpose(1, 0, 2)
        s = jnp.einsum("hqd,hkd->hqk", q, k, precision=hp) / (HEAD_DIM ** 0.5)
        s = jnp.where(causal[None], s, -1e30)
        s = s - s.max(-1, keepdims=True)
        p = jnp.exp(s)
        p = p / p.sum(-1, keepdims=True)
        a = jnp.einsum("hqk,hkd->hqd", p, v, precision=hp)
        a = a.transpose(1, 0, 2).reshape(SEQ, D_MODEL)
        x = x + jnp.dot(a, params["wo"][l], precision=hp)
        h = rms(x, params["ffn_norm"][l])
        gu = jnp.dot(h, params["w13"][l], precision=hp)
        g, u = gu[:, :D_FF], gu[:, D_FF:]
        x = x + jnp.dot(g * jax.nn.sigmoid(g) * u, params["w2"][l], precision=hp)
    xn = rms(x[-1:], params["head_norm"])
    return jnp.dot(xn, params["w_head"], precision=hp)[0]


# ------------------------------ parameter init --------------------------------
def init_params(key):
    # TODO(synk): a real run loads consolidated.00.pth weights; synthetic here.
    # (bf16 weight storage would halve DMA/VMEM on v6e/v7x; kept f32 at this size.)
    scale = 0.02
    ks = jax.random.split(key, 6)

    def rnd(k, shape):
        return scale * jax.random.normal(k, shape, jnp.float32)

    return {
        "tok_embeddings": rnd(ks[0], (VOCAB, D_MODEL)),
        "attn_norm": jnp.ones((N_LAYERS, 1, D_MODEL), jnp.float32),
        "ffn_norm": jnp.ones((N_LAYERS, 1, D_MODEL), jnp.float32),
        "wqkv": rnd(ks[1], (N_LAYERS, D_MODEL, 3 * D_MODEL)),   # wq|wk|wv fused
        "wo": rnd(ks[2], (N_LAYERS, D_MODEL, D_MODEL)),
        "w13": rnd(ks[3], (N_LAYERS, D_MODEL, 2 * D_FF)),       # w1|w3 fused
        "w2": rnd(ks[4], (N_LAYERS, D_FF, D_MODEL)),
        "head_norm": jnp.ones((1, D_MODEL), jnp.float32),
        "w_head": rnd(ks[5], (D_MODEL, VOCAB)),
    }


# ----------------------------------- main -------------------------------------
if __name__ == "__main__":
    root = jax.random.PRNGKey(0)
    k_params, k_tok = jax.random.split(root)
    params = init_params(k_params)

    tokens = jax.random.randint(k_tok, (SEQ,), 0, VOCAB, dtype=jnp.int32)

    # RoPE tables, rotate-half (GPT-NeoX) convention, shape (S, head_dim).
    pos = jnp.arange(SEQ, dtype=jnp.float32)[:, None]
    inv_freq = 1.0 / (10000.0 ** (jnp.arange(0, HEAD_DIM, 2, dtype=jnp.float32) / HEAD_DIM))
    angles = pos * inv_freq[None, :]                          # (S, hd/2)
    r_cos = jnp.concatenate([jnp.cos(angles), jnp.cos(angles)], axis=-1)
    r_sin = jnp.concatenate([jnp.sin(angles), jnp.sin(angles)], axis=-1)

    # Run the fused kernel and check against a pure-JAX reference.
    kernel_logits, _ = forward(params, tokens, r_cos, r_sin)
    kernel_logits = jax.block_until_ready(kernel_logits)
    ref_logits = jax.block_until_ready(reference_logits(params, tokens, r_cos, r_sin))
    np.testing.assert_allclose(np.asarray(kernel_logits), np.asarray(ref_logits),
                               rtol=1e-2, atol=1e-2)

    scores, actual = mmlu_forward(params, tokens, r_cos, r_sin)

    total = sum(scores.values())
    assert abs(total - 1.0) < 1e-4, f"softmax scores do not sum to 1: {total}"
    assert actual in OPTIONS
    print("KERNEL_OK")
</pallas_src>

<mosaic_0001>
module attributes {stable_mosaic.version = 11 : i64} {
  func.func @fused_llama_kernel(%arg0: memref<8x1xi32, #tpu.memory_space<vmem>>, %arg1: memref<256x128xf32, #tpu.memory_space<vmem>>, %arg2: memref<8x32xf32, #tpu.memory_space<vmem>>, %arg3: memref<8x32xf32, #tpu.memory_space<vmem>>, %arg4: memref<2x1x128xf32, #tpu.memory_space<vmem>>, %arg5: memref<2x128x384xf32, #tpu.memory_space<vmem>>, %arg6: memref<2x128x128xf32, #tpu.memory_space<vmem>>, %arg7: memref<2x1x128xf32, #tpu.memory_space<vmem>>, %arg8: memref<2x128x512xf32, #tpu.memory_space<vmem>>, %arg9: memref<2x256x128xf32, #tpu.memory_space<vmem>>, %arg10: memref<1x128xf32, #tpu.memory_space<vmem>>, %arg11: memref<128x256xf32, #tpu.memory_space<vmem>>, %arg12: memref<1x256xf32, #tpu.memory_space<vmem>>) attributes {dimension_semantics = [], scalar_prefetch = 0 : i64, scratch_operands = 0 : i64, tpu.core_type = #tpu.core_type<tc>} {
    %c0 = arith.constant 0 : index
    %c0_0 = arith.constant 0 : index
    %0 = vector.load %arg0[%c0, %c0_0] : memref<8x1xi32, #tpu.memory_space<vmem>>, vector<8x1xi32>
    %1 = tpu.iota {dimensions = array<i32: 1>} : vector<8x256xi32>
    %2 = vector.broadcast %0 : vector<8x1xi32> to vector<8x256xi32>
    %3 = arith.cmpi eq, %1, %2 : vector<8x256xi32>
    %4 = arith.extui %3 : vector<8x256xi1> to vector<8x256xi32>
    %5 = arith.sitofp %4 : vector<8x256xi32> to vector<8x256xf32>
    %c0_1 = arith.constant 0 : index
    %c0_2 = arith.constant 0 : index
    %6 = vector.load %arg1[%c0_1, %c0_2] : memref<256x128xf32, #tpu.memory_space<vmem>>, vector<256x128xf32>
    %cst = arith.constant dense<0.000000e+00> : vector<8x128xf32>
    %7 = tpu.matmul %5, %6, %cst {dimension_numbers = #tpu.dot_dimension_numbers<[1], [0], [0], [1], [0, 0, 1, 1], [], []>} : vector<8x256xf32>, vector<256x128xf32>, vector<8x128xf32> -> vector<8x128xf32>
    %c0_3 = arith.constant 0 : index
    %c0_4 = arith.constant 0 : index
    %8 = vector.load %arg2[%c0_3, %c0_4] : memref<8x32xf32, #tpu.memory_space<vmem>>, vector<8x32xf32>
    %c0_5 = arith.constant 0 : index
    %c0_6 = arith.constant 0 : index
    %9 = vector.load %arg3[%c0_5, %c0_6] : memref<8x32xf32, #tpu.memory_space<vmem>>, vector<8x32xf32>
    %10 = tpu.iota {dimensions = array<i32: 0>} : vector<8x8xi32>
    %11 = tpu.iota {dimensions = array<i32: 1>} : vector<8x8xi32>
    %12 = arith.cmpi sle, %11, %10 : vector<8x8xi32>
    %c0_7 = arith.constant 0 : index
    %c0_8 = arith.constant 0 : index
    %c0_9 = arith.constant 0 : index
    %13 = vector.load %arg4[%c0_7, %c0_8, %c0_9] : memref<2x1x128xf32, #tpu.memory_space<vmem>>, vector<1x1x128xf32>
    %14 = vector.shape_cast %13 : vector<1x1x128xf32> to vector<1x128xf32>
    %15 = arith.mulf %7, %7 : vector<8x128xf32>
    %cst_10 = arith.constant dense<0.000000e+00> : vector<8xf32>
    %16 = vector.multi_reduction <add>, %15, %cst_10 [1] : vector<8x128xf32> to vector<8xf32>
    %17 = vector.shape_cast %16 : vector<8xf32> to vector<8x1xf32>
    %cst_11 = arith.constant 1.280000e+02 : f32
    %18 = vector.broadcast %cst_11 : f32 to vector<8x1xf32>
    %19 = arith.divf %17, %18 : vector<8x1xf32>
    %cst_12 = arith.constant 9.99999974E-6 : f32
    %20 = vector.broadcast %cst_12 : f32 to vector<8x1xf32>
    %21 = arith.addf %19, %20 : vector<8x1xf32>
    %22 = math.rsqrt %21 : vector<8x1xf32>
    %23 = vector.broadcast %22 : vector<8x1xf32> to vector<8x128xf32>
    %24 = arith.mulf %7, %23 : vector<8x128xf32>
    %25 = vector.broadcast %14 : vector<1x128xf32> to vector<8x128xf32>
    %26 = arith.mulf %24, %25 : vector<8x128xf32>
    %c0_13 = arith.constant 0 : index
    %c0_14 = arith.constant 0 : index
    %c0_15 = arith.constant 0 : index
    %27 = vector.load %arg5[%c0_13, %c0_14, %c0_15] : memref<2x128x384xf32, #tpu.memory_space<vmem>>, vector<1x128x384xf32>
    %28 = vector.shape_cast %27 : vector<1x128x384xf32> to vector<128x384xf32>
    %cst_16 = arith.constant dense<0.000000e+00> : vector<8x384xf32>
    %29 = tpu.matmul %26, %28, %cst_16 {dimension_numbers = #tpu.dot_dimension_numbers<[1], [0], [0], [1], [0, 0, 1, 1], [], []>} : vector<8x128xf32>, vector<128x384xf32>, vector<8x384xf32> -> vector<8x384xf32>
    %30 = vector.extract_strided_slice %29 {offsets = [0, 0], sizes = [8, 32], strides = [1, 1]} : vector<8x384xf32> to vector<8x32xf32>
    %31 = vector.extract_strided_slice %30 {offsets = [0, 16], sizes = [8, 16], strides = [1, 1]} : vector<8x32xf32> to vector<8x16xf32>
    %32 = vector.extract_strided_slice %30 {offsets = [0, 0], sizes = [8, 16], strides = [1, 1]} : vector<8x32xf32> to vector<8x16xf32>
    %33 = tpu.concatenate %31, %32 in 1 : vector<8x16xf32>, vector<8x16xf32> -> vector<8x32xf32>
    %34 = arith.mulf %30, %8 : vector<8x32xf32>
    %35 = arith.mulf %33, %9 : vector<8x32xf32>
    %36 = arith.addf %34, %35 : vector<8x32xf32>
    %37 = vector.extract_strided_slice %29 {offsets = [0, 128], sizes = [8, 32], strides = [1, 1]} : vector<8x384xf32> to vector<8x32xf32>
    %38 = vector.extract_strided_slice %37 {offsets = [0, 16], sizes = [8, 16], strides = [1, 1]} : vector<8x32xf32> to vector<8x16xf32>
    %39 = vector.extract_strided_slice %37 {offsets = [0, 0], sizes = [8, 16], strides = [1, 1]} : vector<8x32xf32> to vector<8x16xf32>
    %40 = tpu.concatenate %38, %39 in 1 : vector<8x16xf32>, vector<8x16xf32> -> vector<8x32xf32>
    %41 = arith.mulf %37, %8 : vector<8x32xf32>
    %42 = arith.mulf %40, %9 : vector<8x32xf32>
    %43 = arith.addf %41, %42 : vector<8x32xf32>
    %44 = vector.extract_strided_slice %29 {offsets = [0, 256], sizes = [8, 32], strides = [1, 1]} : vector<8x384xf32> to vector<8x32xf32>
    %45 = tpu.transpose %43, [1, 0] : vector<8x32xf32> -> vector<32x8xf32>
    %cst_17 = arith.constant dense<0.000000e+00> : vector<8x8xf32>
    %46 = tpu.matmul %36, %45, %cst_17 {dimension_numbers = #tpu.dot_dimension_numbers<[1], [0], [0], [1], [0, 0, 1, 1], [], []>} : vector<8x32xf32>, vector<32x8xf32>, vector<8x8xf32> -> vector<8x8xf32>
    %cst_18 = arith.constant 0.176776692 : f32
    %47 = vector.broadcast %cst_18 : f32 to vector<8x8xf32>
    %48 = arith.mulf %46, %47 : vector<8x8xf32>
    %cst_19 = arith.constant -1.000000e+30 : f32
    %49 = vector.broadcast %cst_19 : f32 to vector<8x8xf32>
    %50 = arith.select %12, %48, %49 : vector<8x8xi1>, vector<8x8xf32>
    %cst_20 = arith.constant dense<0xFF800000> : vector<8xf32>
    %51 = vector.multi_reduction <maximumf>, %50, %cst_20 [1] : vector<8x8xf32> to vector<8xf32>
    %52 = vector.shape_cast %51 : vector<8xf32> to vector<8x1xf32>
    %53 = vector.broadcast %52 : vector<8x1xf32> to vector<8x8xf32>
    %54 = arith.subf %50, %53 : vector<8x8xf32>
    %55 = math.exp %54 : vector<8x8xf32>
    %cst_21 = arith.constant dense<0.000000e+00> : vector<8xf32>
    %56 = vector.multi_reduction <add>, %55, %cst_21 [1] : vector<8x8xf32> to vector<8xf32>
    %57 = vector.shape_cast %56 : vector<8xf32> to vector<8x1xf32>
    %58 = vector.broadcast %57 : vector<8x1xf32> to vector<8x8xf32>
    %59 = arith.divf %55, %58 : vector<8x8xf32>
    %cst_22 = arith.constant dense<0.000000e+00> : vector<8x32xf32>
    %60 = tpu.matmul %59, %44, %cst_22 {dimension_numbers = #tpu.dot_dimension_numbers<[1], [0], [0], [1], [0, 0, 1, 1], [], []>} : vector<8x8xf32>, vector<8x32xf32>, vector<8x32xf32> -> vector<8x32xf32>
    %61 = vector.extract_strided_slice %29 {offsets = [0, 32], sizes = [8, 32], strides = [1, 1]} : vector<8x384xf32> to vector<8x32xf32>
    %62 = vector.extract_strided_slice %61 {offsets = [0, 16], sizes = [8, 16], strides = [1, 1]} : vector<8x32xf32> to vector<8x16xf32>
    %63 = vector.extract_strided_slice %61 {offsets = [0, 0], sizes = [8, 16], strides = [1, 1]} : vector<8x32xf32> to vector<8x16xf32>
    %64 = tpu.concatenate %62, %63 in 1 : vector<8x16xf32>, vector<8x16xf32> -> vector<8x32xf32>
    %65 = arith.mulf %61, %8 : vector<8x32xf32>
    %66 = arith.mulf %64, %9 : vector<8x32xf32>
    %67 = arith.addf %65, %66 : vector<8x32xf32>
    %68 = vector.extract_strided_slice %29 {offsets = [0, 160], sizes = [8, 32], strides = [1, 1]} : vector<8x384xf32> to vector<8x32xf32>
    %69 = vector.extract_strided_slice %68 {offsets = [0, 16], sizes = [8, 16], strides = [1, 1]} : vector<8x32xf32> to vector<8x16xf32>
    %70 = vector.extract_strided_slice %68 {offsets = [0, 0], sizes = [8, 16], strides = [1, 1]} : vector<8x32xf32> to vector<8x16xf32>
    %71 = tpu.concatenate %69, %70 in 1 : vector<8x16xf32>, vector<8x16xf32> -> vector<8x32xf32>
    %72 = arith.mulf %68, %8 : vector<8x32xf32>
    %73 = arith.mulf %71, %9 : vector<8x32xf32>
    %74 = arith.addf %72, %73 : vector<8x32xf32>
    %75 = vector.extract_strided_slice %29 {offsets = [0, 288], sizes = [8, 32], strides = [1, 1]} : vector<8x384xf32> to vector<8x32xf32>
    %76 = tpu.transpose %74, [1, 0] : vector<8x32xf32> -> vector<32x8xf32>
    %cst_23 = arith.constant dense<0.000000e+00> : vector<8x8xf32>
    %77 = tpu.matmul %67, %76, %cst_23 {dimension_numbers = #tpu.dot_dimension_numbers<[1], [0], [0], [1], [0, 0, 1, 1], [], []>} : vector<8x32xf32>, vector<32x8xf32>, vector<8x8xf32> -> vector<8x8xf32>
    %cst_24 = arith.constant 0.176776692 : f32
    %78 = vector.broadcast %cst_24 : f32 to vector<8x8xf32>
    %79 = arith.mulf %77, %78 : vector<8x8xf32>
    %cst_25 = arith.constant -1.000000e+30 : f32
    %80 = vector.broadcast %cst_25 : f32 to vector<8x8xf32>
    %81 = arith.select %12, %79, %80 : vector<8x8xi1>, vector<8x8xf32>
    %cst_26 = arith.constant dense<0xFF800000> : vector<8xf32>
    %82 = vector.multi_reduction <maximumf>, %81, %cst_26 [1] : vector<8x8xf32> to vector<8xf32>
    %83 = vector.shape_cast %82 : vector<8xf32> to vector<8x1xf32>
    %84 = vector.broadcast %83 : vector<8x1xf32> to vector<8x8xf32>
    %85 = arith.subf %81, %84 : vector<8x8xf32>
    %86 = math.exp %85 : vector<8x8xf32>
    %cst_27 = arith.constant dense<0.000000e+00> : vector<8xf32>
    %87 = vector.multi_reduction <add>, %86, %cst_27 [1] : vector<8x8xf32> to vector<8xf32>
    %88 = vector.shape_cast %87 : vector<8xf32> to vector<8x1xf32>
    %89 = vector.broadcast %88 : vector<8x1xf32> to vector<8x8xf32>
    %90 = arith.divf %86, %89 : vector<8x8xf32>
    %cst_28 = arith.constant dense<0.000000e+00> : vector<8x32xf32>
    %91 = tpu.matmul %90, %75, %cst_28 {dimension_numbers = #tpu.dot_dimension_numbers<[1], [0], [0], [1], [0, 0, 1, 1], [], []>} : vector<8x8xf32>, vector<8x32xf32>, vector<8x32xf32> -> vector<8x32xf32>
    %92 = vector.extract_strided_slice %29 {offsets = [0, 64], sizes = [8, 32], strides = [1, 1]} : vector<8x384xf32> to vector<8x32xf32>
    %93 = vector.extract_strided_slice %92 {offsets = [0, 16], sizes = [8, 16], strides = [1, 1]} : vector<8x32xf32> to vector<8x16xf32>
    %94 = vector.extract_strided_slice %92 {offsets = [0, 0], sizes = [8, 16], strides = [1, 1]} : vector<8x32xf32> to vector<8x16xf32>
    %95 = tpu.concatenate %93, %94 in 1 : vector<8x16xf32>, vector<8x16xf32> -> vector<8x32xf32>
    %96 = arith.mulf %92, %8 : vector<8x32xf32>
    %97 = arith.mulf %95, %9 : vector<8x32xf32>
    %98 = arith.addf %96, %97 : vector<8x32xf32>
    %99 = vector.extract_strided_slice %29 {offsets = [0, 192], sizes = [8, 32], strides = [1, 1]} : vector<8x384xf32> to vector<8x32xf32>
    %100 = vector.extract_strided_slice %99 {offsets = [0, 16], sizes = [8, 16], strides = [1, 1]} : vector<8x32xf32> to vector<8x16xf32>
    %101 = vector.extract_strided_slice %99 {offsets = [0, 0], sizes = [8, 16], strides = [1, 1]} : vector<8x32xf32> to vector<8x16xf32>
    %102 = tpu.concatenate %100, %101 in 1 : vector<8x16xf32>, vector<8x16xf32> -> vector<8x32xf32>
    %103 = arith.mulf %99, %8 : vector<8x32xf32>
    %104 = arith.mulf %102, %9 : vector<8x32xf32>
    %105 = arith.addf %103, %104 : vector<8x32xf32>
    %106 = vector.extract_strided_slice %29 {offsets = [0, 320], sizes = [8, 32], strides = [1, 1]} : vector<8x384xf32> to vector<8x32xf32>
    %107 = tpu.transpose %105, [1, 0] : vector<8x32xf32> -> vector<32x8xf32>
    %cst_29 = arith.constant dense<0.000000e+00> : vector<8x8xf32>
    %108 = tpu.matmul %98, %107, %cst_29 {dimension_numbers = #tpu.dot_dimension_numbers<[1], [0], [0], [1], [0, 0, 1, 1], [], []>} : vector<8x32xf32>, vector<32x8xf32>, vector<8x8xf32> -> vector<8x8xf32>
    %cst_30 = arith.constant 0.176776692 : f32
    %109 = vector.broadcast %cst_30 : f32 to vector<8x8xf32>
    %110 = arith.mulf %108, %109 : vector<8x8xf32>
    %cst_31 = arith.constant -1.000000e+30 : f32
    %111 = vector.broadcast %cst_31 : f32 to vector<8x8xf32>
    %112 = arith.select %12, %110, %111 : vector<8x8xi1>, vector<8x8xf32>
    %cst_32 = arith.constant dense<0xFF800000> : vector<8xf32>
    %113 = vector.multi_reduction <maximumf>, %112, %cst_32 [1] : vector<8x8xf32> to vector<8xf32>
    %114 = vector.shape_cast %113 : vector<8xf32> to vector<8x1xf32>
    %115 = vector.broadcast %114 : vector<8x1xf32> to vector<8x8xf32>
    %116 = arith.subf %112, %115 : vector<8x8xf32>
    %117 = math.exp %116 : vector<8x8xf32>
    %cst_33 = arith.constant dense<0.000000e+00> : vector<8xf32>
    %118 = vector.multi_reduction <add>, %117, %cst_33 [1] : vector<8x8xf32> to vector<8xf32>
    %119 = vector.shape_cast %118 : vector<8xf32> to vector<8x1xf32>
    %120 = vector.broadcast %119 : vector<8x1xf32> to vector<8x8xf32>
    %121 = arith.divf %117, %120 : vector<8x8xf32>
    %cst_34 = arith.constant dense<0.000000e+00> : vector<8x32xf32>
    %122 = tpu.matmul %121, %106, %cst_34 {dimension_numbers = #tpu.dot_dimension_numbers<[1], [0], [0], [1], [0, 0, 1, 1], [], []>} : vector<8x8xf32>, vector<8x32xf32>, vector<8x32xf32> -> vector<8x32xf32>
    %123 = vector.extract_strided_slice %29 {offsets = [0, 96], sizes = [8, 32], strides = [1, 1]} : vector<8x384xf32> to vector<8x32xf32>
    %124 = vector.extract_strided_slice %123 {offsets = [0, 16], sizes = [8, 16], strides = [1, 1]} : vector<8x32xf32> to vector<8x16xf32>
    %125 = vector.extract_strided_slice %123 {offsets = [0, 0], sizes = [8, 16], strides = [1, 1]} : vector<8x32xf32> to vector<8x16xf32>
    %126 = tpu.concatenate %124, %125 in 1 : vector<8x16xf32>, vector<8x16xf32> -> vector<8x32xf32>
    %127 = arith.mulf %123, %8 : vector<8x32xf32>
    %128 = arith.mulf %126, %9 : vector<8x32xf32>
    %129 = arith.addf %127, %128 : vector<8x32xf32>
    %130 = vector.extract_strided_slice %29 {offsets = [0, 224], sizes = [8, 32], strides = [1, 1]} : vector<8x384xf32> to vector<8x32xf32>
    %131 = vector.extract_strided_slice %130 {offsets = [0, 16], sizes = [8, 16], strides = [1, 1]} : vector<8x32xf32> to vector<8x16xf32>
    %132 = vector.extract_strided_slice %130 {offsets = [0, 0], sizes = [8, 16], strides = [1, 1]} : vector<8x32xf32> to vector<8x16xf32>
    %133 = tpu.concatenate %131, %132 in 1 : vector<8x16xf32>, vector<8x16xf32> -> vector<8x32xf32>
    %134 = arith.mulf %130, %8 : vector<8x32xf32>
    %135 = arith.mulf %133, %9 : vector<8x32xf32>
    %136 = arith.addf %134, %135 : vector<8x32xf32>
    %137 = vector.extract_strided_slice %29 {offsets = [0, 352], sizes = [8, 32], strides = [1, 1]} : vector<8x384xf32> to vector<8x32xf32>
    %138 = tpu.transpose %136, [1, 0] : vector<8x32xf32> -> vector<32x8xf32>
    %cst_35 = arith.constant dense<0.000000e+00> : vector<8x8xf32>
    %139 = tpu.matmul %129, %138, %cst_35 {dimension_numbers = #tpu.dot_dimension_numbers<[1], [0], [0], [1], [0, 0, 1, 1], [], []>} : vector<8x32xf32>, vector<32x8xf32>, vector<8x8xf32> -> vector<8x8xf32>
    %cst_36 = arith.constant 0.176776692 : f32
    %140 = vector.broadcast %cst_36 : f32 to vector<8x8xf32>
    %141 = arith.mulf %139, %140 : vector<8x8xf32>
    %cst_37 = arith.constant -1.000000e+30 : f32
    %142 = vector.broadcast %cst_37 : f32 to vector<8x8xf32>
    %143 = arith.select %12, %141, %142 : vector<8x8xi1>, vector<8x8xf32>
    %cst_38 = arith.constant dense<0xFF800000> : vector<8xf32>
    %144 = vector.multi_reduction <maximumf>, %143, %cst_38 [1] : vector<8x8xf32> to vector<8xf32>
    %145 = vector.shape_cast %144 : vector<8xf32> to vector<8x1xf32>
    %146 = vector.broadcast %145 : vector<8x1xf32> to vector<8x8xf32>
    %147 = arith.subf %143, %146 : vector<8x8xf32>
    %148 = math.exp %147 : vector<8x8xf32>
    %cst_39 = arith.constant dense<0.000000e+00> : vector<8xf32>
    %149 = vector.multi_reduction <add>, %148, %cst_39 [1] : vector<8x8xf32> to vector<8xf32>
    %150 = vector.shape_cast %149 : vector<8xf32> to vector<8x1xf32>
    %151 = vector.broadcast %150 : vector<8x1xf32> to vector<8x8xf32>
    %152 = arith.divf %148, %151 : vector<8x8xf32>
    %cst_40 = arith.constant dense<0.000000e+00> : vector<8x32xf32>
    %153 = tpu.matmul %152, %137, %cst_40 {dimension_numbers = #tpu.dot_dimension_numbers<[1], [0], [0], [1], [0, 0, 1, 1], [], []>} : vector<8x8xf32>, vector<8x32xf32>, vector<8x32xf32> -> vector<8x32xf32>
    %154 = tpu.concatenate %60, %91, %122, %153 in 1 : vector<8x32xf32>, vector<8x32xf32>, vector<8x32xf32>, vector<8x32xf32> -> vector<8x128xf32>
    %c0_41 = arith.constant 0 : index
    %c0_42 = arith.constant 0 : index
    %c0_43 = arith.constant 0 : index
    %155 = vector.load %arg6[%c0_41, %c0_42, %c0_43] : memref<2x128x128xf32, #tpu.memory_space<vmem>>, vector<1x128x128xf32>
    %156 = vector.shape_cast %155 : vector<1x128x128xf32> to vector<128x128xf32>
    %cst_44 = arith.constant dense<0.000000e+00> : vector<8x128xf32>
    %157 = tpu.matmul %154, %156, %cst_44 {dimension_numbers = #tpu.dot_dimension_numbers<[1], [0], [0], [1], [0, 0, 1, 1], [], []>} : vector<8x128xf32>, vector<128x128xf32>, vector<8x128xf32> -> vector<8x128xf32>
    %158 = arith.addf %7, %157 : vector<8x128xf32>
    %c0_45 = arith.constant 0 : index
    %c0_46 = arith.constant 0 : index
    %c0_47 = arith.constant 0 : index
    %159 = vector.load %arg7[%c0_45, %c0_46, %c0_47] : memref<2x1x128xf32, #tpu.memory_space<vmem>>, vector<1x1x128xf32>
    %160 = vector.shape_cast %159 : vector<1x1x128xf32> to vector<1x128xf32>
    %161 = arith.mulf %158, %158 : vector<8x128xf32>
    %cst_48 = arith.constant dense<0.000000e+00> : vector<8xf32>
    %162 = vector.multi_reduction <add>, %161, %cst_48 [1] : vector<8x128xf32> to vector<8xf32>
    %163 = vector.shape_cast %162 : vector<8xf32> to vector<8x1xf32>
    %cst_49 = arith.constant 1.280000e+02 : f32
    %164 = vector.broadcast %cst_49 : f32 to vector<8x1xf32>
    %165 = arith.divf %163, %164 : vector<8x1xf32>
    %cst_50 = arith.constant 9.99999974E-6 : f32
    %166 = vector.broadcast %cst_50 : f32 to vector<8x1xf32>
    %167 = arith.addf %165, %166 : vector<8x1xf32>
    %168 = math.rsqrt %167 : vector<8x1xf32>
    %169 = vector.broadcast %168 : vector<8x1xf32> to vector<8x128xf32>
    %170 = arith.mulf %158, %169 : vector<8x128xf32>
    %171 = vector.broadcast %160 : vector<1x128xf32> to vector<8x128xf32>
    %172 = arith.mulf %170, %171 : vector<8x128xf32>
    %c0_51 = arith.constant 0 : index
    %c0_52 = arith.constant 0 : index
    %c0_53 = arith.constant 0 : index
    %173 = vector.load %arg8[%c0_51, %c0_52, %c0_53] : memref<2x128x512xf32, #tpu.memory_space<vmem>>, vector<1x128x512xf32>
    %174 = vector.shape_cast %173 : vector<1x128x512xf32> to vector<128x512xf32>
    %cst_54 = arith.constant dense<0.000000e+00> : vector<8x512xf32>
    %175 = tpu.matmul %172, %174, %cst_54 {dimension_numbers = #tpu.dot_dimension_numbers<[1], [0], [0], [1], [0, 0, 1, 1], [], []>} : vector<8x128xf32>, vector<128x512xf32>, vector<8x512xf32> -> vector<8x512xf32>
    %176 = vector.extract_strided_slice %175 {offsets = [0, 0], sizes = [8, 256], strides = [1, 1]} : vector<8x512xf32> to vector<8x256xf32>
    %177 = vector.extract_strided_slice %175 {offsets = [0, 256], sizes = [8, 256], strides = [1, 1]} : vector<8x512xf32> to vector<8x256xf32>
    %cst_55 = arith.constant 0.000000e+00 : f32
    %178 = vector.broadcast %cst_55 : f32 to vector<8x256xf32>
    %179 = arith.subf %178, %176 : vector<8x256xf32>
    %180 = math.exp %179 : vector<8x256xf32>
    %cst_56 = arith.constant 1.000000e+00 : f32
    %181 = vector.broadcast %cst_56 : f32 to vector<8x256xf32>
    %182 = arith.addf %181, %180 : vector<8x256xf32>
    %cst_57 = arith.constant 1.000000e+00 : f32
    %183 = vector.broadcast %cst_57 : f32 to vector<8x256xf32>
    %184 = arith.divf %183, %182 : vector<8x256xf32>
    %185 = arith.mulf %176, %184 : vector<8x256xf32>
    %186 = arith.mulf %185, %177 : vector<8x256xf32>
    %c0_58 = arith.constant 0 : index
    %c0_59 = arith.constant 0 : index
    %c0_60 = arith.constant 0 : index
    %187 = vector.load %arg9[%c0_58, %c0_59, %c0_60] : memref<2x256x128xf32, #tpu.memory_space<vmem>>, vector<1x256x128xf32>
    %188 = vector.shape_cast %187 : vector<1x256x128xf32> to vector<256x128xf32>
    %cst_61 = arith.constant dense<0.000000e+00> : vector<8x128xf32>
    %189 = tpu.matmul %186, %188, %cst_61 {dimension_numbers = #tpu.dot_dimension_numbers<[1], [0], [0], [1], [0, 0, 1, 1], [], []>} : vector<8x256xf32>, vector<256x128xf32>, vector<8x128xf32> -> vector<8x128xf32>
    %190 = arith.addf %158, %189 : vector<8x128xf32>
    %c1 = arith.constant 1 : index
    %c0_62 = arith.constant 0 : index
    %c0_63 = arith.constant 0 : index
    %191 = vector.load %arg4[%c1, %c0_62, %c0_63] : memref<2x1x128xf32, #tpu.memory_space<vmem>>, vector<1x1x128xf32>
    %192 = vector.shape_cast %191 : vector<1x1x128xf32> to vector<1x128xf32>
    %193 = arith.mulf %190, %190 : vector<8x128xf32>
    %cst_64 = arith.constant dense<0.000000e+00> : vector<8xf32>
    %194 = vector.multi_reduction <add>, %193, %cst_64 [1] : vector<8x128xf32> to vector<8xf32>
    %195 = vector.shape_cast %194 : vector<8xf32> to vector<8x1xf32>
    %cst_65 = arith.constant 1.280000e+02 : f32
    %196 = vector.broadcast %cst_65 : f32 to vector<8x1xf32>
    %197 = arith.divf %195, %196 : vector<8x1xf32>
    %cst_66 = arith.constant 9.99999974E-6 : f32
    %198 = vector.broadcast %cst_66 : f32 to vector<8x1xf32>
    %199 = arith.addf %197, %198 : vector<8x1xf32>
    %200 = math.rsqrt %199 : vector<8x1xf32>
    %201 = vector.broadcast %200 : vector<8x1xf32> to vector<8x128xf32>
    %202 = arith.mulf %190, %201 : vector<8x128xf32>
    %203 = vector.broadcast %192 : vector<1x128xf32> to vector<8x128xf32>
    %204 = arith.mulf %202, %203 : vector<8x128xf32>
    %c1_67 = arith.constant 1 : index
    %c0_68 = arith.constant 0 : index
    %c0_69 = arith.constant 0 : index
    %205 = vector.load %arg5[%c1_67, %c0_68, %c0_69] : memref<2x128x384xf32, #tpu.memory_space<vmem>>, vector<1x128x384xf32>
    %206 = vector.shape_cast %205 : vector<1x128x384xf32> to vector<128x384xf32>
    %cst_70 = arith.constant dense<0.000000e+00> : vector<8x384xf32>
    %207 = tpu.matmul %204, %206, %cst_70 {dimension_numbers = #tpu.dot_dimension_numbers<[1], [0], [0], [1], [0, 0, 1, 1], [], []>} : vector<8x128xf32>, vector<128x384xf32>, vector<8x384xf32> -> vector<8x384xf32>
    %208 = vector.extract_strided_slice %207 {offsets = [0, 0], sizes = [8, 32], strides = [1, 1]} : vector<8x384xf32> to vector<8x32xf32>
    %209 = vector.extract_strided_slice %208 {offsets = [0, 16], sizes = [8, 16], strides = [1, 1]} : vector<8x32xf32> to vector<8x16xf32>
    %210 = vector.extract_strided_slice %208 {offsets = [0, 0], sizes = [8, 16], strides = [1, 1]} : vector<8x32xf32> to vector<8x16xf32>
    %211 = tpu.concatenate %209, %210 in 1 : vector<8x16xf32>, vector<8x16xf32> -> vector<8x32xf32>
    %212 = arith.mulf %208, %8 : vector<8x32xf32>
    %213 = arith.mulf %211, %9 : vector<8x32xf32>
    %214 = arith.addf %212, %213 : vector<8x32xf32>
    %215 = vector.extract_strided_slice %207 {offsets = [0, 128], sizes = [8, 32], strides = [1, 1]} : vector<8x384xf32> to vector<8x32xf32>
    %216 = vector.extract_strided_slice %215 {offsets = [0, 16], sizes = [8, 16], strides = [1, 1]} : vector<8x32xf32> to vector<8x16xf32>
    %217 = vector.extract_strided_slice %215 {offsets = [0, 0], sizes = [8, 16], strides = [1, 1]} : vector<8x32xf32> to vector<8x16xf32>
    %218 = tpu.concatenate %216, %217 in 1 : vector<8x16xf32>, vector<8x16xf32> -> vector<8x32xf32>
    %219 = arith.mulf %215, %8 : vector<8x32xf32>
    %220 = arith.mulf %218, %9 : vector<8x32xf32>
    %221 = arith.addf %219, %220 : vector<8x32xf32>
    %222 = vector.extract_strided_slice %207 {offsets = [0, 256], sizes = [8, 32], strides = [1, 1]} : vector<8x384xf32> to vector<8x32xf32>
    %223 = tpu.transpose %221, [1, 0] : vector<8x32xf32> -> vector<32x8xf32>
    %cst_71 = arith.constant dense<0.000000e+00> : vector<8x8xf32>
    %224 = tpu.matmul %214, %223, %cst_71 {dimension_numbers = #tpu.dot_dimension_numbers<[1], [0], [0], [1], [0, 0, 1, 1], [], []>} : vector<8x32xf32>, vector<32x8xf32>, vector<8x8xf32> -> vector<8x8xf32>
    %cst_72 = arith.constant 0.176776692 : f32
    %225 = vector.broadcast %cst_72 : f32 to vector<8x8xf32>
    %226 = arith.mulf %224, %225 : vector<8x8xf32>
    %cst_73 = arith.constant -1.000000e+30 : f32
    %227 = vector.broadcast %cst_73 : f32 to vector<8x8xf32>
    %228 = arith.select %12, %226, %227 : vector<8x8xi1>, vector<8x8xf32>
    %cst_74 = arith.constant dense<0xFF800000> : vector<8xf32>
    %229 = vector.multi_reduction <maximumf>, %228, %cst_74 [1] : vector<8x8xf32> to vector<8xf32>
    %230 = vector.shape_cast %229 : vector<8xf32> to vector<8x1xf32>
    %231 = vector.broadcast %230 : vector<8x1xf32> to vector<8x8xf32>
    %232 = arith.subf %228, %231 : vector<8x8xf32>
    %233 = math.exp %232 : vector<8x8xf32>
    %cst_75 = arith.constant dense<0.000000e+00> : vector<8xf32>
    %234 = vector.multi_reduction <add>, %233, %cst_75 [1] : vector<8x8xf32> to vector<8xf32>
    %235 = vector.shape_cast %234 : vector<8xf32> to vector<8x1xf32>
    %236 = vector.broadcast %235 : vector<8x1xf32> to vector<8x8xf32>
    %237 = arith.divf %233, %236 : vector<8x8xf32>
    %cst_76 = arith.constant dense<0.000000e+00> : vector<8x32xf32>
    %238 = tpu.matmul %237, %222, %cst_76 {dimension_numbers = #tpu.dot_dimension_numbers<[1], [0], [0], [1], [0, 0, 1, 1], [], []>} : vector<8x8xf32>, vector<8x32xf32>, vector<8x32xf32> -> vector<8x32xf32>
    %239 = vector.extract_strided_slice %207 {offsets = [0, 32], sizes = [8, 32], strides = [1, 1]} : vector<8x384xf32> to vector<8x32xf32>
    %240 = vector.extract_strided_slice %239 {offsets = [0, 16], sizes = [8, 16], strides = [1, 1]} : vector<8x32xf32> to vector<8x16xf32>
    %241 = vector.extract_strided_slice %239 {offsets = [0, 0], sizes = [8, 16], strides = [1, 1]} : vector<8x32xf32> to vector<8x16xf32>
    %242 = tpu.concatenate %240, %241 in 1 : vector<8x16xf32>, vector<8x16xf32> -> vector<8x32xf32>
    %243 = arith.mulf %239, %8 : vector<8x32xf32>
    %244 = arith.mulf %242, %9 : vector<8x32xf32>
    %245 = arith.addf %243, %244 : vector<8x32xf32>
    %246 = vector.extract_strided_slice %207 {offsets = [0, 160], sizes = [8, 32], strides = [1, 1]} : vector<8x384xf32> to vector<8x32xf32>
    %247 = vector.extract_strided_slice %246 {offsets = [0, 16], sizes = [8, 16], strides = [1, 1]} : vector<8x32xf32> to vector<8x16xf32>
    %248 = vector.extract_strided_slice %246 {offsets = [0, 0], sizes = [8, 16], strides = [1, 1]} : vector<8x32xf32> to vector<8x16xf32>
    %249 = tpu.concatenate %247, %248 in 1 : vector<8x16xf32>, vector<8x16xf32> -> vector<8x32xf32>
    %250 = arith.mulf %246, %8 : vector<8x32xf32>
    %251 = arith.mulf %249, %9 : vector<8x32xf32>
    %252 = arith.addf %250, %251 : vector<8x32xf32>
    %253 = vector.extract_strided_slice %207 {offsets = [0, 288], sizes = [8, 32], strides = [1, 1]} : vector<8x384xf32> to vector<8x32xf32>
    %254 = tpu.transpose %252, [1, 0] : vector<8x32xf32> -> vector<32x8xf32>
    %cst_77 = arith.constant dense<0.000000e+00> : vector<8x8xf32>
    %255 = tpu.matmul %245, %254, %cst_77 {dimension_numbers = #tpu.dot_dimension_numbers<[1], [0], [0], [1], [0, 0, 1, 1], [], []>} : vector<8x32xf32>, vector<32x8xf32>, vector<8x8xf32> -> vector<8x8xf32>
    %cst_78 = arith.constant 0.176776692 : f32
    %256 = vector.broadcast %cst_78 : f32 to vector<8x8xf32>
    %257 = arith.mulf %255, %256 : vector<8x8xf32>
    %cst_79 = arith.constant -1.000000e+30 : f32
    %258 = vector.broadcast %cst_79 : f32 to vector<8x8xf32>
    %259 = arith.select %12, %257, %258 : vector<8x8xi1>, vector<8x8xf32>
    %cst_80 = arith.constant dense<0xFF800000> : vector<8xf32>
    %260 = vector.multi_reduction <maximumf>, %259, %cst_80 [1] : vector<8x8xf32> to vector<8xf32>
    %261 = vector.shape_cast %260 : vector<8xf32> to vector<8x1xf32>
    %262 = vector.broadcast %261 : vector<8x1xf32> to vector<8x8xf32>
    %263 = arith.subf %259, %262 : vector<8x8xf32>
    %264 = math.exp %263 : vector<8x8xf32>
    %cst_81 = arith.constant dense<0.000000e+00> : vector<8xf32>
    %265 = vector.multi_reduction <add>, %264, %cst_81 [1] : vector<8x8xf32> to vector<8xf32>
    %266 = vector.shape_cast %265 : vector<8xf32> to vector<8x1xf32>
    %267 = vector.broadcast %266 : vector<8x1xf32> to vector<8x8xf32>
    %268 = arith.divf %264, %267 : vector<8x8xf32>
    %cst_82 = arith.constant dense<0.000000e+00> : vector<8x32xf32>
    %269 = tpu.matmul %268, %253, %cst_82 {dimension_numbers = #tpu.dot_dimension_numbers<[1], [0], [0], [1], [0, 0, 1, 1], [], []>} : vector<8x8xf32>, vector<8x32xf32>, vector<8x32xf32> -> vector<8x32xf32>
    %270 = vector.extract_strided_slice %207 {offsets = [0, 64], sizes = [8, 32], strides = [1, 1]} : vector<8x384xf32> to vector<8x32xf32>
    %271 = vector.extract_strided_slice %270 {offsets = [0, 16], sizes = [8, 16], strides = [1, 1]} : vector<8x32xf32> to vector<8x16xf32>
    %272 = vector.extract_strided_slice %270 {offsets = [0, 0], sizes = [8, 16], strides = [1, 1]} : vector<8x32xf32> to vector<8x16xf32>
    %273 = tpu.concatenate %271, %272 in 1 : vector<8x16xf32>, vector<8x16xf32> -> vector<8x32xf32>
    %274 = arith.mulf %270, %8 : vector<8x32xf32>
    %275 = arith.mulf %273, %9 : vector<8x32xf32>
    %276 = arith.addf %274, %275 : vector<8x32xf32>
    %277 = vector.extract_strided_slice %207 {offsets = [0, 192], sizes = [8, 32], strides = [1, 1]} : vector<8x384xf32> to vector<8x32xf32>
    %278 = vector.extract_strided_slice %277 {offsets = [0, 16], sizes = [8, 16], strides = [1, 1]} : vector<8x32xf32> to vector<8x16xf32>
    %279 = vector.extract_strided_slice %277 {offsets = [0, 0], sizes = [8, 16], strides = [1, 1]} : vector<8x32xf32> to vector<8x16xf32>
    %280 = tpu.concatenate %278, %279 in 1 : vector<8x16xf32>, vector<8x16xf32> -> vector<8x32xf32>
    %281 = arith.mulf %277, %8 : vector<8x32xf32>
    %282 = arith.mulf %280, %9 : vector<8x32xf32>
    %283 = arith.addf %281, %282 : vector<8x32xf32>
    %284 = vector.extract_strided_slice %207 {offsets = [0, 320], sizes = [8, 32], strides = [1, 1]} : vector<8x384xf32> to vector<8x32xf32>
    %285 = tpu.transpose %283, [1, 0] : vector<8x32xf32> -> vector<32x8xf32>
    %cst_83 = arith.constant dense<0.000000e+00> : vector<8x8xf32>
    %286 = tpu.matmul %276, %285, %cst_83 {dimension_numbers = #tpu.dot_dimension_numbers<[1], [0], [0], [1], [0, 0, 1, 1], [], []>} : vector<8x32xf32>, vector<32x8xf32>, vector<8x8xf32> -> vector<8x8xf32>
    %cst_84 = arith.constant 0.176776692 : f32
    %287 = vector.broadcast %cst_84 : f32 to vector<8x8xf32>
    %288 = arith.mulf %286, %287 : vector<8x8xf32>
    %cst_85 = arith.constant -1.000000e+30 : f32
    %289 = vector.broadcast %cst_85 : f32 to vector<8x8xf32>
    %290 = arith.select %12, %288, %289 : vector<8x8xi1>, vector<8x8xf32>
    %cst_86 = arith.constant dense<0xFF800000> : vector<8xf32>
    %291 = vector.multi_reduction <maximumf>, %290, %cst_86 [1] : vector<8x8xf32> to vector<8xf32>
    %292 = vector.shape_cast %291 : vector<8xf32> to vector<8x1xf32>
    %293 = vector.broadcast %292 : vector<8x1xf32> to vector<8x8xf32>
    %294 = arith.subf %290, %293 : vector<8x8xf32>
    %295 = math.exp %294 : vector<8x8xf32>
    %cst_87 = arith.constant dense<0.000000e+00> : vector<8xf32>
    %296 = vector.multi_reduction <add>, %295, %cst_87 [1] : vector<8x8xf32> to vector<8xf32>
    %297 = vector.shape_cast %296 : vector<8xf32> to vector<8x1xf32>
    %298 = vector.broadcast %297 : vector<8x1xf32> to vector<8x8xf32>
    %299 = arith.divf %295, %298 : vector<8x8xf32>
    %cst_88 = arith.constant dense<0.000000e+00> : vector<8x32xf32>
    %300 = tpu.matmul %299, %284, %cst_88 {dimension_numbers = #tpu.dot_dimension_numbers<[1], [0], [0], [1], [0, 0, 1, 1], [], []>} : vector<8x8xf32>, vector<8x32xf32>, vector<8x32xf32> -> vector<8x32xf32>
    %301 = vector.extract_strided_slice %207 {offsets = [0, 96], sizes = [8, 32], strides = [1, 1]} : vector<8x384xf32> to vector<8x32xf32>
    %302 = vector.extract_strided_slice %301 {offsets = [0, 16], sizes = [8, 16], strides = [1, 1]} : vector<8x32xf32> to vector<8x16xf32>
    %303 = vector.extract_strided_slice %301 {offsets = [0, 0], sizes = [8, 16], strides = [1, 1]} : vector<8x32xf32> to vector<8x16xf32>
    %304 = tpu.concatenate %302, %303 in 1 : vector<8x16xf32>, vector<8x16xf32> -> vector<8x32xf32>
    %305 = arith.mulf %301, %8 : vector<8x32xf32>
    %306 = arith.mulf %304, %9 : vector<8x32xf32>
    %307 = arith.addf %305, %306 : vector<8x32xf32>
    %308 = vector.extract_strided_slice %207 {offsets = [0, 224], sizes = [8, 32], strides = [1, 1]} : vector<8x384xf32> to vector<8x32xf32>
    %309 = vector.extract_strided_slice %308 {offsets = [0, 16], sizes = [8, 16], strides = [1, 1]} : vector<8x32xf32> to vector<8x16xf32>
    %310 = vector.extract_strided_slice %308 {offsets = [0, 0], sizes = [8, 16], strides = [1, 1]} : vector<8x32xf32> to vector<8x16xf32>
    %311 = tpu.concatenate %309, %310 in 1 : vector<8x16xf32>, vector<8x16xf32> -> vector<8x32xf32>
    %312 = arith.mulf %308, %8 : vector<8x32xf32>
    %313 = arith.mulf %311, %9 : vector<8x32xf32>
    %314 = arith.addf %312, %313 : vector<8x32xf32>
    %315 = vector.extract_strided_slice %207 {offsets = [0, 352], sizes = [8, 32], strides = [1, 1]} : vector<8x384xf32> to vector<8x32xf32>
    %316 = tpu.transpose %314, [1, 0] : vector<8x32xf32> -> vector<32x8xf32>
    %cst_89 = arith.constant dense<0.000000e+00> : vector<8x8xf32>
    %317 = tpu.matmul %307, %316, %cst_89 {dimension_numbers = #tpu.dot_dimension_numbers<[1], [0], [0], [1], [0, 0, 1, 1], [], []>} : vector<8x32xf32>, vector<32x8xf32>, vector<8x8xf32> -> vector<8x8xf32>
    %cst_90 = arith.constant 0.176776692 : f32
    %318 = vector.broadcast %cst_90 : f32 to vector<8x8xf32>
    %319 = arith.mulf %317, %318 : vector<8x8xf32>
    %cst_91 = arith.constant -1.000000e+30 : f32
    %320 = vector.broadcast %cst_91 : f32 to vector<8x8xf32>
    %321 = arith.select %12, %319, %320 : vector<8x8xi1>, vector<8x8xf32>
    %cst_92 = arith.constant dense<0xFF800000> : vector<8xf32>
    %322 = vector.multi_reduction <maximumf>, %321, %cst_92 [1] : vector<8x8xf32> to vector<8xf32>
    %323 = vector.shape_cast %322 : vector<8xf32> to vector<8x1xf32>
    %324 = vector.broadcast %323 : vector<8x1xf32> to vector<8x8xf32>
    %325 = arith.subf %321, %324 : vector<8x8xf32>
    %326 = math.exp %325 : vector<8x8xf32>
    %cst_93 = arith.constant dense<0.000000e+00> : vector<8xf32>
    %327 = vector.multi_reduction <add>, %326, %cst_93 [1] : vector<8x8xf32> to vector<8xf32>
    %328 = vector.shape_cast %327 : vector<8xf32> to vector<8x1xf32>
    %329 = vector.broadcast %328 : vector<8x1xf32> to vector<8x8xf32>
    %330 = arith.divf %326, %329 : vector<8x8xf32>
    %cst_94 = arith.constant dense<0.000000e+00> : vector<8x32xf32>
    %331 = tpu.matmul %330, %315, %cst_94 {dimension_numbers = #tpu.dot_dimension_numbers<[1], [0], [0], [1], [0, 0, 1, 1], [], []>} : vector<8x8xf32>, vector<8x32xf32>, vector<8x32xf32> -> vector<8x32xf32>
    %332 = tpu.concatenate %238, %269, %300, %331 in 1 : vector<8x32xf32>, vector<8x32xf32>, vector<8x32xf32>, vector<8x32xf32> -> vector<8x128xf32>
    %c1_95 = arith.constant 1 : index
    %c0_96 = arith.constant 0 : index
    %c0_97 = arith.constant 0 : index
    %333 = vector.load %arg6[%c1_95, %c0_96, %c0_97] : memref<2x128x128xf32, #tpu.memory_space<vmem>>, vector<1x128x128xf32>
    %334 = vector.shape_cast %333 : vector<1x128x128xf32> to vector<128x128xf32>
    %cst_98 = arith.constant dense<0.000000e+00> : vector<8x128xf32>
    %335 = tpu.matmul %332, %334, %cst_98 {dimension_numbers = #tpu.dot_dimension_numbers<[1], [0], [0], [1], [0, 0, 1, 1], [], []>} : vector<8x128xf32>, vector<128x128xf32>, vector<8x128xf32> -> vector<8x128xf32>
    %336 = arith.addf %190, %335 : vector<8x128xf32>
    %c1_99 = arith.constant 1 : index
    %c0_100 = arith.constant 0 : index
    %c0_101 = arith.constant 0 : index
    %337 = vector.load %arg7[%c1_99, %c0_100, %c0_101] : memref<2x1x128xf32, #tpu.memory_space<vmem>>, vector<1x1x128xf32>
    %338 = vector.shape_cast %337 : vector<1x1x128xf32> to vector<1x128xf32>
    %339 = arith.mulf %336, %336 : vector<8x128xf32>
    %cst_102 = arith.constant dense<0.000000e+00> : vector<8xf32>
    %340 = vector.multi_reduction <add>, %339, %cst_102 [1] : vector<8x128xf32> to vector<8xf32>
    %341 = vector.shape_cast %340 : vector<8xf32> to vector<8x1xf32>
    %cst_103 = arith.constant 1.280000e+02 : f32
    %342 = vector.broadcast %cst_103 : f32 to vector<8x1xf32>
    %343 = arith.divf %341, %342 : vector<8x1xf32>
    %cst_104 = arith.constant 9.99999974E-6 : f32
    %344 = vector.broadcast %cst_104 : f32 to vector<8x1xf32>
    %345 = arith.addf %343, %344 : vector<8x1xf32>
    %346 = math.rsqrt %345 : vector<8x1xf32>
    %347 = vector.broadcast %346 : vector<8x1xf32> to vector<8x128xf32>
    %348 = arith.mulf %336, %347 : vector<8x128xf32>
    %349 = vector.broadcast %338 : vector<1x128xf32> to vector<8x128xf32>
    %350 = arith.mulf %348, %349 : vector<8x128xf32>
    %c1_105 = arith.constant 1 : index
    %c0_106 = arith.constant 0 : index
    %c0_107 = arith.constant 0 : index
    %351 = vector.load %arg8[%c1_105, %c0_106, %c0_107] : memref<2x128x512xf32, #tpu.memory_space<vmem>>, vector<1x128x512xf32>
    %352 = vector.shape_cast %351 : vector<1x128x512xf32> to vector<128x512xf32>
    %cst_108 = arith.constant dense<0.000000e+00> : vector<8x512xf32>
    %353 = tpu.matmul %350, %352, %cst_108 {dimension_numbers = #tpu.dot_dimension_numbers<[1], [0], [0], [1], [0, 0, 1, 1], [], []>} : vector<8x128xf32>, vector<128x512xf32>, vector<8x512xf32> -> vector<8x512xf32>
    %354 = vector.extract_strided_slice %353 {offsets = [0, 0], sizes = [8, 256], strides = [1, 1]} : vector<8x512xf32> to vector<8x256xf32>
    %355 = vector.extract_strided_slice %353 {offsets = [0, 256], sizes = [8, 256], strides = [1, 1]} : vector<8x512xf32> to vector<8x256xf32>
    %cst_109 = arith.constant 0.000000e+00 : f32
    %356 = vector.broadcast %cst_109 : f32 to vector<8x256xf32>
    %357 = arith.subf %356, %354 : vector<8x256xf32>
    %358 = math.exp %357 : vector<8x256xf32>
    %cst_110 = arith.constant 1.000000e+00 : f32
    %359 = vector.broadcast %cst_110 : f32 to vector<8x256xf32>
    %360 = arith.addf %359, %358 : vector<8x256xf32>
    %cst_111 = arith.constant 1.000000e+00 : f32
    %361 = vector.broadcast %cst_111 : f32 to vector<8x256xf32>
    %362 = arith.divf %361, %360 : vector<8x256xf32>
    %363 = arith.mulf %354, %362 : vector<8x256xf32>
    %364 = arith.mulf %363, %355 : vector<8x256xf32>
    %c1_112 = arith.constant 1 : index
    %c0_113 = arith.constant 0 : index
    %c0_114 = arith.constant 0 : index
    %365 = vector.load %arg9[%c1_112, %c0_113, %c0_114] : memref<2x256x128xf32, #tpu.memory_space<vmem>>, vector<1x256x128xf32>
    %366 = vector.shape_cast %365 : vector<1x256x128xf32> to vector<256x128xf32>
    %cst_115 = arith.constant dense<0.000000e+00> : vector<8x128xf32>
    %367 = tpu.matmul %364, %366, %cst_115 {dimension_numbers = #tpu.dot_dimension_numbers<[1], [0], [0], [1], [0, 0, 1, 1], [], []>} : vector<8x256xf32>, vector<256x128xf32>, vector<8x128xf32> -> vector<8x128xf32>
    %368 = arith.addf %336, %367 : vector<8x128xf32>
    %369 = vector.extract_strided_slice %368 {offsets = [7, 0], sizes = [1, 128], strides = [1, 1]} : vector<8x128xf32> to vector<1x128xf32>
    %c0_116 = arith.constant 0 : index
    %c0_117 = arith.constant 0 : index
    %370 = vector.load %arg10[%c0_116, %c0_117] : memref<1x128xf32, #tpu.memory_space<vmem>>, vector<1x128xf32>
    %371 = arith.mulf %369, %369 : vector<1x128xf32>
    %cst_118 = arith.constant dense<0.000000e+00> : vector<1xf32>
    %372 = vector.multi_reduction <add>, %371, %cst_118 [1] : vector<1x128xf32> to vector<1xf32>
    %373 = vector.shape_cast %372 : vector<1xf32> to vector<1x1xf32>
    %cst_119 = arith.constant 1.280000e+02 : f32
    %374 = vector.broadcast %cst_119 : f32 to vector<1x1xf32>
    %375 = arith.divf %373, %374 : vector<1x1xf32>
    %cst_120 = arith.constant 9.99999974E-6 : f32
    %376 = vector.broadcast %cst_120 : f32 to vector<1x1xf32>
    %377 = arith.addf %375, %376 : vector<1x1xf32>
    %378 = math.rsqrt %377 : vector<1x1xf32>
    %379 = vector.broadcast %378 : vector<1x1xf32> to vector<1x128xf32>
    %380 = arith.mulf %369, %379 : vector<1x128xf32>
    %381 = arith.mulf %380, %370 : vector<1x128xf32>
    %c0_121 = arith.constant 0 : index
    %c0_122 = arith.constant 0 : index
    %382 = vector.load %arg11[%c0_121, %c0_122] : memref<128x256xf32, #tpu.memory_space<vmem>>, vector<128x256xf32>
    %cst_123 = arith.constant dense<0.000000e+00> : vector<1x256xf32>
    %383 = tpu.matmul %381, %382, %cst_123 {dimension_numbers = #tpu.dot_dimension_numbers<[1], [0], [0], [1], [0, 0, 1, 1], [], []>} : vector<1x128xf32>, vector<128x256xf32>, vector<1x256xf32> -> vector<1x256xf32>
    %c0_124 = arith.constant 0 : index
    %c0_125 = arith.constant 0 : index
    %384 = vector.load %arg12[%c0_124, %c0_125] : memref<1x256xf32, #tpu.memory_space<vmem>>, vector<1x256xf32>
    tpu.vector_store %arg12[%c0_124, %c0_125], %383 {strides = array<i32>} : memref<1x256xf32, #tpu.memory_space<vmem>>, vector<1x256xf32>,
    return
  }
}

</mosaic_0001>

<bundles_post_ra>
// kernel: forward.1
= control target key start
LH: loop header
LB: loop body
LE: loop exit
PB: predicated region body
PF: predicated region fallthrough
CT: control target
= control target key end

     0   :  { %17 = vsyncpa [#allocation3], 0  ;;  %s4914_s0 = inlined_call_operand.vmem [shape: s32[8,1], index: 0, kind: input, shape index: {}]   ;;  %s4915_s1 = inlined_call_operand.hbm [shape: f32[256,128], index: 1, kind: input, shape index: {}]   ;;  %s4916_s2 = inlined_call_operand.vmem [shape: f32[8,32], index: 2, kind: input, shape index: {}]   ;;  %s4917_s3 = inlined_call_operand.vmem [shape: f32[8,32], index: 3, kind: input, shape index: {}]   ;;  %s4918_s4 = inlined_call_operand.vmem [shape: f32[2,1,128], index: 4, kind: input, shape index: {}]   ;;  %s4919_s5 = inlined_call_operand.hbm [shape: f32[2,128,384], index: 5, kind: input, shape index: {}]   ;;  %s4920_s6 = inlined_call_operand.hbm [shape: f32[2,128,128], index: 6, kind: input, shape index: {}]   ;;  %s4921_s7 = inlined_call_operand.vmem [shape: f32[2,1,128], index: 7, kind: input, shape index: {}]   ;;  %s4922_s8 = inlined_call_operand.hbm [shape: f32[2,128,512], index: 8, kind: input, shape index: {}]   ;;  %s4923_s9 = inlined_call_operand.hbm [shape: f32[2,256,128], index: 9, kind: input, shape index: {}]   ;;  %s4924_s10 = inlined_call_operand.vmem [shape: f32[1,128], index: 10, kind: input, shape index: {}]   ;;  %s4925_s11 = inlined_call_operand.hbm [shape: f32[128,256], index: 11, kind: input, shape index: {}]   ;;  %s4926_s12 = inlined_call_operand.vmem [shape: f32[1,256], index: 12, kind: output, shape index: {}]  }
   0x1   :  { %18 = vsyncpa [#allocation5], 0 }
   0x2   :  { %19 = vsyncpa [#allocation8], 0 }
   0x3   :  { %20 = vsyncpa [#allocation11], 0  ;;  %s4317_s21 = smov [#allocation4]   ;;  %s4177_s25 = scalar_lea.hbm %s4919_s5, 12288 }
   0x4   :  { %s46_s22 = sshll.u32 %s4317_s21, 4  ;;  %p4178_p0 = scmp.ne.s32.totalorder %s4919_s5, %s4177_s25  ;;  %s47_s22 = int_to_ptr.vmem [resolvable:$true] %s46_s22 }
   0x5   :  { %p4181_p1 = scmp.lt.u32.totalorder %s4177_s25, %s4919_s5 }
   0x7   :  { %p4183_p2 = pnand %p4181_p1, %p4178_p0 }
   0x9   :  { %4186 = shalt.err (!%p4183_p2)
}
   0xa   :  { %s4187_s30 = scalar_lea.vmem %s47_s22, 12288  ;;  %p4192_p4 = scmp.lt.s32.totalorder %s47_s22, %s47_s22 }
   0xb   :  { %p4188_p3 = scmp.ne.s32.totalorder %s47_s22, %s4187_s30  ;;  %p4193_p5 = scmp.lt.s32.totalorder %s4187_s30, %s4187_s30 }
   0xd   :  { %p4194_p6 = por %p4193_p5, %p4192_p4 }
   0xf   :  { %p4195_p7 = pnand %p4194_p6, %p4188_p3 }
  0x11   :  { %4198 = shalt.err (!%p4195_p7)
}
  0x12   :  { %s4318_s13 = smov 384   ;;  %s4319_s14 = smov 24  }
  0x13   :  { %52 = dma.hbm_to_vmem [thread:$0]  %s4919_s5, 12288, %s47_s22, [#allocation5], %s4318_s13, %s4318_s13, %s4319_s14  }
  0x14   :  { %s4320_s17 = smov [#allocation7]   ;;  %s4199_s21 = scalar_lea.hbm %s4922_s8, 16384 }
  0x15   :  { %s72_s18 = sshll.u32 %s4320_s17, 4  ;;  %p4200_p8 = scmp.ne.s32.totalorder %s4922_s8, %s4199_s21  ;;  %s73_s18 = int_to_ptr.vmem [resolvable:$true] %s72_s18 }
  0x16   :  { %p4203_p9 = scmp.lt.u32.totalorder %s4199_s21, %s4922_s8 }
  0x18   :  { %p4205_p10 = pnand %p4203_p9, %p4200_p8 }
  0x1a   :  { %4208 = shalt.err (!%p4205_p10)
}
  0x1b   :  { %s4209_s27 = scalar_lea.vmem %s73_s18, 16384  ;;  %p4214_p12 = scmp.lt.s32.totalorder %s73_s18, %s73_s18 }
  0x1c   :  { %p4210_p11 = scmp.ne.s32.totalorder %s73_s18, %s4209_s27  ;;  %p4215_p13 = scmp.lt.s32.totalorder %s4209_s27, %s4209_s27 }
  0x1e   :  { %p4216_p0 = por %p4215_p13, %p4214_p12 }
  0x20   :  { %p4217_p1 = pnand %p4216_p0, %p4210_p11 }
  0x22   :  { %4220 = shalt.err (!%p4217_p1)
}
  0x23   :  { %s4321_s5 = smov 512   ;;  %s4322_s22 = smov 32  }
  0x24   :  { %78 = dma.hbm_to_vmem [thread:$0]  %s4922_s8, 16384, %s73_s18, [#allocation8], %s4321_s5, %s4321_s5, %s4322_s22  }
  0x25   :  { %s4323_s30 = smov [#allocation2]   ;;  %s4221_s16 = scalar_lea.hbm %s4915_s1, 4096 }
  0x26   :  { %s28_s13 = sshll.u32 %s4323_s30, 4  ;;  %p4222_p2 = scmp.ne.s32.totalorder %s4915_s1, %s4221_s16  ;;  %s29_s13 = int_to_ptr.vmem [resolvable:$true] %s28_s13 }
  0x27   :  { %p4225_p3 = scmp.lt.u32.totalorder %s4221_s16, %s4915_s1 }
  0x29   :  { %p4227_p4 = pnand %p4225_p3, %p4222_p2 }
  0x2b   :  { %4230 = shalt.err (!%p4227_p4)
}
  0x2c   :  { %s4231_s23 = scalar_lea.vmem %s29_s13, 4096  ;;  %p4236_p6 = scmp.lt.s32.totalorder %s29_s13, %s29_s13 }
  0x2d   :  { %p4232_p5 = scmp.ne.s32.totalorder %s29_s13, %s4231_s23  ;;  %p4237_p7 = scmp.lt.s32.totalorder %s4231_s23, %s4231_s23 }
  0x2f   :  { %p4238_p8 = por %p4237_p7, %p4236_p6 }
  0x31   :  { %p4239_p9 = pnand %p4238_p8, %p4232_p5 }
  0x33   :  { %4242 = shalt.err (!%p4239_p9)
}
  0x34   :  { %s4324_s8 = smov 128   ;;  %s4325_s18 = smov 8  }
  0x35   :  { %34 = dma.hbm_to_vmem [thread:$0]  %s4915_s1, 4096, %s29_s13, [#allocation3], %s4324_s8, %s4324_s8, %s4325_s18  }
  0x36   :  { %s4326_s26 = smov [#allocation6]   ;;  %s4327_s5 = smov [#allocation9]  }
  0x37   :  { %s58_s27 = sshll.u32 %s4326_s26, 4  ;;  %s84_s28 = sshll.u32 %s4327_s5, 4  ;;  %s59_s27 = int_to_ptr.vmem [resolvable:$true] %s58_s27  ;;  %s85_s28 = int_to_ptr.vmem [resolvable:$true] %s84_s28 }
  0x38   :  { %s4243_s14 = scalar_lea.hbm %s4920_s6, 4096 }
  0x39   :  { %p4244_p10 = scmp.ne.s32.totalorder %s4920_s6, %s4243_s14  ;;  %p4247_p11 = scmp.lt.u32.totalorder %s4243_s14, %s4920_s6 }
  0x3b   :  { %p4249_p12 = pnand %p4247_p11, %p4244_p10 }
  0x3d   :  { %4252 = shalt.err (!%p4249_p12)
}
  0x3e   :  { %s4253_s1 = scalar_lea.vmem %s59_s27, 4096  ;;  %p4258_p0 = scmp.lt.s32.totalorder %s59_s27, %s59_s27 }
  0x3f   :  { %p4254_p13 = scmp.ne.s32.totalorder %s59_s27, %s4253_s1  ;;  %p4259_p1 = scmp.lt.s32.totalorder %s4253_s1, %s4253_s1 }
  0x41   :  { %p4260_p2 = por %p4259_p1, %p4258_p0 }
  0x43   :  { %p4261_p3 = pnand %p4260_p2, %p4254_p13 }
  0x45   :  { %4264 = shalt.err (!%p4261_p3)
}
  0x46   :  { %64 = dma.hbm_to_vmem [thread:$0]  %s4920_s6, 4096, %s59_s27, [#allocation5], %s4324_s8, %s4324_s8, %s4325_s18  }
  0x47   :  { %s4265_s24 = scalar_lea.hbm %s4923_s9, 8192 }
  0x48   :  { %p4266_p4 = scmp.ne.s32.totalorder %s4923_s9, %s4265_s24  ;;  %p4269_p5 = scmp.lt.u32.totalorder %s4265_s24, %s4923_s9 }
  0x4a   :  { %p4271_p6 = pnand %p4269_p5, %p4266_p4 }
  0x4c   :  { %4274 = shalt.err (!%p4271_p6)
}
  0x4d   :  { %s4275_s30 = scalar_lea.vmem %s85_s28, 8192  ;;  %p4280_p8 = scmp.lt.s32.totalorder %s85_s28, %s85_s28 }
  0x4e   :  { %p4276_p7 = scmp.ne.s32.totalorder %s85_s28, %s4275_s30  ;;  %p4281_p9 = scmp.lt.s32.totalorder %s4275_s30, %s4275_s30 }
  0x50   :  { %p4282_p10 = por %p4281_p9, %p4280_p8 }
  0x52   :  { %p4283_p11 = pnand %p4282_p10, %p4276_p7 }
  0x54   :  { %4286 = shalt.err (!%p4283_p11)
}
  0x55   :  { %90 = dma.hbm_to_vmem [thread:$0]  %s4923_s9, 8192, %s85_s28, [#allocation8], %s4324_s8, %s4324_s8, %s4325_s18  }
  0x56   :  { %s4328_s14 = smov [#allocation10]   ;;  %s4287_s19 = scalar_lea.hbm %s4925_s11, 4096 }
  0x57   :  { %s98_s15 = sshll.u32 %s4328_s14, 4  ;;  %p4288_p12 = scmp.ne.s32.totalorder %s4925_s11, %s4287_s19  ;;  %s99_s15 = int_to_ptr.vmem [resolvable:$true] %s98_s15 }
  0x58   :  { %p4291_p13 = scmp.lt.u32.totalorder %s4287_s19, %s4925_s11 }
  0x5a   :  { %p4293_p0 = pnand %p4291_p13, %p4288_p12 }
  0x5c   :  { %4296 = shalt.err (!%p4293_p0)
}
  0x5d   :  { %s4297_s23 = scalar_lea.vmem %s99_s15, 4096  ;;  %p4302_p2 = scmp.lt.s32.totalorder %s99_s15, %s99_s15 }
  0x5e   :  { %p4298_p1 = scmp.ne.s32.totalorder %s99_s15, %s4297_s23  ;;  %p4303_p3 = scmp.lt.s32.totalorder %s4297_s23, %s4297_s23 }
  0x60   :  { %p4304_p4 = por %p4303_p3, %p4302_p2 }
  0x62   :  { %p4305_p5 = pnand %p4304_p4, %p4298_p1 }
  0x64   :  { %4308 = shalt.err (!%p4305_p5)
}
  0x65   :  { %s4329_s9 = smov 256   ;;  %s4330_s8 = smov 16  }
  0x66   :  { %104 = dma.hbm_to_vmem [thread:$0]  %s4925_s11, 4096, %s99_s15, [#allocation11], %s4329_s9, %s4329_s9, %s4330_s8  }
  0x67   :  { %4309 = dma.done.wait [#allocation3], 4096  }
  0x68   :  { %4310 = vsyncadd [#allocation3], 4294963200 }
  0x69   :  { %4311 = dma.done.wait [#allocation5], 16384  }
  0x6a   :  { %4312 = vsyncadd [#allocation5], 4294950912 }
  0x6b   :  { %4313 = dma.done.wait [#allocation8], 24576  }
  0x6c   :  { %4314 = vsyncadd [#allocation8], 4294942720 }
  0x6d   :  { %4315 = dma.done.wait [#allocation11], 4096  }
  0x6e   :  { %4316 = vsyncadd [#allocation11], 4294963200  ;;  %v4331_v0 = vmov 0   ;;  %v123_v1 = vld [vmem:[%s4914_s0] sm:$0xff]  ;;  %v153_v3 = vld [vmem:[#allocation2 + $0x88] sm:$0xff]  ;;  %v124_v50 = vlaneseq  ;;  %v4332_v54 = vmov 1.0  }
  0x6f   :  { %4116 = vset.pattern.permute.xlu0 %v4331_v0  ;;  %v152_v2 = vld [vmem:[#allocation2 + $0x80] sm:$0xff]  ;;  %v137_v6 = vld [vmem:[#allocation2 + $0x8] sm:$0xff]  ;;  %v154_v7 = vld [vmem:[#allocation2 + $0x90] sm:$0xff]  ;;  %v4333_v59 = vmov 0.0|0.0   ;;  %vm4335_vm2 = vmmov 0   ;;  %s4336_s29 = smov 112  }
  0x70   :  { %128 = vperm.xlu0 %4116, %v123_v1   ;;  %v3675_v4 = vpack.c.bf16 %v153_v3, %v152_v2  ;;  %v136_v5 = vld [vmem:[#allocation2] sm:$0xff]  ;;  %v155_v9 = vld [vmem:[#allocation2 + $0x98] sm:$0xff]  ;;  %v138_v10 = vld [vmem:[#allocation2 + $0x10] sm:$0xff]  ;;  %v4494_v51 = vand.u32 127, %v124_v50  ;;  %s4337_s30 = smov 80   ;;  %vm455_vm3 = vcmask 130048  }
  0x71   :  { %v3677_v8 = vpack.c.bf16 %v137_v6, %v136_v5  ;;  %v139_v11 = vld [vmem:[#allocation2 + $0x18] sm:$0xff]  ;;  %v3679_v12 = vpack.c.bf16 %v155_v9, %v154_v7  ;;  %v156_v13 = vld [vmem:[#allocation2 + $0xa0] sm:$0xff]  ;;  %v157_v14 = vld [vmem:[#allocation2 + $0xa8] sm:$0xff]  ;;  %vm471_vm4 = vcmask 261120   ;;  %vm550_vm6 = vcmask 64512   ;;  %s4338_s14 = smov 96  }
  0x72   :  { %3676 = vmatprep.subr.bf16.mxu0 %v3675_v4  ;;  %v3681_v15 = vpack.c.bf16 %v139_v11, %v138_v10  ;;  %v3683_v16 = vpack.c.bf16 %v157_v14, %v156_v13  ;;  %v140_v17 = vld [vmem:[#allocation2 + $0x20] sm:$0xff]  ;;  %v141_v18 = vld [vmem:[#allocation2 + $0x28] sm:$0xff]  ;;  %v158_v19 = vld [vmem:[#allocation2 + $0xb0] sm:$0xff]  ;;  %v126_v52 = vadd.s32 128, %v4494_v51  ;;  %s4339_s15 = smov 48   ;;  %s4340_s16 = smov 64  }
  0x73   :  { %3678 = vmatpush3.bf16.msra.mxu0 %v3677_v8  ;;  %v159_v20 = vld [vmem:[#allocation2 + $0xb8] sm:$0xff]  ;;  %v3685_v21 = vpack.c.bf16 %v141_v18, %v140_v17  ;;  %v142_v23 = vld [vmem:[#allocation2 + $0x30] sm:$0xff]  ;;  %v160_v25 = vld [vmem:[#allocation2 + $0xc0] sm:$0xff]  ;;  %vm1226_vm7 = vcmask 523264   ;;  %vm1228_vm8 = vcmask 785408   ;;  %vm3063_vm9 = vcmask 1047559  }
  0x74   :  { %3680 = vmatprep.subr.bf16.mxu0 %v3679_v12  ;;  %v3687_v22 = vpack.c.bf16 %v159_v20, %v158_v19  ;;  %v143_v24 = vld [vmem:[#allocation2 + $0x38] sm:$0xff]  ;;  %v161_v26 = vld [vmem:[#allocation2 + $0xc8] sm:$0xff]  ;;  %v144_v29 = vld [vmem:[#allocation2 + $0x40] sm:$0xff]  ;;  %vm3204_vm10 = vcmp.lt.s32.totalorder %v124_v50, 256 }
  0x75   :  { %v3689_v27 = vpack.c.bf16 %v143_v24, %v142_v23  ;;  %v3691_v28 = vpack.c.bf16 %v161_v26, %v160_v25  ;;  %v145_v30 = vld [vmem:[#allocation2 + $0x48] sm:$0xff]  ;;  %v162_v31 = vld [vmem:[#allocation2 + $0xd0] sm:$0xff]  ;;  %v163_v32 = vld [vmem:[#allocation2 + $0xd8] sm:$0xff] }
  0x76   :  { %v3693_v33 = vpack.c.bf16 %v145_v30, %v144_v29  ;;  %v3695_v34 = vpack.c.bf16 %v163_v32, %v162_v31  ;;  %v146_v35 = vld [vmem:[#allocation2 + $0x50] sm:$0xff]  ;;  %v147_v36 = vld [vmem:[#allocation2 + $0x58] sm:$0xff]  ;;  %v164_v37 = vld [vmem:[#allocation2 + $0xe0] sm:$0xff] }
  0x77   :  { %3682 = vmatpush3.bf16.msra.mxu0 %v3681_v15  ;;  %v165_v38 = vld [vmem:[#allocation2 + $0xe8] sm:$0xff]  ;;  %v3697_v39 = vpack.c.bf16 %v147_v36, %v146_v35  ;;  %v148_v41 = vld [vmem:[#allocation2 + $0x60] sm:$0xff]  ;;  %v166_v43 = vld [vmem:[#allocation2 + $0xf0] sm:$0xff] }
  0x78   :  { %3684 = vmatprep.subr.bf16.mxu0 %v3683_v16  ;;  %v3699_v40 = vpack.c.bf16 %v165_v38, %v164_v37  ;;  %v149_v42 = vld [vmem:[#allocation2 + $0x68] sm:$0xff]  ;;  %v167_v44 = vld [vmem:[#allocation2 + $0xf8] sm:$0xff]  ;;  %v150_v47 = vld [vmem:[#allocation2 + $0x70] sm:$0xff] }
  0x79   :  { %v3701_v45 = vpack.c.bf16 %v149_v42, %v148_v41  ;;  %v3703_v46 = vpack.c.bf16 %v167_v44, %v166_v43  ;;  %v151_v48 = vld [vmem:[#allocation2 + $0x78] sm:$0xff]  ;;  %v260_v55 = vld [vmem:[#allocation4 + $0x8] sm:$0xff]  ;;  %v263_v56 = vld [vmem:[#allocation4 + $0x20] sm:$0xff] }
  0x7a   :  { %v3705_v49 = vpack.c.bf16 %v151_v48, %v150_v47  ;;  %v259_v57 = vld [vmem:[#allocation4] sm:$0xff]  ;;  %v3707_v58 = vpack.c.bf16 %v263_v56, %v260_v55  ;;  %v262_v60 = vld [vmem:[#allocation4 + $0x18] sm:$0xff]  ;;  %v261_v61 = vld [vmem:[#allocation4 + $0x10] sm:$0xff]  ;;  %v4334_v48 = vmov 0.0  }
  0x7b   :  { %3686 = vmatpush3.bf16.msra.mxu0 %v3685_v21  ;;  %v264_v62 = vld [vmem:[#allocation4 + $0x28] sm:$0xff]  ;;  %v3709_v63 = vpack.c.bf16 %v262_v60, %v259_v57  ;;  %v266_v1 = vld [vmem:[#allocation4 + $0x38] sm:$0xff]  ;;  %v269_v2 = vld [vmem:[#allocation4 + $0x50] sm:$0xff]  ;;  %371 = vmatprep.mubr.f32.mxu1 %v4334_v48 }
  0x7c   :  { %3688 = vmatprep.subr.bf16.mxu0 %v3687_v22  ;;  %v3740_v0 = vpack.c.bf16 %v264_v62, %v261_v61  ;;  %v265_v3 = vld [vmem:[#allocation4 + $0x30] sm:$0xff]  ;;  %3708 = vmatprep.subr.bf16.mxu1 %v3707_v58  ;;  %v3711_v4 = vpack.c.bf16 %v269_v2, %v266_v1  ;;  %v268_v5 = vld [vmem:[#allocation4 + $0x48] sm:$0xff]  ;;  %v267_v6 = vld [vmem:[#allocation4 + $0x40] sm:$0xff] }
  0x7d   :  { %v270_v7 = vld [vmem:[#allocation4 + $0x58] sm:$0xff]  ;;  %3710 = vmatpush1.bf16.msra.mxu1 %v3709_v63  ;;  %v3713_v8 = vpack.c.bf16 %v268_v5, %v265_v3  ;;  %v272_v10 = vld [vmem:[#allocation4 + $0x68] sm:$0xff]  ;;  %v275_v11 = vld [vmem:[#allocation4 + $0x80] sm:$0xff] }
  0x7e   :  { %v3743_v9 = vpack.c.bf16 %v270_v7, %v267_v6  ;;  %v271_v12 = vld [vmem:[#allocation4 + $0x60] sm:$0xff]  ;;  %3712 = vmatprep.subr.bf16.mxu1 %v3711_v4  ;;  %v3715_v13 = vpack.c.bf16 %v275_v11, %v272_v10  ;;  %v274_v14 = vld [vmem:[#allocation4 + $0x78] sm:$0xff]  ;;  %v273_v15 = vld [vmem:[#allocation4 + $0x70] sm:$0xff] }
  0x7f   :  { %3690 = vmatpush3.bf16.msra.mxu0 %v3689_v27  ;;  %v276_v16 = vld [vmem:[#allocation4 + $0x88] sm:$0xff]  ;;  %v278_v17 = vld [vmem:[#allocation4 + $0x98] sm:$0xff]  ;;  %v281_v18 = vld [vmem:[#allocation4 + $0xb0] sm:$0xff]  ;;  %v3717_v19 = vpack.c.bf16 %v274_v14, %v271_v12 }
  0x80   :  { %3692 = vmatprep.subr.bf16.mxu0 %v3691_v28  ;;  %v3746_v20 = vpack.c.bf16 %v276_v16, %v273_v15  ;;  %v3719_v21 = vpack.c.bf16 %v281_v18, %v278_v17  ;;  %v277_v26 = vld [vmem:[#allocation4 + $0x90] sm:$0xff]  ;;  %v280_v27 = vld [vmem:[#allocation4 + $0xa8] sm:$0xff]  ;;  %v279_v28 = vld [vmem:[#allocation4 + $0xa0] sm:$0xff] }
  0x81   :  { %3714 = vmatpush1.bf16.msra.mxu1 %v3713_v8  ;;  %v3721_v29 = vpack.c.bf16 %v280_v27, %v277_v26  ;;  %v282_v30 = vld [vmem:[#allocation4 + $0xb8] sm:$0xff]  ;;  %v284_v32 = vld [vmem:[#allocation4 + $0xc8] sm:$0xff]  ;;  %v283_v35 = vld [vmem:[#allocation4 + $0xc0] sm:$0xff] }
  0x82   :  { %3716 = vmatprep.subr.bf16.mxu1 %v3715_v13  ;;  %v3749_v31 = vpack.c.bf16 %v282_v30, %v279_v28  ;;  %v286_v36 = vld [vmem:[#allocation4 + $0xd8] sm:$0xff]  ;;  %v285_v37 = vld [vmem:[#allocation4 + $0xd0] sm:$0xff]  ;;  %v295_v55 = vld [vmem:[#allocation4 + $0x120] sm:$0xff] }
  0x83   :  { %3694 = vmatpush3.bf16.msra.mxu0 %v3693_v33  ;;  %v287_v33 = vld [vmem:[#allocation4 + $0xe0] sm:$0xff]  ;;  %v3725_v38 = vpack.c.bf16 %v286_v36, %v283_v35  ;;  %v290_v41 = vld [vmem:[#allocation4 + $0xf8] sm:$0xff]  ;;  %v293_v42 = vld [vmem:[#allocation4 + $0x110] sm:$0xff] }
  0x84   :  { %3696 = vmatprep.subr.bf16.mxu0 %v3695_v34  ;;  %v3723_v34 = vpack.c.bf16 %v287_v33, %v284_v32  ;;  %v289_v43 = vld [vmem:[#allocation4 + $0xf0] sm:$0xff]  ;;  %v3727_v44 = vpack.c.bf16 %v293_v42, %v290_v41  ;;  %v294_v47 = vld [vmem:[#allocation4 + $0x118] sm:$0xff]  ;;  %v300_v60 = vld [vmem:[#allocation4 + $0x148] sm:$0xff] }
  0x85   :  { %3718 = vmatpush1.bf16.msra.mxu1 %v3717_v19  ;;  %v298_v57 = vld [vmem:[#allocation4 + $0x138] sm:$0xff]  ;;  %v297_v58 = vld [vmem:[#allocation4 + $0x130] sm:$0xff]  ;;  %v304_v3 = vld [vmem:[#allocation4 + $0x168] sm:$0xff] }
  0x86   :  { %3720 = vmatprep.subr.bf16.mxu1 %v3719_v21  ;;  %v3733_v61 = vpack.c.bf16 %v298_v57, %v295_v55  ;;  %v302_v62 = vld [vmem:[#allocation4 + $0x158] sm:$0xff]  ;;  %v305_v63 = vld [vmem:[#allocation4 + $0x170] sm:$0xff]  ;;  %v303_v4 = vld [vmem:[#allocation4 + $0x160] sm:$0xff] }
  0x87   :  { %3698 = vmatpush3.bf16.msra.mxu0 %v3697_v39  ;;  %v288_v39 = vld [vmem:[#allocation4 + $0xe8] sm:$0xff]  ;;  %v3735_v1 = vpack.c.bf16 %v305_v63, %v302_v62  ;;  %v301_v2 = vld [vmem:[#allocation4 + $0x150] sm:$0xff]  ;;  %v306_v5 = vld [vmem:[#allocation4 + $0x178] sm:$0xff] }
  0x88   :  { %3700 = vmatprep.subr.bf16.mxu0 %v3699_v40  ;;  %v3752_v40 = vpack.c.bf16 %v288_v39, %v285_v37  ;;  %v3737_v6 = vpack.c.bf16 %v304_v3, %v301_v2  ;;  %v3761_v7 = vpack.c.bf16 %v306_v5, %v303_v4  ;;  %v4518_v8 = vld [vmem:[%s4916_s2] sm:$0xff] }
  0x89   :  { %3722 = vmatpush1.bf16.msra.mxu1 %v3721_v29  ;;  %v3219_v13 = vld [vmem:[%s4918_s4] ss:$0 sm:$0xff] }
  0x8a   :  { %3724 = vmatprep.subr.bf16.mxu1 %v3723_v34 }
  0x8b   :  { %3702 = vmatpush3.bf16.msra.mxu0 %v3701_v45  ;;  %v292_v45 = vld [vmem:[#allocation4 + $0x108] sm:$0xff] }
  0x8c   :  { %3704 = vmatprep.subr.bf16.mxu0 %v3703_v46  ;;  %v291_v46 = vld [vmem:[#allocation4 + $0x100] sm:$0xff] }
  0x8d   :  { %3726 = vmatpush1.bf16.msra.mxu1 %v3725_v38  ;;  %v4581_v38 = vshrl.u32 %v124_v50, 7 }
  0x8e   :  { %3728 = vmatprep.subr.bf16.mxu1 %v3727_v44 }
  0x8f   :  { %3706 = vmatpush3.bf16.msra.mxu0 %v3705_v49  ;;  %v3729_v49 = vpack.c.bf16 %v292_v45, %v289_v43  ;;  %vm4585_vm5 = vcmp.le.s32.totalorder %v4494_v51, %v4581_v38 }
  0x90   :  { %3739 = vmatprep.subr.bf16.mxu0 %v4333_v59 }
  0x91   :  { %3730 = vmatpush1.bf16.msra.mxu1 %v3729_v49 }
  0xef   :  { %v129_v53 = vpop.permute.xlu0 %128 }
  0xf0   :  { %vm130_vm0 = vcmp.eq.s32.totalorder %v4494_v51, %v129_v53  ;;  %vm131_vm1 = vcmp.eq.s32.totalorder %v126_v52, %v129_v53  ;;  %v3755_v52 = vpack.c.bf16 %v294_v47, %v291_v46  ;;  %v296_v53 = vld [vmem:[#allocation4 + $0x128] sm:$0xff] }
  0xf1   :  { %3217 = vmatprep.mubr.msk.f32.mxu0 %vm131_vm1, %v4332_v54 }
  0xf2   :  { %3218 = vmatmul.mubr.msk.f32.vlgmr.msra.gmra.mrb[0].mxu0 %vm130_vm0, %v4332_v54  ;;  %v299_v54 = vld [vmem:[#allocation4 + $0x140] sm:$0xff] }
  0xf3   :  { %3741 = vmatpush3.bf16.msra.mxu0 %v3740_v0  ;;  %3487 = vmatprep.mubr.msk.f32.mxu0 %vm4335_vm2, %v4334_v48  ;;  %v3731_v56 = vpack.c.bf16 %v299_v54, %v296_v53  ;;  %v3758_v0 = vpack.c.bf16 %v300_v60, %v297_v58 }
  0xf4   :  { %3742 = vmatprep.subr.bf16.mxu0 %v4333_v59 }
  0xf5   :  { %3732 = vmatprep.subr.bf16.mxu1 %v3731_v56 }
  0xf6   :  { %3734 = vmatpush1.bf16.msra.mxu1 %v3733_v61 }
  0xf7   :  { %3744 = vmatpush3.bf16.msra.mxu0 %v3743_v9  ;;  %3736 = vmatprep.subr.bf16.mxu1 %v3735_v1 }
  0xf8   :  { %3745 = vmatprep.subr.bf16.mxu0 %v4333_v59 }
  0xfa   :  { %3738 = vmatpush1.bf16.msra.mxu1 %v3737_v6 }
  0xfb   :  { %3747 = vmatpush3.bf16.msra.mxu0 %v3746_v20  ;;  %3490 = vmatprep.subr.mxu1 %v4334_v48 }
  0xfc   :  { %3748 = vmatprep.subr.bf16.mxu0 %v4333_v59 }
  0xff   :  { %3750 = vmatpush3.bf16.msra.mxu0 %v3749_v31 }
 0x100   :  { %3751 = vmatprep.subr.bf16.mxu0 %v4333_v59 }
 0x103   :  { %3753 = vmatpush3.bf16.msra.mxu0 %v3752_v40 }
 0x104   :  { %3754 = vmatprep.subr.bf16.mxu0 %v4333_v59 }
 0x107   :  { %3756 = vmatpush3.bf16.msra.mxu0 %v3755_v52 }
 0x108   :  { %3757 = vmatprep.subr.bf16.mxu0 %v4333_v59 }
 0x10b   :  { %3759 = vmatpush3.bf16.msra.mxu0 %v3758_v0 }
 0x10c   :  { %3760 = vmatprep.subr.bf16.mxu0 %v4333_v59 }
 0x10f   :  { %3762 = vmatpush3.bf16.msra.mxu0 %v3761_v7 }
 0x110   :  { %3763 = vmatprep.subr.bf16.mxu0 %v4333_v59 }
 0x1c5   :  { %v3282_v22 = vpop.f32.mrb[0].mxu0 }
 0x1c6   :  { %v3283_v23 = vpop.f32.mrb[1].mxu0 }
 0x1c7   :  { %v4502_v24 = vadd.f32 %v3283_v23, %v3282_v22  ;;  %v4551_v22 = vld [vmem:[%s4917_s3] sm:$0xff] }
 0x1c9   :  { %v244_v25 = vmul.f32 %v4502_v24, %v4502_v24 }
 0x1cb   :  { %245 = vadd.xlane.f32.xlu0 %v244_v25 }
 0x1e1   :  { %640 = vrot.lane.b32.xlu0 %v4518_v8, %s4322_s22 }
 0x258   :  { %v246_v9 = vpop.xlane.xlu0 %245 }
 0x259   :  { %v248_v10 = vmul.f32 0.0078125, %v246_v9 }
 0x25b   :  { %v249_v11 = vadd.f32 1e-05, %v248_v10 }
 0x25c   :  { %v4592_v45 = vpop.permute.xlu0 %640 }
 0x25d   :  { %4117 = vrsqrt.f32 %v249_v11 }
 0x267   :  { %v4118_v12 = vpop.eup %4117 }
 0x268   :  { %v251_v14 = vmul.f32 %v4118_v12, %v4502_v24 }
 0x26a   :  { %v258_v15 = vmul.f32 %v3219_v13, %v251_v14 }
 0x26c   :  { %372 = vmatmul.mubr.f32.vlgmr.msra.gmra.mrb[0].mxu1 %v258_v15  ;;  %3488 = vmatmul.mubr.f32.vlgmr.msra.gmra.mrb[2].mxu0 %v258_v15 }
 0x26d   :  { %3492 = vmatprep.mubr.msk.f32.mxu1 %vm4335_vm2, %v4334_v48  ;;  %3562 = vmatprep.mubr.msk.f32.mxu0 %vm4335_vm2, %v4334_v48 }
 0x33f   :  { %v4530_v16 = vpop.f32.mrb[0].mxu1  ;;  %v4532_v17 = vpop.f32.mrb[2].mxu0 }
 0x340   :  { %v3489_v18 = vpop.f32.mrb[3].mxu0  ;;  %449 = vrot.lane.b32.xlu1 %v4530_v16, %s4336_s29  ;;  %v4536_v19 = vpop.f32.mrb[1].mxu1  ;;  %v457_v31 = vmul.f32 %v4530_v16, %v4518_v8  ;;  %v643_v56 = vmul.f32 %v4592_v45, %v4530_v16 }
 0x341   :  { %v468_v26 = vmul.f32 %v4536_v19, %v4518_v8  ;;  %v654_v49 = vmul.f32 %v4592_v45, %v4536_v19 }
 0x344   :  { %461 = vrot.lane.b32.xlu1 %v4536_v19, %s4336_s29 }
 0x348   :  { %464 = vrot.lane.b32.xlu1 %v4536_v19, %s4330_s8 }
 0x34c   :  { %452 = vrot.lane.b32.xlu1 %v4530_v16, %s4330_s8 }
 0x350   :  { %635 = vrot.lane.b32.xlu1 %v4530_v16, %s4337_s30 }
 0x354   :  { %650 = vrot.lane.b32.xlu1 %v4536_v19, %s4337_s30 }
 0x3b2   :  { %v450_v20 = vpop.permute.xlu1 %449 }
 0x3b6   :  { %v462_v21 = vpop.permute.xlu1 %461 }
 0x3ba   :  { %v4553_v23 = vpop.permute.xlu1 %464 }
 0x3bb   :  { %v467_v25 = vsel %vm455_vm3, %v462_v21, %v4553_v23 }
 0x3bc   :  { %v469_v27 = vmul.f32 %v467_v25, %v4551_v22 }
 0x3be   :  { %v470_v28 = vadd.f32 %v469_v27, %v468_v26  ;;  %v4560_v29 = vpop.permute.xlu1 %452 }
 0x3bf   :  { %v456_v30 = vsel %vm455_vm3, %v450_v20, %v4560_v29 }
 0x3c0   :  { %v458_v32 = vmul.f32 %v456_v30, %v4551_v22  ;;  %3491 = vmatpush3.xpose.msk.msra.mxu1 %vm471_vm4, %v470_v28 }
 0x3c1   :  { %3495 = vmatprep.subr.mxu1 %v4334_v48 }
 0x3c2   :  { %v459_v33 = vadd.f32 %v458_v32, %v457_v31  ;;  %v636_v34 = vpop.permute.xlu1 %635 }
 0x3c3   :  { %v638_v46 = vsel %vm455_vm3, %v636_v34, %v450_v20 }
 0x3c4   :  { %3493 = vmatmul.mubr.msk.f32.vlgmr.msra.gmra.mrb[2].mxu1 %vm471_vm4, %v459_v33  ;;  %v644_v47 = vmul.f32 %v638_v46, %v4551_v22 }
 0x3c5   :  { %3496 = vmatpush3.msra.mxu1 %v4532_v17  ;;  %3497 = vmatprep.mubr.msk.f32.mxu1 %vm4335_vm2, %v4334_v48 }
 0x3c6   :  { %v4573_v35 = vpop.permute.xlu1 %650  ;;  %3500 = vmatprep.subr.mxu1 %v4334_v48 }
 0x3c7   :  { %v653_v36 = vsel %vm455_vm3, %v4573_v35, %v462_v21 }
 0x3c8   :  { %v655_v37 = vmul.f32 %v653_v36, %v4551_v22 }
 0x3ca   :  { %657 = vrot.lane.b32.xlu0 %v655_v37, %s4322_s22 }
 0x43c   :  { %v658_v51 = vpop.permute.xlu0 %657 }
 0x43d   :  { %v660_v52 = vadd.f32 %v658_v51, %v654_v49 }
 0x497   :  { %v544_v40 = vpop.f32.mrb[2].mxu1 }
 0x498   :  { %v548_v41 = vmul.f32 0.17677669, %v544_v40  ;;  %v3494_v42 = vpop.f32.mrb[3].mxu1 }
 0x49a   :  { %v549_v43 = vsel %vm4585_vm5, %v548_v41, -1e+30 }
 0x49b   :  { %v551_v44 = vsel %vm550_vm6, %v549_v43, -inf }
 0x49c   :  { %552 = vmax.xlane.f32.xlu1 %v551_v44 }
 0x4ad   :  { %646 = vrot.lane.b32.xlu1 %v644_v47, %s4322_s22 }
 0x4b1   :  { %665 = vrot.lane.b32.xlu1 %v660_v52, %s4338_s14 }
 0x529   :  { %v553_v53 = vpop.xlane.xlu1 %552 }
 0x52a   :  { %v554_v54 = vsub.f32 %v549_v43, %v553_v53 }
 0x52c   :  { %v555_v55 = vmul.f32 1.442695, %v554_v54 }
 0x52d   :  { %v647_v57 = vpop.permute.xlu1 %646 }
 0x52e   :  { %4119 = vpow2.f32 %v555_v55  ;;  %v649_v58 = vadd.f32 %v647_v57, %v643_v56 }
 0x530   :  { %662 = vrot.lane.b32.xlu1 %v649_v58, %s4338_s14 }
 0x531   :  { %v666_v62 = vpop.permute.xlu1 %665 }
 0x534   :  { %845 = vrot.lane.b32.xlu1 %v4536_v19, %s4339_s15 }
 0x538   :  { %v4120_v60 = vpop.eup %4119  ;;  %831 = vrot.lane.b32.xlu1 %v4530_v16, %s4339_s15 }
 0x539   :  { %v557_v61 = vsel %vm550_vm6, %v4120_v60, 0.0 }
 0x53a   :  { %558 = vadd.xlane.f32.xlu0 %v557_v61 }
 0x53c   :  { %835 = vrot.lane.b32.xlu1 %v4518_v8, %s4340_s16 }
 0x5a2   :  { %v663_v63 = vpop.permute.xlu1 %662 }
 0x5a6   :  { %v846_v0 = vpop.permute.xlu1 %845 }
 0x5a7   :  { %v848_v15 = vsel %vm455_vm3, %v846_v0, %v4573_v35  ;;  %v1036_v37 = vsel %vm455_vm3, %v4553_v23, %v846_v0 }
 0x5a8   :  { %v850_v18 = vmul.f32 %v848_v15, %v4551_v22  ;;  %v1038_v40 = vmul.f32 %v1036_v37, %v4551_v22 }
 0x5aa   :  { %v832_v1 = vpop.permute.xlu1 %831 }
 0x5ab   :  { %v834_v2 = vsel %vm455_vm3, %v832_v1, %v636_v34  ;;  %v1025_v41 = vsel %vm455_vm3, %v4560_v29, %v832_v1 }
 0x5ac   :  { %v839_v3 = vmul.f32 %v834_v2, %v4551_v22  ;;  %v1030_v42 = vmul.f32 %v1025_v41, %v4551_v22  ;;  %v1235_v41 = vld [vmem:[#allocation6 + $0x28] sm:$0xff] }
 0x5ae   :  { %841 = vrot.lane.b32.xlu1 %v839_v3, %s4340_s16  ;;  %v4632_v20 = vpop.permute.xlu1 %835 }
 0x5af   :  { %v849_v27 = vmul.f32 %v4632_v20, %v4536_v19  ;;  %v838_v32 = vmul.f32 %v4632_v20, %v4530_v16 }
 0x5c7   :  { %v559_v4 = vpop.xlane.xlu0 %558 }
 0x5c8   :  { %4121 = vrcp.f32 %v559_v4 }
 0x5d2   :  { %v4122_v5 = vpop.eup %4121 }
 0x5d3   :  { %v561_v6 = vmul.f32 %v4122_v5, %v4120_v60 }
 0x5d5   :  { %3498 = vmatmul.mubr.msk.f32.vlgmr.msra.gmra.mrb[4].mxu1 %vm550_vm6, %v561_v6 }
 0x5d6   :  { %3501 = vmatpush3.xpose.msk.msra.mxu1 %vm471_vm4, %v666_v62  ;;  %3502 = vmatprep.mubr.msk.f32.mxu1 %vm4335_vm2, %v4334_v48 }
 0x5d7   :  { %3505 = vmatprep.subr.mxu1 %v4334_v48 }
 0x5d9   :  { %3503 = vmatmul.mubr.msk.f32.vlgmr.msra.gmra.mrb[6].mxu1 %vm471_vm4, %v663_v63 }
 0x5da   :  { %3507 = vmatprep.mubr.msk.f32.mxu1 %vm4335_vm2, %v4334_v48 }
 0x620   :  { %v842_v31 = vpop.permute.xlu1 %841 }
 0x621   :  { %v844_v34 = vadd.f32 %v842_v31, %v838_v32 }
 0x6a8   :  { %v4621_v7 = vpop.f32.mrb[4].mxu1 }
 0x6a9   :  { %v3499_v9 = vpop.f32.mrb[5].mxu1 }
 0x6ac   :  { %v737_v10 = vpop.f32.mrb[6].mxu1 }
 0x6ad   :  { %v741_v11 = vmul.f32 0.17677669, %v737_v10  ;;  %v3504_v12 = vpop.f32.mrb[7].mxu1 }
 0x6af   :  { %v742_v13 = vsel %vm4585_vm5, %v741_v11, -1e+30 }
 0x6b0   :  { %v743_v14 = vsel %vm550_vm6, %v742_v13, -inf }
 0x6b1   :  { %744 = vmax.xlane.f32.xlu0 %v743_v14 }
 0x6c7   :  { %852 = vrot.lane.b32.xlu0 %v850_v18, %s4340_s16 }
 0x6cb   :  { %755 = vrot.lane.b32.xlu0 %v4532_v17, %s4338_s14 }
 0x73e   :  { %v745_v21 = vpop.xlane.xlu0 %744 }
 0x73f   :  { %v746_v25 = vsub.f32 %v742_v13, %v745_v21 }
 0x741   :  { %v747_v26 = vmul.f32 1.442695, %v746_v25 }
 0x742   :  { %v853_v28 = vpop.permute.xlu0 %852 }
 0x743   :  { %4123 = vpow2.f32 %v747_v26  ;;  %v855_v30 = vadd.f32 %v853_v28, %v849_v27 }
 0x745   :  { %860 = vrot.lane.b32.xlu0 %v855_v30, %s4340_s16 }
 0x746   :  { %v756_v33 = vpop.permute.xlu0 %755 }
 0x747   :  { %3506 = vmatpush3.msra.mxu1 %v756_v33  ;;  %v1231_v33 = vld [vmem:[#allocation6 + $0x8] sm:$0xff] }
 0x748   :  { %3510 = vmatprep.subr.mxu1 %v4334_v48 }
 0x749   :  { %857 = vrot.lane.b32.xlu0 %v844_v34, %s4340_s16  ;;  %v1232_v34 = vld [vmem:[#allocation6 + $0x10] sm:$0xff] }
 0x74d   :  { %v4124_v35 = vpop.eup %4123 }
 0x74e   :  { %v749_v36 = vsel %vm550_vm6, %v4124_v35, 0.0 }
 0x74f   :  { %750 = vadd.xlane.f32.xlu1 %v749_v36  ;;  %v1233_v36 = vld [vmem:[#allocation6 + $0x18] sm:$0xff] }
 0x750   :  { %v3767_v37 = vpack.c.bf16 %v1233_v36, %v1232_v34  ;;  %v1351_v36 = vld [vmem:[#allocation7 + $0x98] sm:$0xff] }
 0x760   :  { %1026 = vrot.lane.b32.xlu1 %v4518_v8, %s4338_s14 }
 0x764   :  { %1040 = vrot.lane.b32.xlu1 %v1038_v40, %s4338_s14  ;;  %v1234_v40 = vld [vmem:[#allocation6 + $0x20] sm:$0xff] }
 0x768   :  { %1032 = vrot.lane.b32.xlu1 %v1030_v42, %s4338_s14  ;;  %v3770_v42 = vpack.c.bf16 %v1235_v41, %v1234_v40  ;;  %v1348_v40 = vld [vmem:[#allocation7 + $0x80] sm:$0xff] }
 0x76c   :  { %949 = vrot.lane.b32.xlu1 %v4532_v17, %s4340_s16 }
 0x7b7   :  { %v861_v29 = vpop.permute.xlu0 %860 }
 0x7dc   :  { %v751_v43 = vpop.xlane.xlu1 %750 }
 0x7dd   :  { %4125 = vrcp.f32 %v751_v43  ;;  %v1236_v43 = vld [vmem:[#allocation6 + $0x30] sm:$0xff] }
 0x7e0   :  { %v4654_v23 = vpop.permute.xlu1 %1026 }
 0x7e1   :  { %v1037_v8 = vmul.f32 %v4654_v23, %v4536_v19  ;;  %v1029_v51 = vmul.f32 %v4654_v23, %v4530_v16  ;;  %v858_v19 = vpop.permute.xlu0 %857 }
 0x7e4   :  { %v1041_v44 = vpop.permute.xlu1 %1040 }
 0x7e5   :  { %v1043_v46 = vadd.f32 %v1041_v44, %v1037_v8  ;;  %v1237_v8 = vld [vmem:[#allocation6 + $0x38] sm:$0xff] }
 0x7e6   :  { %v3773_v44 = vpack.c.bf16 %v1237_v8, %v1236_v43  ;;  %v1350_v43 = vld [vmem:[#allocation7 + $0x90] sm:$0xff] }
 0x7e7   :  { %v4126_v47 = vpop.eup %4125  ;;  %v1354_v8 = vld [vmem:[#allocation7 + $0xb0] sm:$0xff] }
 0x7e8   :  { %v753_v22 = vmul.f32 %v4126_v47, %v4124_v35  ;;  %v1033_v49 = vpop.permute.xlu1 %1032  ;;  %v1239_v47 = vld [vmem:[#allocation6 + $0x48] sm:$0xff] }
 0x7e9   :  { %v1035_v52 = vadd.f32 %v1033_v49, %v1029_v51  ;;  %v1240_v51 = vld [vmem:[#allocation6 + $0x50] sm:$0xff] }
 0x7ea   :  { %3508 = vmatmul.mubr.msk.f32.vlgmr.msra.gmra.mrb[8].mxu1 %vm550_vm6, %v753_v22  ;;  %v1241_v22 = vld [vmem:[#allocation6 + $0x58] sm:$0xff] }
 0x7eb   :  { %3511 = vmatpush3.xpose.msk.msra.mxu1 %vm471_vm4, %v861_v29  ;;  %1045 = vrot.lane.b32.xlu1 %v1035_v52, %s4322_s22  ;;  %v3779_v49 = vpack.c.bf16 %v1241_v22, %v1240_v51  ;;  %v1242_v52 = vld [vmem:[#allocation6 + $0x60] sm:$0xff]  ;;  %v3829_v51 = vpack.c.bf16 %v1354_v8, %v1350_v43  ;;  %v1393_v43 = vld [vmem:[#allocation7 + $0x1e8] sm:$0xff] }
 0x7ec   :  { %v950_v53 = vpop.permute.xlu1 %949  ;;  %3512 = vmatprep.mubr.msk.f32.mxu1 %vm4335_vm2, %v4334_v48  ;;  %3515 = vmatprep.subr.mxu1 %v4334_v48 }
 0x7ee   :  { %3513 = vmatmul.mubr.msk.f32.vlgmr.msra.gmra.mrb[10].mxu1 %vm471_vm4, %v858_v19 }
 0x7ef   :  { %3516 = vmatpush3.msra.mxu1 %v950_v53  ;;  %3517 = vmatprep.mubr.msk.f32.mxu1 %vm4335_vm2, %v4334_v48  ;;  %v1243_v53 = vld [vmem:[#allocation6 + $0x68] sm:$0xff] }
 0x7f0   :  { %3520 = vmatprep.subr.mxu1 %v4334_v48  ;;  %v3782_v19 = vpack.c.bf16 %v1243_v53, %v1242_v52 }
 0x85d   :  { %v1046_v6 = vpop.permute.xlu1 %1045 }
 0x8bd   :  { %v827_v16 = vpop.f32.mrb[8].mxu1 }
 0x8be   :  { %v3509_v54 = vpop.f32.mrb[9].mxu1 }
 0x8bf   :  { %v1245_v54 = vld [vmem:[#allocation6 + $0x78] sm:$0xff] }
 0x8c1   :  { %v932_v55 = vpop.f32.mrb[10].mxu1 }
 0x8c2   :  { %v936_v56 = vmul.f32 0.17677669, %v932_v55  ;;  %v3514_v57 = vpop.f32.mrb[11].mxu1 }
 0x8c4   :  { %v937_v58 = vsel %vm4585_vm5, %v936_v56, -1e+30 }
 0x8c5   :  { %v938_v60 = vsel %vm550_vm6, %v937_v58, -inf }
 0x8c6   :  { %939 = vmax.xlane.f32.xlu0 %v938_v60 }
 0x953   :  { %v940_v61 = vpop.xlane.xlu0 %939 }
 0x954   :  { %v941_v62 = vsub.f32 %v937_v58, %v940_v61 }
 0x956   :  { %v942_v63 = vmul.f32 1.442695, %v941_v62 }
 0x958   :  { %4127 = vpow2.f32 %v942_v63 }
 0x962   :  { %v4128_v0 = vpop.eup %4127 }
 0x963   :  { %v944_v1 = vsel %vm550_vm6, %v4128_v0, 0.0 }
 0x964   :  { %945 = vadd.xlane.f32.xlu0 %v944_v1  ;;  %v1333_v1 = vld [vmem:[#allocation7 + $0x8] sm:$0xff] }
 0x97a   :  { %1048 = vrot.lane.b32.xlu0 %v1043_v46, %s4322_s22  ;;  %v1238_v46 = vld [vmem:[#allocation6 + $0x40] sm:$0xff] }
 0x97b   :  { %v3776_v29 = vpack.c.bf16 %v1239_v47, %v1238_v46  ;;  %v1357_v46 = vld [vmem:[#allocation7 + $0xc8] sm:$0xff] }
 0x97c   :  { %v1361_v47 = vld [vmem:[#allocation7 + $0xe8] sm:$0xff] }
 0x97d   :  { %v3799_v22 = vpack.c.bf16 %v1361_v47, %v1357_v46  ;;  %v1391_v46 = vld [vmem:[#allocation7 + $0x1d8] sm:$0xff] }
 0x97e   :  { %v1395_v47 = vld [vmem:[#allocation7 + $0x1f8] sm:$0xff] }
 0x9f1   :  { %v946_v2 = vpop.xlane.xlu0 %945 }
 0x9f2   :  { %4129 = vrcp.f32 %v946_v2  ;;  %v1337_v2 = vld [vmem:[#allocation7 + $0x28] sm:$0xff] }
 0x9f5   :  { %v1049_v5 = vpop.permute.xlu0 %1048 }
 0x9fc   :  { %v4130_v3 = vpop.eup %4129 }
 0x9fd   :  { %v948_v4 = vmul.f32 %v4130_v3, %v4128_v0  ;;  %v1335_v3 = vld [vmem:[#allocation7 + $0x18] sm:$0xff] }
 0x9ff   :  { %3518 = vmatmul.mubr.msk.f32.vlgmr.msra.gmra.mrb[12].mxu1 %vm550_vm6, %v948_v4  ;;  %v3787_v4 = vpack.c.bf16 %v1337_v2, %v1333_v1  ;;  %v1371_v2 = vld [vmem:[#allocation7 + $0x138] sm:$0xff] }
 0xa00   :  { %3521 = vmatpush3.xpose.msk.msra.mxu1 %vm471_vm4, %v1049_v5  ;;  %3522 = vmatprep.mubr.msk.f32.mxu1 %vm4335_vm2, %v4334_v48  ;;  %v1339_v5 = vld [vmem:[#allocation7 + $0x38] sm:$0xff] }
 0xa01   :  { %3525 = vmatprep.subr.mxu1 %v4334_v48 }
 0xa03   :  { %3523 = vmatmul.mubr.msk.f32.vlgmr.msra.gmra.mrb[14].mxu1 %vm471_vm4, %v1046_v6  ;;  %v1332_v6 = vld [vmem:[#allocation7] sm:$0xff] }
 0xa04   :  { %3527 = vmatprep.mubr.msk.f32.mxu1 %vm4335_vm2, %v4334_v48 }
 0xad2   :  { %v1021_v9 = vpop.f32.mrb[12].mxu1 }
 0xad3   :  { %v3519_v10 = vpop.f32.mrb[13].mxu1 }
 0xad4   :  { %v3819_v10 = vpack.c.bf16 %v1339_v5, %v1335_v3  ;;  %v1368_v3 = vld [vmem:[#allocation7 + $0x120] sm:$0xff] }
 0xad6   :  { %v1120_v11 = vpop.f32.mrb[14].mxu1 }
 0xad7   :  { %v1124_v12 = vmul.f32 0.17677669, %v1120_v11  ;;  %v3524_v13 = vpop.f32.mrb[15].mxu1 }
 0xad8   :  { %v1341_v13 = vld [vmem:[#allocation7 + $0x48] sm:$0xff] }
 0xad9   :  { %v1125_v14 = vsel %vm4585_vm5, %v1124_v12, -1e+30  ;;  %v1338_v12 = vld [vmem:[#allocation7 + $0x30] sm:$0xff] }
 0xada   :  { %v1126_v15 = vsel %vm550_vm6, %v1125_v14, -inf }
 0xadb   :  { %1127 = vmax.xlane.f32.xlu1 %v1126_v15  ;;  %v1345_v15 = vld [vmem:[#allocation7 + $0x68] sm:$0xff] }
 0xaec   :  { %1137 = vrot.lane.b32.xlu1 %v4532_v17, %s4322_s22  ;;  %v1230_v17 = vld [vmem:[#allocation6] sm:$0xff] }
 0xaed   :  { %v3764_v35 = vpack.c.bf16 %v1231_v33, %v1230_v17  ;;  %v1349_v17 = vld [vmem:[#allocation7 + $0x88] sm:$0xff] }
 0xaee   :  { %v1353_v33 = vld [vmem:[#allocation7 + $0xa8] sm:$0xff] }
 0xaef   :  { %3765 = vmatpush3.bf16.msra.mxu0 %v3764_v35  ;;  %v3795_v35 = vpack.c.bf16 %v1353_v33, %v1349_v17  ;;  %v1387_v17 = vld [vmem:[#allocation7 + $0x1b8] sm:$0xff] }
 0xaf0   :  { %1218 = vrot.lane.b32.xlu1 %v1021_v9, %s4340_s16  ;;  %3766 = vmatprep.subr.bf16.mxu0 %v4333_v59  ;;  %v1336_v9 = vld [vmem:[#allocation7 + $0x20] sm:$0xff] }
 0xaf1   :  { %v3789_v11 = vpack.c.bf16 %v1336_v9, %v1332_v6  ;;  %v1366_v6 = vld [vmem:[#allocation7 + $0x110] sm:$0xff] }
 0xaf2   :  { %v1370_v9 = vld [vmem:[#allocation7 + $0x130] sm:$0xff] }
 0xaf3   :  { %3768 = vmatpush3.bf16.msra.mxu0 %v3767_v37  ;;  %v1355_v37 = vld [vmem:[#allocation7 + $0xb8] sm:$0xff] }
 0xaf4   :  { %3769 = vmatprep.subr.bf16.mxu0 %v4333_v59  ;;  %v3827_v41 = vpack.c.bf16 %v1355_v37, %v1351_v36  ;;  %v1384_v36 = vld [vmem:[#allocation7 + $0x1a0] sm:$0xff]  ;;  %v1382_v37 = vld [vmem:[#allocation7 + $0x190] sm:$0xff] }
 0xaf7   :  { %3771 = vmatpush3.bf16.msra.mxu0 %v3770_v42  ;;  %v1352_v42 = vld [vmem:[#allocation7 + $0xa0] sm:$0xff] }
 0xaf8   :  { %3772 = vmatprep.subr.bf16.mxu0 %v4333_v59 }
 0xafb   :  { %3774 = vmatpush3.bf16.msra.mxu0 %v3773_v44  ;;  %v3797_v44 = vpack.c.bf16 %v1352_v42, %v1348_v40  ;;  %v1389_v42 = vld [vmem:[#allocation7 + $0x1c8] sm:$0xff] }
 0xafc   :  { %3775 = vmatprep.subr.bf16.mxu0 %v4333_v59 }
 0xaff   :  { %3777 = vmatpush3.bf16.msra.mxu0 %v3776_v29  ;;  %v1359_v29 = vld [vmem:[#allocation7 + $0xd8] sm:$0xff] }
 0xb00   :  { %3778 = vmatprep.subr.bf16.mxu0 %v4333_v59 }
 0xb03   :  { %3780 = vmatpush3.bf16.msra.mxu0 %v3779_v49  ;;  %v1363_v49 = vld [vmem:[#allocation7 + $0xf8] sm:$0xff] }
 0xb04   :  { %3781 = vmatprep.subr.bf16.mxu0 %v4333_v59  ;;  %v3831_v52 = vpack.c.bf16 %v1363_v49, %v1359_v29  ;;  %v1388_v29 = vld [vmem:[#allocation7 + $0x1c0] sm:$0xff]  ;;  %v1390_v49 = vld [vmem:[#allocation7 + $0x1d0] sm:$0xff] }
 0xb07   :  { %3783 = vmatpush3.bf16.msra.mxu0 %v3782_v19 }
 0xb08   :  { %3784 = vmatprep.subr.bf16.mxu0 %v4333_v59 }
 0xb68   :  { %v1128_v18 = vpop.xlane.xlu1 %1127 }
 0xb69   :  { %v1129_v21 = vsub.f32 %v1125_v14, %v1128_v18  ;;  %v1343_v18 = vld [vmem:[#allocation7 + $0x58] sm:$0xff] }
 0xb6b   :  { %v1130_v25 = vmul.f32 1.442695, %v1129_v21  ;;  %v1347_v21 = vld [vmem:[#allocation7 + $0x78] sm:$0xff] }
 0xb6c   :  { %v1138_v26 = vpop.permute.xlu1 %1137 }
 0xb6d   :  { %4131 = vpow2.f32 %v1130_v25  ;;  %3526 = vmatpush3.msra.mxu1 %v1138_v26  ;;  %v3791_v25 = vpack.c.bf16 %v1345_v15, %v1341_v13  ;;  %v3823_v26 = vpack.c.bf16 %v1347_v21, %v1343_v18  ;;  %v1372_v15 = vld [vmem:[#allocation7 + $0x140] sm:$0xff] }
 0xb6e   :  { %3788 = vmatprep.subr.bf16.mxu1 %v3787_v4  ;;  %v1376_v18 = vld [vmem:[#allocation7 + $0x160] sm:$0xff] }
 0xb70   :  { %v1219_v60 = vpop.permute.xlu1 %1218 }
 0xb77   :  { %v4132_v27 = vpop.eup %4131 }
 0xb78   :  { %v1132_v28 = vsel %vm550_vm6, %v4132_v27, 0.0 }
 0xb79   :  { %1133 = vadd.xlane.f32.xlu0 %v1132_v28  ;;  %v1344_v28 = vld [vmem:[#allocation7 + $0x60] sm:$0xff] }
 0xb8f   :  { %1214 = vrot.lane.b32.xlu0 %v827_v16, %s4322_s22  ;;  %v1244_v16 = vld [vmem:[#allocation6 + $0x70] sm:$0xff] }
 0xb90   :  { %v3785_v55 = vpack.c.bf16 %v1245_v54, %v1244_v16 }
 0xb92   :  { %3786 = vmatpush3.bf16.msra.mxu0 %v3785_v55  ;;  %v1356_v55 = vld [vmem:[#allocation7 + $0xc0] sm:$0xff] }
 0xb93   :  { %3820 = vmatprep.subr.bf16.mxu0 %v3819_v10  ;;  %v3837_v10 = vpack.c.bf16 %v1370_v9, %v1366_v6  ;;  %v1556_v6 = vld [vmem:[#allocation9 + $0x10] sm:$0xff]  ;;  %v1557_v9 = vld [vmem:[#allocation9 + $0x18] sm:$0xff] }
 0xc06   :  { %v1134_v30 = vpop.xlane.xlu0 %1133 }
 0xc07   :  { %4133 = vrcp.f32 %v1134_v30  ;;  %v1342_v30 = vld [vmem:[#allocation7 + $0x50] sm:$0xff] }
 0xc0a   :  { %v1215_v58 = vpop.permute.xlu0 %1214 }
 0xc0b   :  { %v1225_v61 = vsel %vm471_vm4, %v4621_v7, %v1215_v58  ;;  %v1334_v7 = vld [vmem:[#allocation7 + $0x10] sm:$0xff] }
 0xc0c   :  { %v1227_v62 = vsel %vm1226_vm7, %v1225_v61, %v1219_v60  ;;  %v3821_v14 = vpack.c.bf16 %v1338_v12, %v1334_v7  ;;  %v1362_v60 = vld [vmem:[#allocation7 + $0xf0] sm:$0xff]  ;;  %v1377_v7 = vld [vmem:[#allocation7 + $0x168] sm:$0xff]  ;;  %v1375_v12 = vld [vmem:[#allocation7 + $0x158] sm:$0xff] }
 0xc11   :  { %v4134_v31 = vpop.eup %4133 }
 0xc12   :  { %v1136_v32 = vmul.f32 %v4134_v31, %v4132_v27  ;;  %v1340_v27 = vld [vmem:[#allocation7 + $0x40] sm:$0xff] }
 0xc13   :  { %v3793_v31 = vpack.c.bf16 %v1344_v28, %v1340_v27  ;;  %v1378_v27 = vld [vmem:[#allocation7 + $0x170] sm:$0xff]  ;;  %v1381_v28 = vld [vmem:[#allocation7 + $0x188] sm:$0xff] }
 0xc14   :  { %3528 = vmatmul.mubr.msk.f32.vlgmr.msra.gmra.mrb[16].mxu1 %vm550_vm6, %v1136_v32  ;;  %v1346_v32 = vld [vmem:[#allocation7 + $0x70] sm:$0xff] }
 0xc15   :  { %1460 = vmatprep.mubr.f32.mxu1 %v4334_v48  ;;  %3790 = vmatpush1.bf16.msra.mxu1 %v3789_v11  ;;  %v3825_v34 = vpack.c.bf16 %v1346_v32, %v1342_v30  ;;  %v1373_v11 = vld [vmem:[#allocation7 + $0x148] sm:$0xff]  ;;  %v1383_v32 = vld [vmem:[#allocation7 + $0x198] sm:$0xff] }
 0xc16   :  { %3792 = vmatprep.subr.bf16.mxu1 %v3791_v25  ;;  %v3807_v13 = vpack.c.bf16 %v1377_v7, %v1373_v11  ;;  %v3809_v25 = vpack.c.bf16 %v1376_v18, %v1372_v15  ;;  %v1574_v11 = vld [vmem:[#allocation9 + $0xa0] sm:$0xff]  ;;  %v1575_v7 = vld [vmem:[#allocation9 + $0xa8] sm:$0xff]  ;;  %v1576_v18 = vld [vmem:[#allocation9 + $0xb0] sm:$0xff] }
 0xc19   :  { %3794 = vmatpush1.bf16.msra.mxu1 %v3793_v31  ;;  %v1385_v31 = vld [vmem:[#allocation7 + $0x1a8] sm:$0xff] }
 0xc1a   :  { %3796 = vmatprep.subr.bf16.mxu1 %v3795_v35  ;;  %v3811_v33 = vpack.c.bf16 %v1385_v31, %v1381_v28  ;;  %v1380_v35 = vld [vmem:[#allocation7 + $0x180] sm:$0xff]  ;;  %v1579_v31 = vld [vmem:[#allocation9 + $0xc8] sm:$0xff] }
 0xc1b   :  { %v3813_v40 = vpack.c.bf16 %v1384_v36, %v1380_v35  ;;  %v1580_v35 = vld [vmem:[#allocation9 + $0xd0] sm:$0xff]  ;;  %v1581_v36 = vld [vmem:[#allocation9 + $0xd8] sm:$0xff] }
 0xc1d   :  { %3798 = vmatpush1.bf16.msra.mxu1 %v3797_v44  ;;  %v3815_v44 = vpack.c.bf16 %v1393_v43, %v1389_v42  ;;  %v1582_v43 = vld [vmem:[#allocation9 + $0xe0] sm:$0xff] }
 0xc1e   :  { %3800 = vmatprep.subr.bf16.mxu1 %v3799_v22  ;;  %v1392_v22 = vld [vmem:[#allocation7 + $0x1e0] sm:$0xff] }
 0xce7   :  { %v1209_v56 = vpop.f32.mrb[16].mxu1 }
 0xce8   :  { %1222 = vrot.lane.b32.xlu1 %v1209_v56, %s4338_s14  ;;  %v3529_v57 = vpop.f32.mrb[17].mxu1  ;;  %v1360_v56 = vld [vmem:[#allocation7 + $0xe0] sm:$0xff] }
 0xce9   :  { %v1358_v57 = vld [vmem:[#allocation7 + $0xd0] sm:$0xff]  ;;  %v3801_v58 = vpack.c.bf16 %v1360_v56, %v1356_v55 }
 0xcea   :  { %v3833_v61 = vpack.c.bf16 %v1362_v60, %v1358_v57 }
 0xceb   :  { %3802 = vmatpush1.bf16.msra.mxu1 %v3801_v58  ;;  %v3232_v58 = vld [vmem:[%s4921_s7] ss:$0 sm:$0xff] }
 0xd5a   :  { %v1223_v63 = vpop.permute.xlu1 %1222 }
 0xd5b   :  { %v1229_v0 = vsel %vm1228_vm8, %v1227_v62, %v1223_v63  ;;  %v1365_v62 = vld [vmem:[#allocation7 + $0x108] sm:$0xff] }
 0xd5c   :  { %3563 = vmatmul.mubr.f32.vlgmr.msra.gmra.mrb[4].mxu0 %v1229_v0  ;;  %v1369_v63 = vld [vmem:[#allocation7 + $0x128] sm:$0xff]  ;;  %v1367_v0 = vld [vmem:[#allocation7 + $0x118] sm:$0xff] }
 0xd5d   :  { %1531 = vmatprep.mubr.f32.mxu0 %v4334_v48  ;;  %3822 = vmatpush1.bf16.msra.mxu0 %v3821_v14  ;;  %v3803_v1 = vpack.c.bf16 %v1369_v63, %v1365_v62  ;;  %v3835_v4 = vpack.c.bf16 %v1371_v2, %v1367_v0  ;;  %v1379_v14 = vld [vmem:[#allocation7 + $0x178] sm:$0xff]  ;;  %v1570_v62 = vld [vmem:[#allocation9 + $0x80] sm:$0xff]  ;;  %v1571_v63 = vld [vmem:[#allocation9 + $0x88] sm:$0xff] }
 0xd5e   :  { %3824 = vmatprep.subr.bf16.mxu0 %v3823_v26  ;;  %v3839_v21 = vpack.c.bf16 %v1379_v14, %v1375_v12  ;;  %v1374_v26 = vld [vmem:[#allocation7 + $0x150] sm:$0xff]  ;;  %v3851_v0 = vpack.c.bf16 %v1571_v63, %v1570_v62  ;;  %v1555_v2 = vld [vmem:[#allocation9 + $0x8] sm:$0xff]  ;;  %v3859_v12 = vpack.c.bf16 %v1575_v7, %v1574_v11  ;;  %v1678_v11 = vld [vmem:[#allocation4 + $0x1a0] sm:$0xff] }
 0xd5f   :  { %3804 = vmatprep.subr.bf16.mxu1 %v3803_v1  ;;  %v3841_v30 = vpack.c.bf16 %v1378_v27, %v1374_v26  ;;  %v1554_v1 = vld [vmem:[#allocation9] sm:$0xff]  ;;  %v1559_v14 = vld [vmem:[#allocation9 + $0x28] sm:$0xff]  ;;  %v1560_v26 = vld [vmem:[#allocation9 + $0x30] sm:$0xff] }
 0xd60   :  { %v1561_v27 = vld [vmem:[#allocation9 + $0x38] sm:$0xff]  ;;  %v1674_v7 = vld [vmem:[#allocation4 + $0x180] sm:$0xff] }
 0xd61   :  { %3826 = vmatpush1.bf16.msra.mxu0 %v3825_v34  ;;  %v3843_v34 = vpack.c.bf16 %v1387_v17, %v1383_v32  ;;  %v3865_v28 = vpack.c.bf16 %v1561_v27, %v1560_v26  ;;  %v1562_v17 = vld [vmem:[#allocation9 + $0x40] sm:$0xff]  ;;  %v1684_v26 = vld [vmem:[#allocation4 + $0x1d0] sm:$0xff] }
 0xd62   :  { %3828 = vmatprep.subr.bf16.mxu0 %v3827_v41  ;;  %v1386_v41 = vld [vmem:[#allocation7 + $0x1b0] sm:$0xff] }
 0xd63   :  { %v3845_v8 = vpack.c.bf16 %v1386_v41, %v1382_v37  ;;  %v3871_v37 = vpack.c.bf16 %v1581_v36, %v1580_v35  ;;  %v1565_v41 = vld [vmem:[#allocation9 + $0x58] sm:$0xff]  ;;  %v1680_v27 = vld [vmem:[#allocation4 + $0x1b0] sm:$0xff]  ;;  %v1690_v35 = vld [vmem:[#allocation4 + $0x200] sm:$0xff] }
 0xd64   :  { %v1686_v36 = vld [vmem:[#allocation4 + $0x1e0] sm:$0xff] }
 0xd65   :  { %3830 = vmatpush1.bf16.msra.mxu0 %v3829_v51  ;;  %v3847_v51 = vpack.c.bf16 %v1395_v47, %v1391_v46  ;;  %v1566_v46 = vld [vmem:[#allocation9 + $0x60] sm:$0xff]  ;;  %v1567_v47 = vld [vmem:[#allocation9 + $0x68] sm:$0xff] }
 0xd66   :  { %3832 = vmatprep.subr.bf16.mxu0 %v3831_v52  ;;  %v1394_v52 = vld [vmem:[#allocation7 + $0x1f0] sm:$0xff] }
 0xd69   :  { %3834 = vmatpush1.bf16.msra.mxu0 %v3833_v61 }
 0xd6a   :  { %3836 = vmatprep.subr.bf16.mxu0 %v3835_v4  ;;  %v1573_v4 = vld [vmem:[#allocation9 + $0x98] sm:$0xff] }
 0xd6d   :  { %3838 = vmatpush1.bf16.msra.mxu0 %v3837_v10  ;;  %v3857_v10 = vpack.c.bf16 %v1557_v9, %v1556_v6 }
 0xd6e   :  { %3840 = vmatprep.subr.bf16.mxu0 %v3839_v21  ;;  %v1577_v21 = vld [vmem:[#allocation9 + $0xb8] sm:$0xff] }
 0xd71   :  { %3842 = vmatpush1.bf16.msra.mxu0 %v3841_v30  ;;  %v1578_v30 = vld [vmem:[#allocation9 + $0xc0] sm:$0xff] }
 0xd72   :  { %3844 = vmatprep.subr.bf16.mxu0 %v3843_v34  ;;  %v3867_v32 = vpack.c.bf16 %v1579_v31, %v1578_v30  ;;  %v1683_v30 = vld [vmem:[#allocation4 + $0x1c8] sm:$0xff]  ;;  %v1682_v31 = vld [vmem:[#allocation4 + $0x1c0] sm:$0xff] }
 0xd75   :  { %3846 = vmatpush1.bf16.msra.mxu0 %v3845_v8  ;;  %v1583_v8 = vld [vmem:[#allocation9 + $0xe8] sm:$0xff] }
 0xd76   :  { %3848 = vmatprep.subr.bf16.mxu0 %v3847_v51  ;;  %v1584_v51 = vld [vmem:[#allocation9 + $0xf0] sm:$0xff] }
 0xe2f   :  { %v1312_v53 = vpop.f32.mrb[4].mxu0 }
 0xe30   :  { %v4707_v19 = vadd.f32 %v4502_v24, %v1312_v53  ;;  %v3564_v16 = vpop.f32.mrb[5].mxu0  ;;  %v1364_v24 = vld [vmem:[#allocation7 + $0x100] sm:$0xff]  ;;  %v3817_v53 = vpack.c.bf16 %v1392_v22, %v1388_v29  ;;  %v3877_v29 = vpack.c.bf16 %v1567_v47, %v1566_v46  ;;  %v1585_v22 = vld [vmem:[#allocation9 + $0xf8] sm:$0xff] }
 0xe31   :  { %v3805_v5 = vpack.c.bf16 %v1368_v3, %v1364_v24  ;;  %v3849_v16 = vpack.c.bf16 %v1394_v52, %v1390_v49  ;;  %v3853_v24 = vpack.c.bf16 %v1555_v2, %v1554_v1  ;;  %v1572_v3 = vld [vmem:[#allocation9 + $0x90] sm:$0xff]  ;;  %v3879_v49 = vpack.c.bf16 %v1585_v22, %v1584_v51 }
 0xe32   :  { %v1318_v54 = vmul.f32 %v4707_v19, %v4707_v19  ;;  %v1568_v52 = vld [vmem:[#allocation9 + $0x70] sm:$0xff] }
 0xe33   :  { %3806 = vmatpush1.bf16.msra.mxu1 %v3805_v5  ;;  %3850 = vmatpush1.bf16.msra.mxu0 %v3849_v16  ;;  %v3855_v5 = vpack.c.bf16 %v1573_v4, %v1572_v3 }
 0xe34   :  { %1319 = vadd.xlane.f32.xlu1 %v1318_v54  ;;  %3808 = vmatprep.subr.bf16.mxu1 %v3807_v13  ;;  %v1558_v13 = vld [vmem:[#allocation9 + $0x20] sm:$0xff] }
 0xe35   :  { %v3861_v15 = vpack.c.bf16 %v1559_v14, %v1558_v13  ;;  %v1677_v13 = vld [vmem:[#allocation4 + $0x198] sm:$0xff]  ;;  %v1676_v14 = vld [vmem:[#allocation4 + $0x190] sm:$0xff] }
 0xe37   :  { %3810 = vmatpush1.bf16.msra.mxu1 %v3809_v25  ;;  %v3863_v25 = vpack.c.bf16 %v1577_v21, %v1576_v18  ;;  %v3885_v18 = vpack.c.bf16 %v1677_v13, %v1674_v7  ;;  %v1714_v13 = vld [vmem:[#allocation4 + $0x2c0] sm:$0xff] }
 0xe38   :  { %3812 = vmatprep.subr.bf16.mxu1 %v3811_v33  ;;  %v1563_v33 = vld [vmem:[#allocation9 + $0x48] sm:$0xff] }
 0xe39   :  { %v3869_v34 = vpack.c.bf16 %v1563_v33, %v1562_v17  ;;  %v3889_v17 = vpack.c.bf16 %v1683_v30, %v1680_v27  ;;  %v1720_v27 = vld [vmem:[#allocation4 + $0x2f0] sm:$0xff] }
 0xe3b   :  { %3814 = vmatpush1.bf16.msra.mxu1 %v3813_v40  ;;  %v1564_v40 = vld [vmem:[#allocation9 + $0x50] sm:$0xff] }
 0xe3c   :  { %3816 = vmatprep.subr.bf16.mxu1 %v3815_v44  ;;  %v3873_v42 = vpack.c.bf16 %v1565_v41, %v1564_v40  ;;  %v3875_v44 = vpack.c.bf16 %v1583_v8, %v1582_v43  ;;  %v1689_v40 = vld [vmem:[#allocation4 + $0x1f8] sm:$0xff]  ;;  %v1688_v41 = vld [vmem:[#allocation4 + $0x1f0] sm:$0xff] }
 0xe3d   :  { %v1693_v43 = vld [vmem:[#allocation4 + $0x218] sm:$0xff]  ;;  %v1696_v8 = vld [vmem:[#allocation4 + $0x230] sm:$0xff] }
 0xe3e   :  { %v3895_v47 = vpack.c.bf16 %v1696_v8, %v1693_v43  ;;  %v3234_v43 = vld [vmem:[%s4918_s4 + $0x1] ss:$0 sm:$0xff] }
 0xe3f   :  { %3818 = vmatpush1.bf16.msra.mxu1 %v3817_v53  ;;  %v1569_v53 = vld [vmem:[#allocation9 + $0x78] sm:$0xff] }
 0xe40   :  { %3852 = vmatprep.subr.bf16.mxu1 %v3851_v0  ;;  %v3881_v16 = vpack.c.bf16 %v1569_v53, %v1568_v52  ;;  %v1692_v53 = vld [vmem:[#allocation4 + $0x210] sm:$0xff] }
 0xec1   :  { %v1320_v54 = vpop.xlane.xlu1 %1319 }
 0xec2   :  { %v1321_v55 = vmul.f32 0.0078125, %v1320_v54 }
 0xec4   :  { %v1322_v56 = vadd.f32 1e-05, %v1321_v55 }
 0xec6   :  { %4135 = vrsqrt.f32 %v1322_v56 }
 0xed0   :  { %v4136_v57 = vpop.eup %4135 }
 0xed1   :  { %v1324_v60 = vmul.f32 %v4136_v57, %v4707_v19 }
 0xed3   :  { %v1331_v61 = vmul.f32 %v3232_v58, %v1324_v60 }
 0xed5   :  { %1461 = vmatmul.mubr.f32.vlgmr.msra.gmra.mrb[18].mxu1 %v1331_v61  ;;  %1532 = vmatmul.mubr.f32.vlgmr.msra.gmra.mrb[6].mxu0 %v1331_v61 }
 0xed6   :  { %1786 = vmatprep.mubr.f32.mxu0 %v4334_v48  ;;  %3854 = vmatpush3.bf16.msra.mxu1 %v3853_v24 }
 0xed7   :  { %3856 = vmatprep.subr.bf16.mxu1 %v3855_v5 }
 0xeda   :  { %3858 = vmatpush3.bf16.msra.mxu1 %v3857_v10  ;;  %v1675_v10 = vld [vmem:[#allocation4 + $0x188] sm:$0xff] }
 0xedb   :  { %3860 = vmatprep.subr.bf16.mxu1 %v3859_v12  ;;  %v3883_v12 = vpack.c.bf16 %v1678_v11, %v1675_v10  ;;  %v1709_v10 = vld [vmem:[#allocation4 + $0x298] sm:$0xff] }
 0xedd   :  { %3884 = vmatprep.subr.bf16.mxu0 %v3883_v12  ;;  %v1711_v12 = vld [vmem:[#allocation4 + $0x2a8] sm:$0xff] }
 0xede   :  { %3862 = vmatpush3.bf16.msra.mxu1 %v3861_v15  ;;  %v1679_v15 = vld [vmem:[#allocation4 + $0x1a8] sm:$0xff]  ;;  %3886 = vmatpush1.bf16.msra.mxu0 %v3885_v18  ;;  %v1713_v18 = vld [vmem:[#allocation4 + $0x2b8] sm:$0xff] }
 0xedf   :  { %3864 = vmatprep.subr.bf16.mxu1 %v3863_v25  ;;  %v3916_v21 = vpack.c.bf16 %v1679_v15, %v1676_v14  ;;  %v1681_v25 = vld [vmem:[#allocation4 + $0x1b8] sm:$0xff]  ;;  %v1710_v14 = vld [vmem:[#allocation4 + $0x2a0] sm:$0xff]  ;;  %v3907_v15 = vpack.c.bf16 %v1714_v13, %v1711_v12 }
 0xee2   :  { %3866 = vmatpush3.bf16.msra.mxu1 %v3865_v28  ;;  %v3887_v28 = vpack.c.bf16 %v1684_v26, %v1681_v25  ;;  %v1715_v25 = vld [vmem:[#allocation4 + $0x2c8] sm:$0xff]  ;;  %v1717_v26 = vld [vmem:[#allocation4 + $0x2d8] sm:$0xff] }
 0xee3   :  { %3868 = vmatprep.subr.bf16.mxu1 %v3867_v32  ;;  %v1685_v32 = vld [vmem:[#allocation4 + $0x1d8] sm:$0xff] }
 0xee4   :  { %v3919_v33 = vpack.c.bf16 %v1685_v32, %v1682_v31  ;;  %3888 = vmatprep.subr.bf16.mxu0 %v3887_v28  ;;  %v3909_v28 = vpack.c.bf16 %v1713_v18, %v1710_v14  ;;  %v3911_v31 = vpack.c.bf16 %v1720_v27, %v1717_v26  ;;  %v1716_v32 = vld [vmem:[#allocation4 + $0x2d0] sm:$0xff] }
 0xee5   :  { %3890 = vmatpush1.bf16.msra.mxu0 %v3889_v17  ;;  %v1719_v17 = vld [vmem:[#allocation4 + $0x2e8] sm:$0xff] }
 0xee6   :  { %3870 = vmatpush3.bf16.msra.mxu1 %v3869_v34  ;;  %v1687_v34 = vld [vmem:[#allocation4 + $0x1e8] sm:$0xff] }
 0xee7   :  { %3872 = vmatprep.subr.bf16.mxu1 %v3871_v37  ;;  %v3891_v37 = vpack.c.bf16 %v1690_v35, %v1687_v34  ;;  %v1721_v34 = vld [vmem:[#allocation4 + $0x2f8] sm:$0xff]  ;;  %v3913_v35 = vpack.c.bf16 %v1719_v17, %v1716_v32 }
 0xee9   :  { %3892 = vmatprep.subr.bf16.mxu0 %v3891_v37 }
 0xeea   :  { %3874 = vmatpush3.bf16.msra.mxu1 %v3873_v42  ;;  %v1691_v42 = vld [vmem:[#allocation4 + $0x208] sm:$0xff] }
 0xeeb   :  { %3876 = vmatprep.subr.bf16.mxu1 %v3875_v44  ;;  %v3893_v44 = vpack.c.bf16 %v1689_v40, %v1686_v36  ;;  %v3922_v46 = vpack.c.bf16 %v1691_v42, %v1688_v41 }
 0xeed   :  { %3894 = vmatpush1.bf16.msra.mxu0 %v3893_v44 }
 0xeee   :  { %3878 = vmatpush3.bf16.msra.mxu1 %v3877_v29  ;;  %3896 = vmatprep.subr.bf16.mxu0 %v3895_v47 }
 0xeef   :  { %3880 = vmatprep.subr.bf16.mxu1 %v3879_v49 }
 0xef2   :  { %3882 = vmatpush3.bf16.msra.mxu1 %v3881_v16  ;;  %v1695_v16 = vld [vmem:[#allocation4 + $0x228] sm:$0xff] }
 0xef3   :  { %3915 = vmatprep.subr.bf16.mxu1 %v4333_v59 }
 0xfa8   :  { %v1462_v54 = vpop.f32.mrb[18].mxu1  ;;  %v1533_v55 = vpop.f32.mrb[6].mxu0 }
 0xfa9   :  { %v1538_v56 = vsub.f32 0.0, %v1462_v54  ;;  %v1464_v57 = vpop.f32.mrb[19].mxu1  ;;  %v1535_v58 = vpop.f32.mrb[7].mxu0 }
 0xfaa   :  { %v1539_v60 = vsub.f32 0.0, %v1464_v57 }
 0xfab   :  { %v1540_v61 = vmul.f32 1.442695, %v1538_v56  ;;  %v1697_v56 = vld [vmem:[#allocation4 + $0x238] sm:$0xff] }
 0xfac   :  { %v1542_v62 = vmul.f32 1.442695, %v1539_v60  ;;  %v1702_v60 = vld [vmem:[#allocation4 + $0x260] sm:$0xff] }
 0xfad   :  { %4137 = vpow2.f32 %v1540_v61 }
 0xfae   :  { %4139 = vpow2.f32 %v1542_v62  ;;  %v1698_v62 = vld [vmem:[#allocation4 + $0x240] sm:$0xff] }
 0xfb7   :  { %v4138_v63 = vpop.eup %4137 }
 0xfb8   :  { %v4140_v0 = vpop.eup %4139  ;;  %v1544_v1 = vadd.f32 1.0, %v4138_v63  ;;  %v1701_v63 = vld [vmem:[#allocation4 + $0x258] sm:$0xff] }
 0xfb9   :  { %v1545_v2 = vadd.f32 1.0, %v4140_v0  ;;  %v1700_v0 = vld [vmem:[#allocation4 + $0x250] sm:$0xff] }
 0xfba   :  { %4141 = vrcp.f32 %v1544_v1  ;;  %v1703_v1 = vld [vmem:[#allocation4 + $0x268] sm:$0xff] }
 0xfbb   :  { %4143 = vrcp.f32 %v1545_v2  ;;  %v3928_v2 = vpack.c.bf16 %v1703_v1, %v1700_v0 }
 0xfc4   :  { %v4142_v24 = vpop.eup %4141 }
 0xfc5   :  { %v4144_v3 = vpop.eup %4143  ;;  %v1550_v4 = vmul.f32 %v4142_v24, %v1462_v54  ;;  %v1694_v54 = vld [vmem:[#allocation4 + $0x220] sm:$0xff]  ;;  %v1705_v24 = vld [vmem:[#allocation4 + $0x278] sm:$0xff] }
 0xfc6   :  { %v1551_v5 = vmul.f32 %v4144_v3, %v1464_v57  ;;  %v3925_v57 = vpack.c.bf16 %v1697_v56, %v1694_v54  ;;  %v1708_v3 = vld [vmem:[#allocation4 + $0x290] sm:$0xff] }
 0xfc7   :  { %v1552_v6 = vmul.f32 %v1550_v4, %v1533_v55  ;;  %v3897_v55 = vpack.c.bf16 %v1695_v16, %v1692_v53  ;;  %v1704_v4 = vld [vmem:[#allocation4 + $0x270] sm:$0xff]  ;;  %v4175_v16 = vld [vmem:[%s4916_s2] sm:$0xff] }
 0xfc8   :  { %v1553_v9 = vmul.f32 %v1551_v5, %v1535_v58  ;;  %v1699_v58 = vld [vmem:[#allocation4 + $0x248] sm:$0xff]  ;;  %v3903_v5 = vpack.c.bf16 %v1708_v3, %v1705_v24 }
 0xfc9   :  { %3898 = vmatpush1.bf16.msra.mxu0 %v3897_v55  ;;  %v3899_v61 = vpack.c.bf16 %v1702_v60, %v1699_v58  ;;  %v4770_v55 = vld [vmem:[%s4917_s3] sm:$0xff] }
 0xfca   :  { %1650 = vmatprep.mubr.f32.mxu1 %v1553_v9  ;;  %v1706_v9 = vld [vmem:[#allocation4 + $0x280] sm:$0xff] }
 0xfcb   :  { %1651 = vmatmul.mubr.f32.vlgmr.msra.gmra.mrb[20].mxu1 %v1552_v6  ;;  %3900 = vmatprep.subr.bf16.mxu0 %v3899_v61  ;;  %v1707_v6 = vld [vmem:[#allocation4 + $0x288] sm:$0xff]  ;;  %v3931_v7 = vpack.c.bf16 %v1709_v10, %v1706_v9 }
 0xfcc   :  { %3597 = vmatprep.mubr.msk.f32.mxu1 %vm4335_vm2, %v4334_v48  ;;  %3917 = vmatpush3.bf16.msra.mxu1 %v3916_v21  ;;  %v3905_v11 = vpack.c.bf16 %v1707_v6, %v1704_v4  ;;  %v1712_v21 = vld [vmem:[#allocation4 + $0x2b0] sm:$0xff] }
 0xfcd   :  { %3918 = vmatprep.subr.bf16.mxu1 %v4333_v59  ;;  %v3934_v30 = vpack.c.bf16 %v1715_v25, %v1712_v21 }
 0xfd0   :  { %3920 = vmatpush3.bf16.msra.mxu1 %v3919_v33  ;;  %v1718_v33 = vld [vmem:[#allocation4 + $0x2e0] sm:$0xff] }
 0xfd1   :  { %3921 = vmatprep.subr.bf16.mxu1 %v4333_v59  ;;  %v3937_v36 = vpack.c.bf16 %v1721_v34, %v1718_v33 }
 0xfd4   :  { %3923 = vmatpush3.bf16.msra.mxu1 %v3922_v46 }
 0xfd5   :  { %3924 = vmatprep.subr.bf16.mxu1 %v4333_v59 }
 0xfd8   :  { %3926 = vmatpush3.bf16.msra.mxu1 %v3925_v57 }
 0xfd9   :  { %3927 = vmatprep.subr.bf16.mxu1 %v4333_v59 }
 0xfdc   :  { %3929 = vmatpush3.bf16.msra.mxu1 %v3928_v2 }
 0xfdd   :  { %3930 = vmatprep.subr.bf16.mxu1 %v4333_v59 }
 0xfe0   :  { %3932 = vmatpush3.bf16.msra.mxu1 %v3931_v7 }
 0xfe1   :  { %3933 = vmatprep.subr.bf16.mxu1 %v4333_v59 }
 0xfe4   :  { %3935 = vmatpush3.bf16.msra.mxu1 %v3934_v30 }
 0xfe5   :  { %3936 = vmatprep.subr.bf16.mxu1 %v4333_v59 }
 0xfe8   :  { %3938 = vmatpush3.bf16.msra.mxu1 %v3937_v36 }
 0xfe9   :  { %3600 = vmatprep.subr.mxu1 %v4334_v48 }
0x109e   :  { %v3367_v29 = vpop.f32.mrb[20].mxu1 }
0x109f   :  { %v3368_v51 = vpop.f32.mrb[21].mxu1 }
0x10a0   :  { %v3369_v22 = vadd.f32 %v3368_v51, %v3367_v29 }
0x10a2   :  { %v4723_v49 = vadd.f32 %v3369_v22, %v4707_v19  ;;  %v3901_v19 = vpack.c.bf16 %v1701_v63, %v1698_v62 }
0x10a4   :  { %v1659_v52 = vmul.f32 %v4723_v49, %v4723_v49  ;;  %3902 = vmatpush1.bf16.msra.mxu0 %v3901_v19 }
0x10a5   :  { %3904 = vmatprep.subr.bf16.mxu0 %v3903_v5 }
0x10a6   :  { %1660 = vadd.xlane.f32.xlu0 %v1659_v52 }
0x10a8   :  { %3906 = vmatpush1.bf16.msra.mxu0 %v3905_v11 }
0x10a9   :  { %3908 = vmatprep.subr.bf16.mxu0 %v3907_v15 }
0x10ac   :  { %3910 = vmatpush1.bf16.msra.mxu0 %v3909_v28 }
0x10ad   :  { %3912 = vmatprep.subr.bf16.mxu0 %v3911_v31 }
0x10b0   :  { %3914 = vmatpush1.bf16.msra.mxu0 %v3913_v35 }
0x10b1   :  { %3939 = vmatprep.subr.bf16.mxu0 %v4333_v59 }
0x1133   :  { %v1661_v37 = vpop.xlane.xlu0 %1660 }
0x1134   :  { %v1662_v40 = vmul.f32 0.0078125, %v1661_v37 }
0x1136   :  { %v1663_v41 = vadd.f32 1e-05, %v1662_v40 }
0x1138   :  { %4145 = vrsqrt.f32 %v1663_v41 }
0x1142   :  { %v4146_v42 = vpop.eup %4145 }
0x1143   :  { %v1665_v8 = vmul.f32 %v4146_v42, %v4723_v49 }
0x1145   :  { %v1672_v44 = vmul.f32 %v3234_v43, %v1665_v8 }
0x1147   :  { %1787 = vmatmul.mubr.f32.vlgmr.msra.gmra.mrb[8].mxu0 %v1672_v44  ;;  %3598 = vmatmul.mubr.f32.vlgmr.msra.gmra.mrb[22].mxu1 %v1672_v44 }
0x1148   :  { %3602 = vmatprep.mubr.msk.f32.mxu1 %vm4335_vm2, %v4334_v48  ;;  %3672 = vmatprep.mubr.msk.f32.mxu0 %vm4335_vm2, %v4334_v48 }
0x121a   :  { %v4741_v46 = vpop.f32.mrb[8].mxu0  ;;  %v4743_v47 = vpop.f32.mrb[22].mxu1 }
0x121b   :  { %v4745_v29 = vpop.f32.mrb[9].mxu0  ;;  %v3599_v51 = vpop.f32.mrb[23].mxu1  ;;  %v1871_v62 = vmul.f32 %v4175_v16, %v4741_v46  ;;  %v2051_v30 = vmul.f32 %v4741_v46, %v4592_v45 }
0x121c   :  { %1878 = vrot.lane.b32.xlu0 %v4745_v29, %s4330_s8  ;;  %1875 = vrot.lane.b32.xlu1 %v4745_v29, %s4336_s29  ;;  %v1882_v54 = vmul.f32 %v4175_v16, %v4745_v29  ;;  %v2062_v12 = vmul.f32 %v4745_v29, %v4592_v45  ;;  %v2254_v45 = vmul.f32 %v4745_v29, %v4632_v20 }
0x1220   :  { %2047 = vrot.lane.b32.xlu0 %v4741_v46, %s4337_s30  ;;  %1864 = vrot.lane.b32.xlu1 %v4741_v46, %s4336_s29 }
0x1224   :  { %1867 = vrot.lane.b32.xlu1 %v4741_v46, %s4330_s8 }
0x1228   :  { %2058 = vrot.lane.b32.xlu1 %v4745_v29, %s4337_s30 }
0x128e   :  { %v4759_v22 = vpop.permute.xlu0 %1878  ;;  %v1876_v52 = vpop.permute.xlu1 %1875 }
0x128f   :  { %v1881_v53 = vsel %vm455_vm3, %v1876_v52, %v4759_v22 }
0x1290   :  { %v1883_v56 = vmul.f32 %v4770_v55, %v1881_v53 }
0x1292   :  { %v1884_v57 = vadd.f32 %v1883_v56, %v1882_v54  ;;  %v1865_v58 = vpop.permute.xlu1 %1864  ;;  %v2048_v0 = vpop.permute.xlu0 %2047 }
0x1293   :  { %v2050_v3 = vsel %vm455_vm3, %v2048_v0, %v1865_v58 }
0x1294   :  { %3601 = vmatpush3.xpose.msk.msra.mxu1 %vm471_vm4, %v1884_v57  ;;  %v2052_v4 = vmul.f32 %v4770_v55, %v2050_v3  ;;  %v2243_v57 = vmul.f32 %v4741_v46, %v4632_v20 }
0x1295   :  { %3605 = vmatprep.subr.mxu1 %v4334_v48 }
0x1296   :  { %v4775_v60 = vpop.permute.xlu1 %1867 }
0x1297   :  { %v1870_v61 = vsel %vm455_vm3, %v1865_v58, %v4775_v60 }
0x1298   :  { %v1872_v63 = vmul.f32 %v4770_v55, %v1870_v61 }
0x129a   :  { %v1873_v19 = vadd.f32 %v1872_v63, %v1871_v62  ;;  %v2059_v1 = vpop.permute.xlu1 %2058 }
0x129b   :  { %v2061_v2 = vsel %vm455_vm3, %v2059_v1, %v1876_v52 }
0x129c   :  { %3603 = vmatmul.mubr.msk.f32.vlgmr.msra.gmra.mrb[24].mxu1 %vm471_vm4, %v1873_v19  ;;  %v2063_v24 = vmul.f32 %v4770_v55, %v2061_v2 }
0x129d   :  { %3606 = vmatpush3.msra.mxu1 %v4743_v47  ;;  %3607 = vmatprep.mubr.msk.f32.mxu1 %vm4335_vm2, %v4334_v48 }
0x129e   :  { %2065 = vrot.lane.b32.xlu0 %v2063_v24, %s4322_s22  ;;  %3610 = vmatprep.subr.mxu1 %v4334_v48 }
0x12a2   :  { %2054 = vrot.lane.b32.xlu0 %v2052_v4, %s4322_s22 }
0x1310   :  { %v2066_v7 = vpop.permute.xlu0 %2065 }
0x1311   :  { %v2068_v13 = vadd.f32 %v2066_v7, %v2062_v12 }
0x1314   :  { %v2055_v28 = vpop.permute.xlu0 %2054 }
0x1315   :  { %v2057_v31 = vadd.f32 %v2055_v28, %v2051_v30 }
0x136f   :  { %v1957_v5 = vpop.f32.mrb[24].mxu1 }
0x1370   :  { %v1961_v6 = vmul.f32 0.17677669, %v1957_v5  ;;  %v3604_v9 = vpop.f32.mrb[25].mxu1 }
0x1372   :  { %v1962_v10 = vsel %vm4585_vm5, %v1961_v6, -1e+30  ;;  %v2439_v6 = vmul.f32 %v4745_v29, %v4654_v23 }
0x1373   :  { %v1963_v11 = vsel %vm550_vm6, %v1962_v10, -inf }
0x1374   :  { %1964 = vmax.xlane.f32.xlu1 %v1963_v11 }
0x1385   :  { %2073 = vrot.lane.b32.xlu1 %v2068_v13, %s4338_s14 }
0x1389   :  { %2250 = vrot.lane.b32.xlu1 %v4745_v29, %s4339_s15 }
0x138d   :  { %2239 = vrot.lane.b32.xlu1 %v4741_v46, %s4339_s15 }
0x1401   :  { %v1965_v14 = vpop.xlane.xlu1 %1964 }
0x1402   :  { %v1966_v15 = vsub.f32 %v1962_v10, %v1965_v14 }
0x1404   :  { %v1967_v18 = vmul.f32 1.442695, %v1966_v15 }
0x1405   :  { %v2074_v26 = vpop.permute.xlu1 %2073 }
0x1406   :  { %4147 = vpow2.f32 %v1967_v18 }
0x1409   :  { %v2251_v27 = vpop.permute.xlu1 %2250 }
0x140a   :  { %v2253_v32 = vsel %vm455_vm3, %v2251_v27, %v2059_v1  ;;  %v2438_v20 = vsel %vm455_vm3, %v4759_v22, %v2251_v27 }
0x140b   :  { %v2255_v33 = vmul.f32 %v4770_v55, %v2253_v32  ;;  %v2440_v2 = vmul.f32 %v4770_v55, %v2438_v20  ;;  %v2637_v20 = vld [vmem:[#allocation6 + $0xb0] sm:$0xff] }
0x140d   :  { %v2240_v17 = vpop.permute.xlu1 %2239 }
0x140e   :  { %v2242_v34 = vsel %vm455_vm3, %v2240_v17, %v2048_v0  ;;  %v2430_v24 = vsel %vm455_vm3, %v4775_v60, %v2240_v17 }
0x140f   :  { %v2244_v35 = vmul.f32 %v4770_v55, %v2242_v34  ;;  %v2432_v3 = vmul.f32 %v4770_v55, %v2430_v24 }
0x1410   :  { %v4148_v21 = vpop.eup %4147 }
0x1411   :  { %v1969_v25 = vsel %vm550_vm6, %v4148_v21, 0.0 }
0x1412   :  { %1970 = vadd.xlane.f32.xlu0 %v1969_v25 }
0x1428   :  { %2070 = vrot.lane.b32.xlu0 %v2057_v31, %s4338_s14 }
0x142c   :  { %2257 = vrot.lane.b32.xlu0 %v2255_v33, %s4340_s16 }
0x1430   :  { %2246 = vrot.lane.b32.xlu0 %v2244_v35, %s4340_s16 }
0x149f   :  { %v1971_v36 = vpop.xlane.xlu0 %1970 }
0x14a0   :  { %4149 = vrcp.f32 %v1971_v36 }
0x14a3   :  { %v2071_v37 = vpop.permute.xlu0 %2070 }
0x14a7   :  { %v2258_v40 = vpop.permute.xlu0 %2257 }
0x14a8   :  { %v2260_v41 = vadd.f32 %v2258_v40, %v2254_v45 }
0x14aa   :  { %v4150_v42 = vpop.eup %4149 }
0x14ab   :  { %v1973_v43 = vmul.f32 %v4150_v42, %v4148_v21  ;;  %v2247_v56 = vpop.permute.xlu0 %2246  ;;  %v2431_v21 = vmul.f32 %v4741_v46, %v4654_v23 }
0x14ac   :  { %v2249_v58 = vadd.f32 %v2247_v56, %v2243_v57  ;;  %v2632_v57 = vld [vmem:[#allocation6 + $0x88] sm:$0xff] }
0x14ad   :  { %3608 = vmatmul.mubr.msk.f32.vlgmr.msra.gmra.mrb[26].mxu1 %vm550_vm6, %v1973_v43 }
0x14ae   :  { %3611 = vmatpush3.xpose.msk.msra.mxu1 %vm471_vm4, %v2074_v26  ;;  %3612 = vmatprep.mubr.msk.f32.mxu1 %vm4335_vm2, %v4334_v48 }
0x14af   :  { %3615 = vmatprep.subr.mxu1 %v4334_v48 }
0x14b1   :  { %3613 = vmatmul.mubr.msk.f32.vlgmr.msra.gmra.mrb[28].mxu1 %vm471_vm4, %v2071_v37 }
0x14b2   :  { %3617 = vmatprep.mubr.msk.f32.mxu1 %vm4335_vm2, %v4334_v48 }
0x1580   :  { %v4822_v8 = vpop.f32.mrb[26].mxu1 }
0x1581   :  { %v3609_v44 = vpop.f32.mrb[27].mxu1 }
0x1584   :  { %v2145_v51 = vpop.f32.mrb[28].mxu1 }
0x1585   :  { %v2149_v52 = vmul.f32 0.17677669, %v2145_v51  ;;  %v3614_v53 = vpop.f32.mrb[29].mxu1 }
0x1587   :  { %v2150_v16 = vsel %vm4585_vm5, %v2149_v52, -1e+30 }
0x1588   :  { %v2151_v54 = vsel %vm550_vm6, %v2150_v16, -inf }
0x1589   :  { %2152 = vmax.xlane.f32.xlu1 %v2151_v54 }
0x159a   :  { %2163 = vrot.lane.b32.xlu1 %v4743_v47, %s4338_s14 }
0x159e   :  { %2262 = vrot.lane.b32.xlu1 %v2249_v58, %s4340_s16  ;;  %v2633_v58 = vld [vmem:[#allocation6 + $0x90] sm:$0xff] }
0x1616   :  { %v2153_v61 = vpop.xlane.xlu1 %2152 }
0x1617   :  { %v2154_v62 = vsub.f32 %v2150_v16, %v2153_v61 }
0x1619   :  { %v2155_v63 = vmul.f32 1.442695, %v2154_v62  ;;  %v2634_v62 = vld [vmem:[#allocation6 + $0x98] sm:$0xff] }
0x161a   :  { %v2164_v0 = vpop.permute.xlu1 %2163 }
0x161b   :  { %4151 = vpow2.f32 %v2155_v63  ;;  %3616 = vmatpush3.msra.mxu1 %v2164_v0  ;;  %v3943_v63 = vpack.c.bf16 %v2634_v62, %v2633_v58  ;;  %v2635_v0 = vld [vmem:[#allocation6 + $0xa0] sm:$0xff]  ;;  %v2753_v62 = vld [vmem:[#allocation7 + $0x290] sm:$0xff] }
0x161c   :  { %3620 = vmatprep.subr.mxu1 %v4334_v48 }
0x161e   :  { %v2263_v55 = vpop.permute.xlu1 %2262 }
0x1625   :  { %v4152_v19 = vpop.eup %4151 }
0x1626   :  { %v2157_v1 = vsel %vm550_vm6, %v4152_v19, 0.0 }
0x1627   :  { %2158 = vadd.xlane.f32.xlu0 %v2157_v1 }
0x163d   :  { %2265 = vrot.lane.b32.xlu0 %v2260_v41, %s4340_s16 }
0x1641   :  { %2442 = vrot.lane.b32.xlu0 %v2440_v2, %s4338_s14  ;;  %v2638_v2 = vld [vmem:[#allocation6 + $0xb8] sm:$0xff] }
0x1642   :  { %v3949_v24 = vpack.c.bf16 %v2638_v2, %v2637_v20  ;;  %v2762_v20 = vld [vmem:[#allocation7 + $0x2d8] sm:$0xff] }
0x1645   :  { %2434 = vrot.lane.b32.xlu0 %v2432_v3, %s4338_s14  ;;  %v2639_v3 = vld [vmem:[#allocation6 + $0xc0] sm:$0xff] }
0x16b4   :  { %v2159_v4 = vpop.xlane.xlu0 %2158 }
0x16b5   :  { %4153 = vrcp.f32 %v2159_v4  ;;  %v2640_v4 = vld [vmem:[#allocation6 + $0xc8] sm:$0xff] }
0x16b8   :  { %v2266_v5 = vpop.permute.xlu0 %2265 }
0x16bc   :  { %v2443_v22 = vpop.permute.xlu0 %2442 }
0x16bd   :  { %v2445_v9 = vadd.f32 %v2443_v22, %v2439_v6  ;;  %v2641_v6 = vld [vmem:[#allocation6 + $0xd0] sm:$0xff]  ;;  %v2642_v22 = vld [vmem:[#allocation6 + $0xd8] sm:$0xff] }
0x16bf   :  { %v4154_v10 = vpop.eup %4153 }
0x16c0   :  { %v2161_v11 = vmul.f32 %v4154_v10, %v4152_v19  ;;  %v2435_v18 = vpop.permute.xlu0 %2434  ;;  %v2636_v19 = vld [vmem:[#allocation6 + $0xa8] sm:$0xff]  ;;  %v2643_v10 = vld [vmem:[#allocation6 + $0xe0] sm:$0xff] }
0x16c1   :  { %v2437_v25 = vadd.f32 %v2435_v18, %v2431_v21  ;;  %v3946_v1 = vpack.c.bf16 %v2636_v19, %v2635_v0  ;;  %v2760_v19 = vld [vmem:[#allocation7 + $0x2c8] sm:$0xff] }
0x16c2   :  { %3618 = vmatmul.mubr.msk.f32.vlgmr.msra.gmra.mrb[30].mxu1 %vm550_vm6, %v2161_v11  ;;  %v2644_v11 = vld [vmem:[#allocation6 + $0xe8] sm:$0xff] }
0x16c3   :  { %3621 = vmatpush3.xpose.msk.msra.mxu1 %vm471_vm4, %v2266_v5  ;;  %3622 = vmatprep.mubr.msk.f32.mxu1 %vm4335_vm2, %v4334_v48  ;;  %v3952_v5 = vpack.c.bf16 %v2640_v4, %v2639_v3  ;;  %v2766_v3 = vld [vmem:[#allocation7 + $0x2f8] sm:$0xff] }
0x16c4   :  { %3625 = vmatprep.subr.mxu1 %v4334_v48  ;;  %v4007_v4 = vpack.c.bf16 %v2766_v3, %v2762_v20 }
0x16c6   :  { %3623 = vmatmul.mubr.msk.f32.vlgmr.msra.gmra.mrb[32].mxu1 %vm471_vm4, %v2263_v55  ;;  %v3958_v55 = vpack.c.bf16 %v2644_v11, %v2643_v10  ;;  %v2759_v10 = vld [vmem:[#allocation7 + $0x2c0] sm:$0xff] }
0x16c7   :  { %3627 = vmatprep.mubr.msk.f32.mxu1 %vm4335_vm2, %v4334_v48  ;;  %v2763_v11 = vld [vmem:[#allocation7 + $0x2e0] sm:$0xff] }
0x1795   :  { %v2235_v29 = vpop.f32.mrb[30].mxu1 }
0x1796   :  { %v3619_v60 = vpop.f32.mrb[31].mxu1 }
0x1797   :  { %v2646_v60 = vld [vmem:[#allocation6 + $0xf8] sm:$0xff] }
0x1799   :  { %v2337_v7 = vpop.f32.mrb[32].mxu1 }
0x179a   :  { %v2341_v12 = vmul.f32 0.17677669, %v2337_v7  ;;  %v3624_v13 = vpop.f32.mrb[33].mxu1 }
0x179c   :  { %v2342_v14 = vsel %vm4585_vm5, %v2341_v12, -1e+30 }
0x179d   :  { %v2343_v15 = vsel %vm550_vm6, %v2342_v14, -inf }
0x179e   :  { %2344 = vmax.xlane.f32.xlu1 %v2343_v15 }
0x17af   :  { %2354 = vrot.lane.b32.xlu1 %v4743_v47, %s4340_s16 }
0x17b3   :  { %2447 = vrot.lane.b32.xlu1 %v2437_v25, %s4322_s22 }
0x182b   :  { %v2345_v26 = vpop.xlane.xlu1 %2344 }
0x182c   :  { %v2346_v27 = vsub.f32 %v2342_v14, %v2345_v26 }
0x182e   :  { %v2347_v28 = vmul.f32 1.442695, %v2346_v27  ;;  %v2736_v27 = vld [vmem:[#allocation7 + $0x208] sm:$0xff] }
0x182f   :  { %v2355_v30 = vpop.permute.xlu1 %2354 }
0x1830   :  { %4155 = vpow2.f32 %v2347_v28  ;;  %3626 = vmatpush3.msra.mxu1 %v2355_v30  ;;  %v2738_v28 = vld [vmem:[#allocation7 + $0x218] sm:$0xff] }
0x1831   :  { %3630 = vmatprep.subr.mxu1 %v4334_v48 }
0x1833   :  { %v2448_v34 = vpop.permute.xlu1 %2447 }
0x183a   :  { %v4156_v31 = vpop.eup %4155 }
0x183b   :  { %v2349_v32 = vsel %vm550_vm6, %v4156_v31, 0.0 }
0x183c   :  { %2350 = vadd.xlane.f32.xlu0 %v2349_v32  ;;  %v2735_v32 = vld [vmem:[#allocation7 + $0x200] sm:$0xff] }
0x1852   :  { %2450 = vrot.lane.b32.xlu0 %v2445_v9, %s4322_s22  ;;  %v3955_v9 = vpack.c.bf16 %v2642_v22, %v2641_v6 }
0x18c9   :  { %v2351_v23 = vpop.xlane.xlu0 %2350 }
0x18ca   :  { %4157 = vrcp.f32 %v2351_v23  ;;  %v2739_v23 = vld [vmem:[#allocation7 + $0x220] sm:$0xff] }
0x18cd   :  { %v2451_v33 = vpop.permute.xlu0 %2450 }
0x18d4   :  { %v4158_v46 = vpop.eup %4157 }
0x18d5   :  { %v2353_v17 = vmul.f32 %v4158_v46, %v4156_v31  ;;  %v2742_v31 = vld [vmem:[#allocation7 + $0x238] sm:$0xff] }
0x18d6   :  { %v3995_v46 = vpack.c.bf16 %v2742_v31, %v2738_v28  ;;  %v2780_v31 = vld [vmem:[#allocation7 + $0x368] sm:$0xff] }
0x18d7   :  { %3628 = vmatmul.mubr.msk.f32.vlgmr.msra.gmra.mrb[34].mxu1 %vm550_vm6, %v2353_v17  ;;  %v3965_v17 = vpack.c.bf16 %v2739_v23, %v2735_v32  ;;  %v2778_v32 = vld [vmem:[#allocation7 + $0x358] sm:$0xff] }
0x18d8   :  { %3631 = vmatpush3.xpose.msk.msra.mxu1 %vm471_vm4, %v2451_v33  ;;  %3632 = vmatprep.mubr.msk.f32.mxu1 %vm4335_vm2, %v4334_v48  ;;  %v2737_v33 = vld [vmem:[#allocation7 + $0x210] sm:$0xff] }
0x18d9   :  { %3635 = vmatprep.subr.mxu1 %v4334_v48 }
0x18db   :  { %3633 = vmatmul.mubr.msk.f32.vlgmr.msra.gmra.mrb[36].mxu1 %vm471_vm4, %v2448_v34  ;;  %v2741_v34 = vld [vmem:[#allocation7 + $0x230] sm:$0xff] }
0x18dc   :  { %3637 = vmatprep.mubr.msk.f32.mxu1 %vm4335_vm2, %v4334_v48 }
0x19aa   :  { %v2426_v35 = vpop.f32.mrb[34].mxu1 }
0x19ab   :  { %v3629_v36 = vpop.f32.mrb[35].mxu1 }
0x19ac   :  { %v2748_v36 = vld [vmem:[#allocation7 + $0x268] sm:$0xff] }
0x19ae   :  { %v2522_v37 = vpop.f32.mrb[36].mxu1 }
0x19af   :  { %v2526_v45 = vmul.f32 0.17677669, %v2522_v37  ;;  %v3634_v40 = vpop.f32.mrb[37].mxu1  ;;  %v2746_v37 = vld [vmem:[#allocation7 + $0x258] sm:$0xff] }
0x19b1   :  { %v2527_v41 = vsel %vm4585_vm5, %v2526_v45, -1e+30  ;;  %v2750_v45 = vld [vmem:[#allocation7 + $0x278] sm:$0xff] }
0x19b2   :  { %v2528_v42 = vsel %vm550_vm6, %v2527_v41, -inf }
0x19b3   :  { %2529 = vmax.xlane.f32.xlu1 %v2528_v42  ;;  %v2743_v42 = vld [vmem:[#allocation7 + $0x240] sm:$0xff] }
0x19c4   :  { %2539 = vrot.lane.b32.xlu1 %v4743_v47, %s4322_s22  ;;  %v2631_v47 = vld [vmem:[#allocation6 + $0x80] sm:$0xff] }
0x19c5   :  { %v3940_v61 = vpack.c.bf16 %v2632_v57, %v2631_v47  ;;  %v2758_v47 = vld [vmem:[#allocation7 + $0x2b8] sm:$0xff]  ;;  %v2751_v57 = vld [vmem:[#allocation7 + $0x280] sm:$0xff] }
0x19c7   :  { %3941 = vmatpush3.bf16.msra.mxu0 %v3940_v61  ;;  %v2755_v61 = vld [vmem:[#allocation7 + $0x2a0] sm:$0xff] }
0x19c8   :  { %2620 = vrot.lane.b32.xlu1 %v2426_v35, %s4340_s16  ;;  %3942 = vmatprep.subr.bf16.mxu0 %v4333_v59  ;;  %v3997_v35 = vpack.c.bf16 %v2741_v34, %v2737_v33  ;;  %v3973_v0 = vpack.c.bf16 %v2755_v61, %v2751_v57  ;;  %v2779_v33 = vld [vmem:[#allocation7 + $0x360] sm:$0xff]  ;;  %v2798_v61 = vld [vmem:[#allocation7 + $0x3f8] sm:$0xff] }
0x19cb   :  { %3944 = vmatpush3.bf16.msra.mxu0 %v3943_v63  ;;  %v2757_v63 = vld [vmem:[#allocation7 + $0x2b0] sm:$0xff] }
0x19cc   :  { %3945 = vmatprep.subr.bf16.mxu0 %v4333_v59  ;;  %v4005_v2 = vpack.c.bf16 %v2757_v63, %v2753_v62  ;;  %v2791_v62 = vld [vmem:[#allocation7 + $0x3c0] sm:$0xff] }
0x19cf   :  { %3947 = vmatpush3.bf16.msra.mxu0 %v3946_v1  ;;  %v2764_v1 = vld [vmem:[#allocation7 + $0x2e8] sm:$0xff] }
0x19d0   :  { %3948 = vmatprep.subr.bf16.mxu0 %v4333_v59 }
0x19d3   :  { %3950 = vmatpush3.bf16.msra.mxu0 %v3949_v24  ;;  %v3975_v24 = vpack.c.bf16 %v2764_v1, %v2760_v19  ;;  %v2793_v19 = vld [vmem:[#allocation7 + $0x3d0] sm:$0xff] }
0x19d4   :  { %3951 = vmatprep.subr.bf16.mxu0 %v4333_v59  ;;  %v2797_v1 = vld [vmem:[#allocation7 + $0x3f0] sm:$0xff] }
0x19d7   :  { %3953 = vmatpush3.bf16.msra.mxu0 %v3952_v5 }
0x19d8   :  { %3954 = vmatprep.subr.bf16.mxu0 %v4333_v59 }
0x19db   :  { %3956 = vmatpush3.bf16.msra.mxu0 %v3955_v9 }
0x19dc   :  { %3957 = vmatprep.subr.bf16.mxu0 %v4333_v59 }
0x19df   :  { %3959 = vmatpush3.bf16.msra.mxu0 %v3958_v55  ;;  %v2761_v55 = vld [vmem:[#allocation7 + $0x2d0] sm:$0xff] }
0x19e0   :  { %3960 = vmatprep.subr.bf16.mxu0 %v4333_v59  ;;  %v2740_v59 = vld [vmem:[#allocation7 + $0x228] sm:$0xff] }
0x19e1   :  { %v3963_v30 = vpack.c.bf16 %v2740_v59, %v2736_v27  ;;  %v2769_v27 = vld [vmem:[#allocation7 + $0x310] sm:$0xff] }
0x19e2   :  { %v2773_v59 = vld [vmem:[#allocation7 + $0x330] sm:$0xff] }
0x19e3   :  { %v4013_v28 = vpack.c.bf16 %v2773_v59, %v2769_v27  ;;  %v2963_v59 = vld [vmem:[#allocation9 + $0x128] sm:$0xff] }
0x1a40   :  { %v2530_v43 = vpop.xlane.xlu1 %2529 }
0x1a41   :  { %v2531_v44 = vsub.f32 %v2527_v41, %v2530_v43  ;;  %v3999_v41 = vpack.c.bf16 %v2750_v45, %v2746_v37  ;;  %v2747_v43 = vld [vmem:[#allocation7 + $0x260] sm:$0xff]  ;;  %v2784_v37 = vld [vmem:[#allocation7 + $0x388] sm:$0xff] }
0x1a43   :  { %v2532_v51 = vmul.f32 1.442695, %v2531_v44  ;;  %v2745_v44 = vld [vmem:[#allocation7 + $0x250] sm:$0xff] }
0x1a44   :  { %v2540_v52 = vpop.permute.xlu1 %2539 }
0x1a45   :  { %4159 = vpow2.f32 %v2532_v51  ;;  %3636 = vmatpush3.msra.mxu1 %v2540_v52  ;;  %v3969_v51 = vpack.c.bf16 %v2747_v43, %v2743_v42  ;;  %v2749_v52 = vld [vmem:[#allocation7 + $0x270] sm:$0xff]  ;;  %v2790_v42 = vld [vmem:[#allocation7 + $0x3b8] sm:$0xff] }
0x1a46   :  { %3964 = vmatprep.subr.bf16.mxu1 %v3963_v30  ;;  %v2776_v30 = vld [vmem:[#allocation7 + $0x348] sm:$0xff] }
0x1a47   :  { %v3983_v23 = vpack.c.bf16 %v2780_v31, %v2776_v30  ;;  %v2980_v30 = vld [vmem:[#allocation9 + $0x1b0] sm:$0xff]  ;;  %v2981_v31 = vld [vmem:[#allocation9 + $0x1b8] sm:$0xff] }
0x1a48   :  { %v2621_v15 = vpop.permute.xlu1 %2620 }
0x1a4f   :  { %v4160_v53 = vpop.eup %4159 }
0x1a50   :  { %v2534_v16 = vsel %vm550_vm6, %v4160_v53, 0.0 }
0x1a51   :  { %2535 = vadd.xlane.f32.xlu0 %v2534_v16  ;;  %v2756_v16 = vld [vmem:[#allocation7 + $0x2a8] sm:$0xff] }
0x1a67   :  { %2616 = vrot.lane.b32.xlu0 %v2235_v29, %s4322_s22  ;;  %v2645_v29 = vld [vmem:[#allocation6 + $0xf0] sm:$0xff] }
0x1a68   :  { %v3961_v7 = vpack.c.bf16 %v2646_v60, %v2645_v29  ;;  %v3977_v29 = vpack.c.bf16 %v2763_v11, %v2759_v10  ;;  %v2765_v60 = vld [vmem:[#allocation7 + $0x2f0] sm:$0xff]  ;;  %v2974_v11 = vld [vmem:[#allocation9 + $0x180] sm:$0xff] }
0x1a6a   :  { %3962 = vmatpush3.bf16.msra.mxu0 %v3961_v7  ;;  %v4009_v7 = vpack.c.bf16 %v2765_v60, %v2761_v55  ;;  %v2975_v55 = vld [vmem:[#allocation9 + $0x188] sm:$0xff]  ;;  %v2958_v60 = vld [vmem:[#allocation9 + $0x100] sm:$0xff] }
0x1a6b   :  { %3996 = vmatprep.subr.bf16.mxu0 %v3995_v46  ;;  %v2782_v46 = vld [vmem:[#allocation7 + $0x378] sm:$0xff] }
0x1a6c   :  { %v4015_v34 = vpack.c.bf16 %v2782_v46, %v2778_v32  ;;  %v4039_v32 = vpack.c.bf16 %v2981_v31, %v2980_v30  ;;  %v2965_v46 = vld [vmem:[#allocation9 + $0x138] sm:$0xff] }
0x1ade   :  { %v2536_v39 = vpop.xlane.xlu0 %2535 }
0x1adf   :  { %4161 = vrcp.f32 %v2536_v39  ;;  %v4001_v39 = vpack.c.bf16 %v2749_v52, %v2745_v44  ;;  %v2787_v52 = vld [vmem:[#allocation7 + $0x3a0] sm:$0xff] }
0x1ae2   :  { %v2617_v14 = vpop.permute.xlu0 %2616 }
0x1ae3   :  { %v2627_v18 = vsel %vm471_vm4, %v4822_v8, %v2617_v14  ;;  %v2744_v8 = vld [vmem:[#allocation7 + $0x248] sm:$0xff]  ;;  %v2770_v14 = vld [vmem:[#allocation7 + $0x318] sm:$0xff] }
0x1ae4   :  { %v2628_v21 = vsel %vm1226_vm7, %v2627_v18, %v2621_v15  ;;  %v3967_v40 = vpack.c.bf16 %v2748_v36, %v2744_v8  ;;  %v2774_v18 = vld [vmem:[#allocation7 + $0x338] sm:$0xff]  ;;  %v2781_v36 = vld [vmem:[#allocation7 + $0x370] sm:$0xff] }
0x1ae9   :  { %v4162_v54 = vpop.eup %4161 }
0x1aea   :  { %v2538_v56 = vmul.f32 %v4162_v54, %v4160_v53  ;;  %v2752_v53 = vld [vmem:[#allocation7 + $0x288] sm:$0xff] }
0x1aeb   :  { %v3971_v54 = vpack.c.bf16 %v2756_v16, %v2752_v53  ;;  %v2785_v53 = vld [vmem:[#allocation7 + $0x390] sm:$0xff] }
0x1aec   :  { %3638 = vmatmul.mubr.msk.f32.vlgmr.msra.gmra.mrb[38].mxu1 %vm550_vm6, %v2538_v56  ;;  %v2754_v56 = vld [vmem:[#allocation7 + $0x298] sm:$0xff] }
0x1aed   :  { %2863 = vmatprep.mubr.f32.mxu1 %v4334_v48  ;;  %3966 = vmatpush1.bf16.msra.mxu1 %v3965_v17  ;;  %v4003_v58 = vpack.c.bf16 %v2758_v47, %v2754_v56  ;;  %v2775_v17 = vld [vmem:[#allocation7 + $0x340] sm:$0xff]  ;;  %v2796_v56 = vld [vmem:[#allocation7 + $0x3e8] sm:$0xff] }
0x1aee   :  { %3968 = vmatprep.subr.bf16.mxu1 %v3967_v40  ;;  %v3985_v8 = vpack.c.bf16 %v2779_v33, %v2775_v17  ;;  %v2788_v40 = vld [vmem:[#allocation7 + $0x3a8] sm:$0xff]  ;;  %v2982_v33 = vld [vmem:[#allocation9 + $0x1c0] sm:$0xff] }
0x1aef   :  { %v3987_v43 = vpack.c.bf16 %v2788_v40, %v2784_v37  ;;  %v2985_v40 = vld [vmem:[#allocation9 + $0x1d8] sm:$0xff] }
0x1af1   :  { %3970 = vmatpush1.bf16.msra.mxu1 %v3969_v51  ;;  %v2783_v51 = vld [vmem:[#allocation7 + $0x380] sm:$0xff] }
0x1af2   :  { %3972 = vmatprep.subr.bf16.mxu1 %v3971_v54  ;;  %v3989_v16 = vpack.c.bf16 %v2787_v52, %v2783_v51  ;;  %v2792_v54 = vld [vmem:[#allocation7 + $0x3c8] sm:$0xff]  ;;  %v2986_v51 = vld [vmem:[#allocation9 + $0x1e0] sm:$0xff] }
0x1af3   :  { %v3991_v57 = vpack.c.bf16 %v2796_v56, %v2792_v54  ;;  %v2987_v52 = vld [vmem:[#allocation9 + $0x1e8] sm:$0xff]  ;;  %v2988_v56 = vld [vmem:[#allocation9 + $0x1f0] sm:$0xff] }
0x1af5   :  { %3974 = vmatpush1.bf16.msra.mxu1 %v3973_v0  ;;  %v2795_v0 = vld [vmem:[#allocation7 + $0x3e0] sm:$0xff] }
0x1af6   :  { %3976 = vmatprep.subr.bf16.mxu1 %v3975_v24  ;;  %v3993_v20 = vpack.c.bf16 %v2795_v0, %v2791_v62 }
0x1af9   :  { %3978 = vmatpush1.bf16.msra.mxu1 %v3977_v29  ;;  %v4027_v29 = vpack.c.bf16 %v2975_v55, %v2974_v11 }
0x1bbf   :  { %v2611_v12 = vpop.f32.mrb[38].mxu1 }
0x1bc0   :  { %2624 = vrot.lane.b32.xlu1 %v2611_v12, %s4338_s14  ;;  %v3639_v13 = vpop.f32.mrb[39].mxu1  ;;  %v2768_v12 = vld [vmem:[#allocation7 + $0x308] sm:$0xff] }
0x1bc1   :  { %v2772_v13 = vld [vmem:[#allocation7 + $0x328] sm:$0xff] }
0x1bc2   :  { %v3979_v15 = vpack.c.bf16 %v2772_v13, %v2768_v12  ;;  %v2976_v13 = vld [vmem:[#allocation9 + $0x190] sm:$0xff] }
0x1bc4   :  { %3980 = vmatprep.subr.bf16.mxu1 %v3979_v15 }
0x1c32   :  { %v2625_v25 = vpop.permute.xlu1 %2624 }
0x1c33   :  { %v2629_v26 = vsel %vm1228_vm8, %v2628_v21, %v2625_v25  ;;  %v2771_v21 = vld [vmem:[#allocation7 + $0x320] sm:$0xff]  ;;  %v4011_v25 = vpack.c.bf16 %v2774_v18, %v2770_v14  ;;  %v2977_v14 = vld [vmem:[#allocation9 + $0x198] sm:$0xff]  ;;  %v2960_v18 = vld [vmem:[#allocation9 + $0x110] sm:$0xff] }
0x1c34   :  { %3673 = vmatmul.mubr.f32.vlgmr.msra.gmra.mrb[10].mxu0 %v2629_v26  ;;  %v4031_v15 = vpack.c.bf16 %v2977_v14, %v2976_v13  ;;  %v3081_v13 = vld [vmem:[#allocation10 + $0x18] sm:$0xff]  ;;  %v3078_v14 = vld [vmem:[#allocation10] sm:$0xff] }
0x1c35   :  { %2934 = vmatprep.mubr.f32.mxu0 %v4334_v48  ;;  %3998 = vmatpush1.bf16.msra.mxu0 %v3997_v35  ;;  %v2777_v35 = vld [vmem:[#allocation7 + $0x350] sm:$0xff] }
0x1c36   :  { %4000 = vmatprep.subr.bf16.mxu0 %v3999_v41  ;;  %v4017_v45 = vpack.c.bf16 %v2781_v36, %v2777_v35  ;;  %v2786_v41 = vld [vmem:[#allocation7 + $0x398] sm:$0xff]  ;;  %v2966_v35 = vld [vmem:[#allocation9 + $0x140] sm:$0xff]  ;;  %v2967_v36 = vld [vmem:[#allocation9 + $0x148] sm:$0xff] }
0x1c37   :  { %v4019_v44 = vpack.c.bf16 %v2790_v42, %v2786_v41  ;;  %v4045_v37 = vpack.c.bf16 %v2967_v36, %v2966_v35  ;;  %v2968_v42 = vld [vmem:[#allocation9 + $0x150] sm:$0xff] }
0x1c39   :  { %4002 = vmatpush1.bf16.msra.mxu0 %v4001_v39  ;;  %v2789_v39 = vld [vmem:[#allocation7 + $0x3b0] sm:$0xff] }
0x1c3a   :  { %4004 = vmatprep.subr.bf16.mxu0 %v4003_v58  ;;  %v4021_v47 = vpack.c.bf16 %v2789_v39, %v2785_v53  ;;  %v2794_v58 = vld [vmem:[#allocation7 + $0x3d8] sm:$0xff]  ;;  %v4051_v53 = vpack.c.bf16 %v2987_v52, %v2986_v51  ;;  %v2971_v39 = vld [vmem:[#allocation9 + $0x168] sm:$0xff] }
0x1c3b   :  { %v4023_v63 = vpack.c.bf16 %v2798_v61, %v2794_v58  ;;  %v2972_v58 = vld [vmem:[#allocation9 + $0x170] sm:$0xff]  ;;  %v2973_v61 = vld [vmem:[#allocation9 + $0x178] sm:$0xff] }
0x1c3c   :  { %v4057_v62 = vpack.c.bf16 %v2973_v61, %v2972_v58  ;;  %v3097_v51 = vld [vmem:[#allocation10 + $0x98] sm:$0xff]  ;;  %v3103_v58 = vld [vmem:[#allocation10 + $0xc8] sm:$0xff] }
0x1c3d   :  { %4006 = vmatpush1.bf16.msra.mxu0 %v4005_v2  ;;  %v4025_v2 = vpack.c.bf16 %v2797_v1, %v2793_v19  ;;  %v3105_v61 = vld [vmem:[#allocation10 + $0xd8] sm:$0xff] }
0x1c3e   :  { %4008 = vmatprep.subr.bf16.mxu0 %v4007_v4 }
0x1c41   :  { %4010 = vmatpush1.bf16.msra.mxu0 %v4009_v7  ;;  %v2959_v7 = vld [vmem:[#allocation9 + $0x108] sm:$0xff] }
0x1c42   :  { %4012 = vmatprep.subr.bf16.mxu0 %v4011_v25  ;;  %v4029_v12 = vpack.c.bf16 %v2959_v7, %v2958_v60  ;;  %v2978_v25 = vld [vmem:[#allocation9 + $0x1a0] sm:$0xff] }
0x1c45   :  { %4014 = vmatpush1.bf16.msra.mxu0 %v4013_v28 }
0x1c46   :  { %4016 = vmatprep.subr.bf16.mxu0 %v4015_v34  ;;  %v2983_v34 = vld [vmem:[#allocation9 + $0x1c8] sm:$0xff] }
0x1c49   :  { %4018 = vmatpush1.bf16.msra.mxu0 %v4017_v45  ;;  %v2984_v45 = vld [vmem:[#allocation9 + $0x1d0] sm:$0xff] }
0x1c4a   :  { %4020 = vmatprep.subr.bf16.mxu0 %v4019_v44  ;;  %v4047_v41 = vpack.c.bf16 %v2985_v40, %v2984_v45  ;;  %v3093_v45 = vld [vmem:[#allocation10 + $0x78] sm:$0xff] }
0x1c4d   :  { %4022 = vmatpush1.bf16.msra.mxu0 %v4021_v47  ;;  %v2989_v47 = vld [vmem:[#allocation9 + $0x1f8] sm:$0xff] }
0x1c4e   :  { %4024 = vmatprep.subr.bf16.mxu0 %v4023_v63 }
0x1c51   :  { %4026 = vmatpush1.bf16.msra.mxu0 %v4025_v2 }
0x1d07   :  { %v2713_v5 = vpop.f32.mrb[10].mxu0 }
0x1d08   :  { %v4896_v6 = vadd.f32 %v2713_v5, %v4723_v49  ;;  %v3674_v22 = vpop.f32.mrb[11].mxu0  ;;  %v2767_v49 = vld [vmem:[#allocation7 + $0x300] sm:$0xff] }
0x1d09   :  { %v3981_v26 = vpack.c.bf16 %v2771_v21, %v2767_v49  ;;  %v3248_v22 = vld [vmem:[%s4921_s7 + $0x1] ss:$0 sm:$0xff]  ;;  %v2961_v49 = vld [vmem:[#allocation9 + $0x118] sm:$0xff] }
0x1d0a   :  { %v2720_v9 = vmul.f32 %v4896_v6, %v4896_v6  ;;  %v4033_v21 = vpack.c.bf16 %v2961_v49, %v2960_v18  ;;  %v3080_v18 = vld [vmem:[#allocation10 + $0x10] sm:$0xff]  ;;  %v3083_v49 = vld [vmem:[#allocation10 + $0x28] sm:$0xff] }
0x1d0b   :  { %3982 = vmatpush1.bf16.msra.mxu1 %v3981_v26  ;;  %v2979_v26 = vld [vmem:[#allocation9 + $0x1a8] sm:$0xff] }
0x1d0c   :  { %2721 = vadd.xlane.f32.xlu1 %v2720_v9  ;;  %3984 = vmatprep.subr.bf16.mxu1 %v3983_v23  ;;  %v4035_v27 = vpack.c.bf16 %v2979_v26, %v2978_v25  ;;  %v2964_v23 = vld [vmem:[#allocation9 + $0x130] sm:$0xff]  ;;  %v4061_v25 = vpack.c.bf16 %v3080_v18, %v3078_v14 }
0x1d0d   :  { %v4041_v17 = vpack.c.bf16 %v2965_v46, %v2964_v23  ;;  %v3088_v23 = vld [vmem:[#allocation10 + $0x50] sm:$0xff] }
0x1d0f   :  { %3986 = vmatpush1.bf16.msra.mxu1 %v3985_v8  ;;  %v4043_v8 = vpack.c.bf16 %v2983_v34, %v2982_v33 }
0x1d10   :  { %3988 = vmatprep.subr.bf16.mxu1 %v3987_v43  ;;  %v2969_v43 = vld [vmem:[#allocation9 + $0x158] sm:$0xff] }
0x1d11   :  { %v4049_v44 = vpack.c.bf16 %v2969_v43, %v2968_v42  ;;  %v3092_v42 = vld [vmem:[#allocation10 + $0x70] sm:$0xff] }
0x1d13   :  { %3990 = vmatpush1.bf16.msra.mxu1 %v3989_v16  ;;  %v2970_v16 = vld [vmem:[#allocation9 + $0x160] sm:$0xff] }
0x1d14   :  { %3992 = vmatprep.subr.bf16.mxu1 %v3991_v57  ;;  %v4053_v54 = vpack.c.bf16 %v2971_v39, %v2970_v16  ;;  %v4055_v57 = vpack.c.bf16 %v2989_v47, %v2988_v56  ;;  %v3096_v16 = vld [vmem:[#allocation10 + $0x90] sm:$0xff]  ;;  %v3099_v39 = vld [vmem:[#allocation10 + $0xa8] sm:$0xff]  ;;  %v3098_v56 = vld [vmem:[#allocation10 + $0xa0] sm:$0xff] }
0x1d15   :  { %v3100_v47 = vld [vmem:[#allocation10 + $0xb0] sm:$0xff] }
0x1d17   :  { %3994 = vmatpush1.bf16.msra.mxu1 %v3993_v20 }
0x1d18   :  { %4028 = vmatprep.subr.bf16.mxu1 %v4027_v29 }
0x1d99   :  { %v2722_v24 = vpop.xlane.xlu1 %2721 }
0x1d9a   :  { %v2723_v3 = vmul.f32 0.0078125, %v2722_v24 }
0x1d9c   :  { %v2724_v4 = vadd.f32 1e-05, %v2723_v3 }
0x1d9e   :  { %4163 = vrsqrt.f32 %v2724_v4 }
0x1da8   :  { %v4164_v5 = vpop.eup %4163 }
0x1da9   :  { %v2726_v9 = vmul.f32 %v4164_v5, %v4896_v6 }
0x1dab   :  { %v2733_v10 = vmul.f32 %v3248_v22, %v2726_v9 }
0x1dad   :  { %2864 = vmatmul.mubr.f32.vlgmr.msra.gmra.mrb[40].mxu1 %v2733_v10  ;;  %2935 = vmatmul.mubr.f32.vlgmr.msra.gmra.mrb[12].mxu0 %v2733_v10 }
0x1dae   :  { %3177 = vmatprep.mubr.f32.mxu0 %v4334_v48  ;;  %4030 = vmatpush3.bf16.msra.mxu1 %v4029_v12  ;;  %v2962_v48 = vld [vmem:[#allocation9 + $0x120] sm:$0xff]  ;;  %v3079_v12 = vld [vmem:[#allocation10 + $0x8] sm:$0xff] }
0x1daf   :  { %4032 = vmatprep.subr.bf16.mxu1 %v4031_v15  ;;  %v4037_v28 = vpack.c.bf16 %v2963_v59, %v2962_v48  ;;  %v4059_v15 = vpack.c.bf16 %v3081_v13, %v3079_v12  ;;  %v3084_v48 = vld [vmem:[#allocation10 + $0x30] sm:$0xff]  ;;  %v3087_v59 = vld [vmem:[#allocation10 + $0x48] sm:$0xff]  ;;  %v4341_v12 = vmov 1966171168  }
0x1db0   :  { %v3188_v13 = vunpack.c.l.s4 %v4341_v12 }
0x1db1   :  { %4060 = vmatprep.subr.bf16.mxu0 %v4059_v15 }
0x1db2   :  { %4034 = vmatpush3.bf16.msra.mxu1 %v4033_v21  ;;  %v3085_v21 = vld [vmem:[#allocation10 + $0x38] sm:$0xff]  ;;  %4062 = vmatpush1.bf16.msra.mxu0 %v4061_v25  ;;  %v3189_v14 = vunpack.c.0.s8 %v3188_v13 }
0x1db3   :  { %4036 = vmatprep.subr.bf16.mxu1 %v4035_v27  ;;  %v4063_v26 = vpack.c.bf16 %v3085_v21, %v3083_v49  ;;  %v3082_v27 = vld [vmem:[#allocation10 + $0x20] sm:$0xff] }
0x1db4   :  { %v4065_v30 = vpack.c.bf16 %v3084_v48, %v3082_v27  ;;  %v3192_v18 = vsub.s32 %v3189_v14, %v4581_v38 }
0x1db5   :  { %4064 = vmatprep.subr.bf16.mxu0 %v4063_v26 }
0x1db6   :  { %4038 = vmatpush3.bf16.msra.mxu1 %v4037_v28  ;;  %v3089_v28 = vld [vmem:[#allocation10 + $0x58] sm:$0xff]  ;;  %4066 = vmatpush1.bf16.msra.mxu0 %v4065_v30 }
0x1db7   :  { %4040 = vmatprep.subr.bf16.mxu1 %v4039_v32  ;;  %v4067_v31 = vpack.c.bf16 %v3089_v28, %v3087_v59  ;;  %v3086_v32 = vld [vmem:[#allocation10 + $0x40] sm:$0xff] }
0x1db8   :  { %v4069_v46 = vpack.c.bf16 %v3088_v23, %v3086_v32 }
0x1db9   :  { %4068 = vmatprep.subr.bf16.mxu0 %v4067_v31 }
0x1dba   :  { %4042 = vmatpush3.bf16.msra.mxu1 %v4041_v17  ;;  %4070 = vmatpush1.bf16.msra.mxu0 %v4069_v46 }
0x1dbb   :  { %4044 = vmatprep.subr.bf16.mxu1 %v4043_v8 }
0x1dbe   :  { %4046 = vmatpush3.bf16.msra.mxu1 %v4045_v37  ;;  %v3091_v37 = vld [vmem:[#allocation10 + $0x68] sm:$0xff] }
0x1dbf   :  { %4048 = vmatprep.subr.bf16.mxu1 %v4047_v41  ;;  %v4071_v40 = vpack.c.bf16 %v3093_v45, %v3091_v37  ;;  %v3090_v41 = vld [vmem:[#allocation10 + $0x60] sm:$0xff] }
0x1dc0   :  { %v4073_v43 = vpack.c.bf16 %v3092_v42, %v3090_v41 }
0x1dc1   :  { %4072 = vmatprep.subr.bf16.mxu0 %v4071_v40 }
0x1dc2   :  { %4050 = vmatpush3.bf16.msra.mxu1 %v4049_v44  ;;  %4074 = vmatpush1.bf16.msra.mxu0 %v4073_v43  ;;  %v3095_v44 = vld [vmem:[#allocation10 + $0x88] sm:$0xff] }
0x1dc3   :  { %4052 = vmatprep.subr.bf16.mxu1 %v4051_v53  ;;  %v4075_v52 = vpack.c.bf16 %v3097_v51, %v3095_v44  ;;  %v3094_v53 = vld [vmem:[#allocation10 + $0x80] sm:$0xff] }
0x1dc5   :  { %4076 = vmatprep.subr.bf16.mxu0 %v4075_v52 }
0x1dc6   :  { %4054 = vmatpush3.bf16.msra.mxu1 %v4053_v54  ;;  %v4077_v54 = vpack.c.bf16 %v3096_v16, %v3094_v53 }
0x1dc7   :  { %4056 = vmatprep.subr.bf16.mxu1 %v4055_v57 }
0x1dc8   :  { %4078 = vmatpush1.bf16.msra.mxu0 %v4077_v54 }
0x1dca   :  { %4058 = vmatpush3.bf16.msra.mxu1 %v4057_v62  ;;  %v4081_v62 = vpack.c.bf16 %v3100_v47, %v3098_v56 }
0x1e80   :  { %v2865_v63 = vpop.f32.mrb[40].mxu1  ;;  %v2936_v0 = vpop.f32.mrb[12].mxu0 }
0x1e81   :  { %v2941_v19 = vsub.f32 0.0, %v2865_v63  ;;  %v2867_v1 = vpop.f32.mrb[41].mxu1  ;;  %v2938_v20 = vpop.f32.mrb[13].mxu0 }
0x1e82   :  { %v2942_v2 = vsub.f32 0.0, %v2867_v1 }
0x1e83   :  { %v2943_v24 = vmul.f32 1.442695, %v2941_v19  ;;  %v3104_v19 = vld [vmem:[#allocation10 + $0xd0] sm:$0xff] }
0x1e84   :  { %v2945_v3 = vmul.f32 1.442695, %v2942_v2 }
0x1e85   :  { %4165 = vpow2.f32 %v2943_v24 }
0x1e86   :  { %4167 = vpow2.f32 %v2945_v3  ;;  %v3106_v3 = vld [vmem:[#allocation10 + $0xe0] sm:$0xff] }
0x1e8f   :  { %v4166_v4 = vpop.eup %4165 }
0x1e90   :  { %v4168_v5 = vpop.eup %4167  ;;  %v2947_v22 = vadd.f32 1.0, %v4166_v4  ;;  %v3108_v4 = vld [vmem:[#allocation10 + $0xf0] sm:$0xff] }
0x1e91   :  { %v2948_v9 = vadd.f32 1.0, %v4168_v5  ;;  %v4089_v5 = vpack.c.bf16 %v3108_v4, %v3106_v3 }
0x1e92   :  { %4169 = vrcp.f32 %v2947_v22 }
0x1e93   :  { %4171 = vrcp.f32 %v2948_v9 }
0x1e9c   :  { %v4170_v10 = vpop.eup %4169 }
0x1e9d   :  { %v4172_v11 = vpop.eup %4171  ;;  %v2953_v55 = vmul.f32 %v4170_v10, %v2865_v63  ;;  %v4083_v63 = vpack.c.bf16 %v3105_v61, %v3103_v58 }
0x1e9e   :  { %v2954_v29 = vmul.f32 %v4172_v11, %v2867_v1  ;;  %v3107_v1 = vld [vmem:[#allocation10 + $0xe8] sm:$0xff] }
0x1e9f   :  { %v2955_v60 = vmul.f32 %v2953_v55, %v2936_v0  ;;  %v3102_v0 = vld [vmem:[#allocation10 + $0xc0] sm:$0xff] }
0x1ea0   :  { %v2956_v7 = vmul.f32 %v2954_v29, %v2938_v20  ;;  %v3109_v20 = vld [vmem:[#allocation10 + $0xf8] sm:$0xff]  ;;  %v4085_v2 = vpack.c.bf16 %v3104_v19, %v3102_v0  ;;  %v3249_v55 = vld [vmem:[%s4924_s10] ss:$0 sm:$0xff] }
0x1ea1   :  { %v4087_v24 = vpack.c.bf16 %v3109_v20, %v3107_v1 }
0x1ea2   :  { %3054 = vmatprep.mubr.f32.mxu1 %v2956_v7 }
0x1ea3   :  { %3055 = vmatmul.mubr.f32.vlgmr.msra.gmra.mrb[42].mxu1 %v2955_v60 }
0x1f76   :  { %v3452_v17 = vpop.f32.mrb[42].mxu1 }
0x1f77   :  { %v3453_v33 = vpop.f32.mrb[43].mxu1 }
0x1f78   :  { %v3454_v34 = vadd.f32 %v3453_v33, %v3452_v17 }
0x1f7a   :  { %v3060_v8 = vadd.f32 %v3454_v34, %v4896_v6  ;;  %v3101_v6 = vld [vmem:[#allocation10 + $0xb8] sm:$0xff] }
0x1f7b   :  { %v4079_v57 = vpack.c.bf16 %v3101_v6, %v3099_v39 }
0x1f7c   :  { %v3062_v35 = vmul.f32 %v3060_v8, %v3060_v8 }
0x1f7d   :  { %4080 = vmatprep.subr.bf16.mxu0 %v4079_v57 }
0x1f7e   :  { %v3064_v36 = vsel %vm3063_vm9, %v3062_v35, 0.0  ;;  %4082 = vmatpush1.bf16.msra.mxu0 %v4081_v62 }
0x1f7f   :  { %3065 = vadd.xlane.f32.xlu0 %v3064_v36  ;;  %4084 = vmatprep.subr.bf16.mxu0 %v4083_v63 }
0x1f82   :  { %4086 = vmatpush1.bf16.msra.mxu0 %v4085_v2 }
0x1f83   :  { %4088 = vmatprep.subr.bf16.mxu0 %v4087_v24 }
0x1f86   :  { %4090 = vmatpush1.bf16.msra.mxu0 %v4089_v5 }
0x200c   :  { %v3066_v22 = vpop.xlane.xlu0 %3065 }
0x200d   :  { %v3067_v9 = vmul.f32 0.0078125, %v3066_v22 }
0x200f   :  { %v3068_v10 = vadd.f32 1e-05, %v3067_v9 }
0x2011   :  { %4173 = vrsqrt.f32 %v3068_v10 }
0x201b   :  { %v4174_v11 = vpop.eup %4173 }
0x201c   :  { %v3070_v29 = vmul.f32 %v4174_v11, %v3060_v8 }
0x201e   :  { %v3077_v60 = vmul.f32 %v3249_v55, %v3070_v29 }
0x2020   :  { %v3111_v7 = vrot.slane %v3077_v60, 7 }
0x2022   :  { %3178 = vmatmul.mubr.f32.vlgmr.msra.gmra.mrb[14].mxu0 %v3111_v7 }
0x20f5   :  { %v3179_v15 = vpop.f32.mrb[14].mxu0 }
0x20f6   :  { %v3181_v49 = vpop.f32.mrb[15].mxu0 }
0x20f7   :  { %v3186_v21 = vcombine.low %v3179_v15, %v3181_v49 }
0x20f9   :  { %v3193_v25 = vrot.slane %v3186_v21, %v3192_v18 }
0x20fb   :  { %v3200_v26 = vrot.slane %v3193_v25, %v3192_v18 }
0x20fd   :  { %3206 = vst.msk [vmem:[%s4926_s12] sm:$0x3] %vm3204_vm10, %v3200_v26 }
0x20fe   :  { %3211 = vsyncpa [#allocation3], 1 }
0x20ff   :  { %3212 = vsyncpa [#allocation5], 1 }
0x2100   :  { %3213 = vsyncpa [#allocation8], 1 }
0x2101   :  { %3214 = vsyncpa [#allocation11], 1 }

</bundles_post_ra>
